<compile_context>
chip_gen: v7x
topology: tpu7x:2x2x1
jax: 0.10.0
libtpu: 0.0.40
codegen_flags: <defaults>
</compile_context>

<pallas_src>
import math

import jax
import jax.numpy as jnp
from jax.experimental import pallas as pl
from jax.experimental.pallas import tpu as pltpu

# Older/newer JAX naming robustness.
_CompilerParams = getattr(pltpu, "CompilerParams", None) or getattr(
    pltpu, "TPUCompilerParams")


# ----------------------------------------------------------------------------
# Pallas kernel: one MuxGNN layer (GIN per relation + semantic attention fuse)
# Grid = (N//TILE_M  [parallel],  N//TILE_K  [arbitrary/reduction]).
# ----------------------------------------------------------------------------
def _muxgnn_layer_kernel(adj_ref, xk_ref, xdst_ref, w1_ref, b1_ref, w2_ref,
                         b2_ref, ws1_ref, ws2_ref, h_out_ref, *rest):
    if len(rest) == 2:
        attn_ref, acc_ref = rest
    else:
        attn_ref = None
        (acc_ref,) = rest

    R, tm, tk = adj_ref.shape           # (R, TILE_M, TILE_K) int8 block
    d_in = xk_ref.shape[1]
    d_out = w1_ref.shape[1]

    k = pl.program_id(1)
    nk = pl.num_programs(1)

    @pl.when(k == 0)
    def _init():
        acc_ref[...] = jnp.zeros_like(acc_ref)

    # --- Stacked GIN aggregation, native bf16 MXU GEMM, f32 accumulation.
    # int8 (0/1) adjacency block -> bf16 (exact); no f32 copy is made.
    adj_bf16 = adj_ref[...].astype(jnp.bfloat16).reshape(R * tm, tk)
    acc_ref[...] += jnp.dot(adj_bf16, xk_ref[...],
                            preferred_element_type=jnp.float32)

    @pl.when(k == nk - 1)
    def _finish():
        # agg_r = x_dst + A[r] @ x   (broadcast add over the R axis; no tile).
        agg = (acc_ref[...].reshape(R, tm, d_in)
               + xdst_ref[...][None]).reshape(R * tm, d_in)

        # --- apply_func MLP (shared weights), fused across relations.
        h1 = jnp.maximum(
            jnp.dot(agg, w1_ref[...], preferred_element_type=jnp.float32)
            + b1_ref[...], 0.0)
        h = jnp.maximum(
            jnp.dot(h1, w2_ref[...], preferred_element_type=jnp.float32)
            + b2_ref[...], 0.0)                          # (R*TILE_M, D_out)
        h3 = h.reshape(R, tm, d_out)

        # --- Semantic attention: one batched score GEMM over R, then a VPU
        # multiply + lane reduction for the width-1 (dim_a -> 1) projection.
        t = jnp.tanh(jnp.einsum('rnd,rda->rna', h3, ws1_ref[...],
                                preferred_element_type=jnp.float32))
        s = jnp.sum(t * ws2_ref[...], axis=-1, keepdims=True)   # (R, TM, 1)

        # Softmax over relations; EUP approx reciprocal + one Newton step.
        m = jnp.max(s, axis=0, keepdims=True)
        e = jnp.exp(s - m)
        denom = jnp.sum(e, axis=0, keepdims=True)
        inv = pl.reciprocal(denom, approx=True)
        inv = inv * (2.0 - denom * inv)
        attn = e * inv                                           # (R, TM, 1)

        h_out_ref[...] = jnp.sum(attn * h3, axis=0)              # (TM, D_out)
        if attn_ref is not None:
            # Dense (TILE_M, R) slab; transposed to (R, N) in the wrapper.
            attn_ref[...] = jnp.concatenate([attn[r] for r in range(R)],
                                            axis=1)


# ----------------------------------------------------------------------------
# VMEM budget / tile picker (single source for the picker and vmem_limit).
# ----------------------------------------------------------------------------
def _vmem_budget():
    cap = 64 * 1024 * 1024
    try:
        cap = int(pltpu.get_tpu_info().vmem_capacity_bytes)
    except Exception:
        pass
    # <= 3/4 of capacity, capped at 64 MiB: 48 MiB on v7x (64 MiB/TC physical),
    # 64 MiB on v5e/v6e (128 MiB physical) -> big tiles, still headroom.
    return min((cap * 3) // 4, 64 * 1024 * 1024)


def _vmem_use(R, d_in, d_out, dim_a, tm, tk):
    adj_i8 = 2 * R * tm * tk                 # int8 block, double-buffered
    adj_bf = 2 * R * tm * tk                 # in-kernel bf16 cast of the block
    x_k = 2 * tk * d_in * 2                  # bf16 X K-block, double-buffered
    x_m = 2 * tm * d_in * 4                  # f32 dst rows, double-buffered
    acc = R * tm * d_in * 4                  # f32 accumulator scratch
    wts = 2 * 4 * (d_in * d_out + d_out * d_out + 2 * d_out
                   + R * d_out * dim_a + R * dim_a)
    work = 4 * R * tm * (d_in + 2 * d_out + 2 * dim_a + 4)   # MLP/attn temps
    outs = 2 * 4 * tm * (d_out + R)
    return adj_i8 + adj_bf + x_k + x_m + acc + wts + work + outs


def _pick_tiles(R, N, d_in, d_out, dim_a, budget):
    if N % 128 != 0:
        return N, N                          # single full-extent block fallback
    tms = [t for t in (2048, 1024, 512, 256, 128) if N % t == 0]
    two = [t for t in tms if N // t >= 2]    # >= 2 "parallel" steps (v7x 2 TCs)
    tms = two if two else tms
    tks, seen = [], set()
    for t in (N, 4096, 2048, 1024, 512, 256, 128):
        if t <= N and N % t == 0 and t not in seen:
            seen.add(t)
            tks.append(t)
    for tk in tks:                           # prefer full-N rows, then big TM
        for tm in tms:
            if _vmem_use(R, d_in, d_out, dim_a, tm, tk) <= budget:
                return tm, tk
    return tms[-1], tks[-1]


# ----------------------------------------------------------------------------
# Wrappers
# ----------------------------------------------------------------------------
def muxgnn_layer_forward(adj, x, params, return_attn=False,
                         tile_m=None, tile_k=None):
    """One MuxGNNLayer forward. adj: (R, N, N) 0/1 adjacency, x: (N, D_in) f32."""
    R, N, N2 = adj.shape
    assert N == N2
    d_in = x.shape[1]
    d_out = params["w1"].shape[1]
    dim_a = params["ws1"].shape[2]

    budget = _vmem_budget()
    auto_tm, auto_tk = _pick_tiles(R, N, d_in, d_out, dim_a, budget)
    tm = auto_tm if tile_m is None else tile_m
    tk = auto_tk if tile_k is None else tile_k
    assert N % tm == 0 and N % tk == 0
    grid = (N // tm, N // tk)

    # Adjacency compressed to int8 in HBM (exact only for 0/1 entries; gate
    # this cast if adjacency ever becomes weighted).  X streamed bf16 for the
    # aggregation GEMM; f32 X kept for the exact self (dst) term.
    if adj.dtype != jnp.int8:
        adj = adj.astype(jnp.int8)
    x_bf16 = x.astype(jnp.bfloat16)
    # ws2: (R, dim_a, 1) -> (R, 1, dim_a) row form for the VPU reduction.
    ws2_row = jnp.transpose(params["ws2"], (0, 2, 1))

    def const_spec(shape):
        nd = len(shape)
        return pl.BlockSpec(shape, lambda i, k, _nd=nd: (0,) * _nd)

    in_specs = [
        pl.BlockSpec((R, tm, tk), lambda i, k: (0, i, k)),   # adjacency block
        pl.BlockSpec((tk, d_in), lambda i, k: (k, 0)),       # X bf16 (K tile)
        pl.BlockSpec((tm, d_in), lambda i, k: (i, 0)),       # X f32 dst rows
        const_spec((d_in, d_out)),                           # w1
        const_spec((1, d_out)),                              # b1
        const_spec((d_out, d_out)),                          # w2
        const_spec((1, d_out)),                              # b2
        const_spec((R, d_out, dim_a)),                       # ws1
        const_spec((R, 1, dim_a)),                           # ws2 (row form)
    ]

    if return_attn:
        out_shape = (jax.ShapeDtypeStruct((N, d_out), jnp.float32),
                     jax.ShapeDtypeStruct((N, R), jnp.float32))
        out_specs = (pl.BlockSpec((tm, d_out), lambda i, k: (i, 0)),
                     pl.BlockSpec((tm, R), lambda i, k: (i, 0)))
    else:
        out_shape = jax.ShapeDtypeStruct((N, d_out), jnp.float32)
        out_specs = pl.BlockSpec((tm, d_out), lambda i, k: (i, 0))

    call = pl.pallas_call(
        _muxgnn_layer_kernel,
        out_shape=out_shape,
        grid=grid,
        in_specs=in_specs,
        out_specs=out_specs,
        scratch_shapes=[pltpu.VMEM((R * tm, d_in), jnp.float32)],
        compiler_params=_CompilerParams(
            dimension_semantics=("parallel", "arbitrary"),
            vmem_limit_bytes=budget),
    )
    outs = call(adj, x_bf16, x, params["w1"], params["b1"], params["w2"],
                params["b2"], params["ws1"], ws2_row)

    if return_attn:
        h, attn_nr = outs
        return h, attn_nr.T                 # (R, N), matching torch .squeeze()
    return outs


def muxgnn_forward(adjs_per_layer, feat, params_list, return_attn=False,
                   tile_m=None, tile_k=None):
    """Full MuxGNN forward over num_gnn_layers layers."""
    h = feat
    attn = None
    n_layers = len(params_list)
    for li, (adj, p) in enumerate(zip(adjs_per_layer, params_list)):
        want_attn = return_attn and (li == n_layers - 1)
        if want_attn:
            h, attn = muxgnn_layer_forward(adj, h, p, return_attn=True,
                                           tile_m=tile_m, tile_k=tile_k)
        else:
            h = muxgnn_layer_forward(adj, h, p, return_attn=False,
                                     tile_m=tile_m, tile_k=tile_k)
    if return_attn:
        return h, attn
    return h


# ----------------------------------------------------------------------------
# Deterministic parameter init (shapes follow the PyTorch module __init__)
# ----------------------------------------------------------------------------
def make_layer_params(key, num_relations, in_dim, out_dim, dim_a):
    k1, k2, k3, k4, k5, k6 = jax.random.split(key, 6)

    # GIN apply_func MLP: Linear(in_dim, out_dim), Linear(out_dim, out_dim)
    bnd1 = 1.0 / math.sqrt(in_dim)
    w1 = jax.random.uniform(k1, (in_dim, out_dim), jnp.float32, -bnd1, bnd1)
    b1 = jax.random.uniform(k2, (1, out_dim), jnp.float32, -bnd1, bnd1)
    bnd2 = 1.0 / math.sqrt(out_dim)
    w2 = jax.random.uniform(k3, (out_dim, out_dim), jnp.float32, -bnd2, bnd2)
    b2 = jax.random.uniform(k4, (1, out_dim), jnp.float32, -bnd2, bnd2)

    # SemanticAttentionEinsum weights: (R, out_dim, dim_a) and (R, dim_a, 1)
    gain_tanh = 5.0 / 3.0
    fan_in1, fan_out1 = out_dim * dim_a, num_relations * dim_a
    a1 = gain_tanh * math.sqrt(6.0 / (fan_in1 + fan_out1))
    ws1 = jax.random.uniform(k5, (num_relations, out_dim, dim_a),
                             jnp.float32, -a1, a1)
    fan_in2, fan_out2 = dim_a * 1, num_relations * 1
    a2 = math.sqrt(6.0 / (fan_in2 + fan_out2))
    ws2 = jax.random.uniform(k6, (num_relations, dim_a, 1),
                             jnp.float32, -a2, a2)

    return {"w1": w1, "b1": b1, "w2": w2, "b2": b2, "ws1": ws1, "ws2": ws2}


# ----------------------------------------------------------------------------
# Pure-JAX references.
#   bf16_agg=False : the exact f32 spec (PyTorch semantics).
#   bf16_agg=True  : matches the kernel's bf16-streamed X in the aggregation
#                    (self term stays f32), for a tight numerical check.
# ----------------------------------------------------------------------------
def _ref_layer(adj, x, p, bf16_agg=False):
    hp = jax.lax.Precision.HIGHEST
    x_src = x.astype(jnp.bfloat16).astype(jnp.float32) if bf16_agg else x
    neigh = jnp.einsum('rij,jd->rid', adj, x_src, precision=hp)
    agg = x[None, :, :] + neigh
    h1 = jax.nn.relu(jnp.einsum('rnd,de->rne', agg, p["w1"], precision=hp)
                     + p["b1"][None])
    h = jax.nn.relu(jnp.einsum('rnd,de->rne', h1, p["w2"], precision=hp)
                    + p["b2"][None])
    s = jnp.einsum('rna,rak->rnk',
                   jnp.tanh(jnp.einsum('rnd,rda->rna', h, p["ws1"],
                                       precision=hp)),
                   p["ws2"], precision=hp)                 # (R, N, 1)
    attn = jax.nn.softmax(s, axis=0)[..., 0]               # (R, N)
    out = jnp.einsum('rn,rnd->nd', attn, h, precision=hp)
    return out, attn


def _ref_forward(adj, feat, params_list, bf16_agg):
    h, a = feat, None
    for p in params_list:
        h, a = _ref_layer(adj, h, p, bf16_agg=bf16_agg)
    return h, a


if __name__ == "__main__":
    key = jax.random.PRNGKey(0)
    num_relations = 3
    num_nodes = 256
    feat_dim = 64
    embed_dim = 32
    dim_a = 16
    num_gnn_layers = 2

    k_adj, k_feat, k_param = jax.random.split(key, 3)

    # Dense per-relation 0/1 adjacency ("blocks"), shared across layers.
    adj = (jax.random.uniform(k_adj, (num_relations, num_nodes, num_nodes))
           < 0.1).astype(jnp.float32)
    adj_i8 = adj.astype(jnp.int8)                  # exact: entries are 0/1
    feat = jax.random.normal(k_feat, (num_nodes, feat_dim), jnp.float32)

    layer_keys = jax.random.split(k_param, num_gnn_layers)
    params_list = []
    d_in = feat_dim
    for li in range(num_gnn_layers):
        params_list.append(
            make_layer_params(layer_keys[li], num_relations, d_in, embed_dim,
                              dim_a))
        d_in = embed_dim

    adjs_per_layer = [adj_i8] * num_gnn_layers

    # Run 1: forced small tiles -> multi-step (M, K) grid, exercises the
    # accumulator / pl.when K-reduction path and the multi-tile index maps.
    h = muxgnn_forward(adjs_per_layer, feat, params_list, return_attn=False,
                       tile_m=128, tile_k=128)
    h = jax.block_until_ready(h)

    # Run 2: auto tile sizes + the attention-emitting kernel variant.
    h2, attn2 = muxgnn_forward(adjs_per_layer, feat, params_list,
                               return_attn=True)
    h2 = jax.block_until_ready(h2)

    # References.
    h_match, attn_match = _ref_forward(adj, feat, params_list, bf16_agg=True)
    h_spec, _ = _ref_forward(adj, feat, params_list, bf16_agg=False)

    assert h.shape == (num_nodes, embed_dim)
    assert attn2.shape == (num_relations, num_nodes)

    # Tile-independence: forced-tile and auto-tile kernels agree.
    assert jnp.allclose(h, h2, atol=1e-2, rtol=1e-2), "tiling mismatch"
    # Tight check vs the bf16-aggregation-matched reference.
    assert jnp.allclose(h, h_match, atol=1e-2, rtol=1e-2), "Pallas != ref (h)"
    assert jnp.allclose(h2, h_match, atol=1e-2, rtol=1e-2), "Pallas != ref (h2)"
    assert jnp.allclose(attn2, attn_match, atol=1e-2, rtol=1e-2), \
        "Pallas != ref (attn)"
    # Loose check vs the pure-f32 spec (bf16-streamed X adds ~0.2%/layer).
    assert jnp.allclose(h2, h_spec, atol=2.5e-1, rtol=5e-2), \
        "Pallas != f32 spec (h2)"

    print("KERNEL_OK")
</pallas_src>

<mosaic_0001>
module attributes {stable_mosaic.version = 11 : i64} {
  func.func @_muxgnn_layer_kernel(%arg0: i32, %arg1: i32, %arg2: memref<3x128x128xi8, #tpu.memory_space<vmem>>, %arg3: memref<128x64xbf16, #tpu.memory_space<vmem>>, %arg4: memref<128x64xf32, #tpu.memory_space<vmem>>, %arg5: memref<64x32xf32, #tpu.memory_space<vmem>>, %arg6: memref<1x32xf32, #tpu.memory_space<vmem>>, %arg7: memref<32x32xf32, #tpu.memory_space<vmem>>, %arg8: memref<1x32xf32, #tpu.memory_space<vmem>>, %arg9: memref<3x32x16xf32, #tpu.memory_space<vmem>>, %arg10: memref<3x1x16xf32, #tpu.memory_space<vmem>>, %arg11: memref<128x32xf32, #tpu.memory_space<vmem>>, %arg12: memref<384x64xf32, #tpu.memory_space<vmem>>) attributes {dimension_semantics = [#tpu.dimension_semantics<parallel>, #tpu.dimension_semantics<arbitrary>], iteration_bounds = array<i64: 2, 2>, scalar_prefetch = 0 : i64, scratch_operands = 1 : i64, tpu.core_type = #tpu.core_type<tc>, window_params = [{transform_indices = @transform_0, window_bounds = array<i64: 3, 128, 128>}, {transform_indices = @transform_1, window_bounds = array<i64: 128, 64>}, {transform_indices = @transform_2, window_bounds = array<i64: 128, 64>}, {pipeline_mode = #tpu.pipeline_mode<synchronous>, transform_indices = @transform_3, window_bounds = array<i64: 64, 32>}, {pipeline_mode = #tpu.pipeline_mode<synchronous>, transform_indices = @transform_4, window_bounds = array<i64: 1, 32>}, {pipeline_mode = #tpu.pipeline_mode<synchronous>, transform_indices = @transform_5, window_bounds = array<i64: 32, 32>}, {pipeline_mode = #tpu.pipeline_mode<synchronous>, transform_indices = @transform_6, window_bounds = array<i64: 1, 32>}, {pipeline_mode = #tpu.pipeline_mode<synchronous>, transform_indices = @transform_7, window_bounds = array<i64: 3, 32, 16>}, {pipeline_mode = #tpu.pipeline_mode<synchronous>, transform_indices = @transform_8, window_bounds = array<i64: 3, 1, 16>}, {transform_indices = @transform_9, window_bounds = array<i64: 128, 32>}]} {
    %c0_i32 = arith.constant 0 : i32
    %0 = arith.cmpi eq, %arg1, %c0_i32 : i32
    %1 = arith.extui %0 : i1 to i32
    %c0_i32_0 = arith.constant 0 : i32
    %2 = arith.cmpi ne, %1, %c0_i32_0 : i32
    scf.if %2 {
      %cst_10 = arith.constant 0.000000e+00 : f32
      %14 = vector.broadcast %cst_10 : f32 to vector<384x64xf32>
      %c0_11 = arith.constant 0 : index
      %c0_12 = arith.constant 0 : index
      %15 = vector.load %arg12[%c0_11, %c0_12] : memref<384x64xf32, #tpu.memory_space<vmem>>, vector<384x64xf32>
      tpu.vector_store %arg12[%c0_11, %c0_12], %14 {strides = array<i32>} : memref<384x64xf32, #tpu.memory_space<vmem>>, vector<384x64xf32>,
    } else {
    }
    %c0 = arith.constant 0 : index
    %c0_1 = arith.constant 0 : index
    %c0_2 = arith.constant 0 : index
    %3 = vector.load %arg2[%c0, %c0_1, %c0_2] : memref<3x128x128xi8, #tpu.memory_space<vmem>>, vector<3x128x128xi8>
    %4 = arith.sitofp %3 : vector<3x128x128xi8> to vector<3x128x128xbf16>
    %5 = vector.shape_cast %4 : vector<3x128x128xbf16> to vector<384x128xbf16>
    %c0_3 = arith.constant 0 : index
    %c0_4 = arith.constant 0 : index
    %6 = vector.load %arg12[%c0_3, %c0_4] : memref<384x64xf32, #tpu.memory_space<vmem>>, vector<384x64xf32>
    %c0_5 = arith.constant 0 : index
    %c0_6 = arith.constant 0 : index
    %7 = vector.load %arg3[%c0_5, %c0_6] : memref<128x64xbf16, #tpu.memory_space<vmem>>, vector<128x64xbf16>
    %cst = arith.constant dense<0.000000e+00> : vector<384x64xf32>
    %8 = tpu.matmul %5, %7, %cst {dimension_numbers = #tpu.dot_dimension_numbers<[1], [0], [0], [1], [0, 0, 1, 1], [], []>} : vector<384x128xbf16>, vector<128x64xbf16>, vector<384x64xf32> -> vector<384x64xf32>
    %9 = arith.addf %6, %8 : vector<384x64xf32>
    %c0_7 = arith.constant 0 : index
    %c0_8 = arith.constant 0 : index
    %10 = vector.load %arg12[%c0_7, %c0_8] : memref<384x64xf32, #tpu.memory_space<vmem>>, vector<384x64xf32>
    tpu.vector_store %arg12[%c0_7, %c0_8], %9 {strides = array<i32>} : memref<384x64xf32, #tpu.memory_space<vmem>>, vector<384x64xf32>,
    %c1_i32 = arith.constant 1 : i32
    %11 = arith.cmpi eq, %arg1, %c1_i32 : i32
    %12 = arith.extui %11 : i1 to i32
    %c0_i32_9 = arith.constant 0 : i32
    %13 = arith.cmpi ne, %12, %c0_i32_9 : i32
    scf.if %13 {
      %c0_10 = arith.constant 0 : index
      %c0_11 = arith.constant 0 : index
      %14 = vector.load %arg12[%c0_10, %c0_11] : memref<384x64xf32, #tpu.memory_space<vmem>>, vector<384x64xf32>
      %15 = vector.shape_cast %14 : vector<384x64xf32> to vector<3x128x64xf32>
      %c0_12 = arith.constant 0 : index
      %c0_13 = arith.constant 0 : index
      %16 = vector.load %arg4[%c0_12, %c0_13] : memref<128x64xf32, #tpu.memory_space<vmem>>, vector<128x64xf32>
      %17 = vector.shape_cast %16 : vector<128x64xf32> to vector<1x128x64xf32>
      %18 = vector.broadcast %17 : vector<1x128x64xf32> to vector<3x128x64xf32>
      %19 = arith.addf %15, %18 : vector<3x128x64xf32>
      %20 = vector.shape_cast %19 : vector<3x128x64xf32> to vector<384x64xf32>
      %c0_14 = arith.constant 0 : index
      %c0_15 = arith.constant 0 : index
      %21 = vector.load %arg5[%c0_14, %c0_15] : memref<64x32xf32, #tpu.memory_space<vmem>>, vector<64x32xf32>
      %cst_16 = arith.constant dense<0.000000e+00> : vector<384x32xf32>
      %22 = tpu.matmul %20, %21, %cst_16 {dimension_numbers = #tpu.dot_dimension_numbers<[1], [0], [0], [1], [0, 0, 1, 1], [], []>} : vector<384x64xf32>, vector<64x32xf32>, vector<384x32xf32> -> vector<384x32xf32>
      %c0_17 = arith.constant 0 : index
      %c0_18 = arith.constant 0 : index
      %23 = vector.load %arg6[%c0_17, %c0_18] : memref<1x32xf32, #tpu.memory_space<vmem>>, vector<1x32xf32>
      %24 = vector.broadcast %23 : vector<1x32xf32> to vector<384x32xf32>
      %25 = arith.addf %22, %24 : vector<384x32xf32>
      %cst_19 = arith.constant 0.000000e+00 : f32
      %26 = vector.broadcast %cst_19 : f32 to vector<384x32xf32>
      %27 = arith.maximumf %25, %26 : vector<384x32xf32>
      %c0_20 = arith.constant 0 : index
      %c0_21 = arith.constant 0 : index
      %28 = vector.load %arg7[%c0_20, %c0_21] : memref<32x32xf32, #tpu.memory_space<vmem>>, vector<32x32xf32>
      %cst_22 = arith.constant dense<0.000000e+00> : vector<384x32xf32>
      %29 = tpu.matmul %27, %28, %cst_22 {dimension_numbers = #tpu.dot_dimension_numbers<[1], [0], [0], [1], [0, 0, 1, 1], [], []>} : vector<384x32xf32>, vector<32x32xf32>, vector<384x32xf32> -> vector<384x32xf32>
      %c0_23 = arith.constant 0 : index
      %c0_24 = arith.constant 0 : index
      %30 = vector.load %arg8[%c0_23, %c0_24] : memref<1x32xf32, #tpu.memory_space<vmem>>, vector<1x32xf32>
      %31 = vector.broadcast %30 : vector<1x32xf32> to vector<384x32xf32>
      %32 = arith.addf %29, %31 : vector<384x32xf32>
      %cst_25 = arith.constant 0.000000e+00 : f32
      %33 = vector.broadcast %cst_25 : f32 to vector<384x32xf32>
      %34 = arith.maximumf %32, %33 : vector<384x32xf32>
      %35 = vector.shape_cast %34 : vector<384x32xf32> to vector<3x128x32xf32>
      %c0_26 = arith.constant 0 : index
      %c0_27 = arith.constant 0 : index
      %c0_28 = arith.constant 0 : index
      %36 = vector.load %arg9[%c0_26, %c0_27, %c0_28] : memref<3x32x16xf32, #tpu.memory_space<vmem>>, vector<3x32x16xf32>
      "tpu.trace_start"() <{level = 10 : i32, message = "rnd,rda->rna"}> : () -> ()
      %cst_29 = arith.constant dense<0.000000e+00> : vector<3x128x16xf32>
      %37 = tpu.matmul %35, %36, %cst_29 {dimension_numbers = #tpu.dot_dimension_numbers<[2], [1], [1], [2], [0, 0, 0, 1, 1, 2], [0], [0]>} : vector<3x128x32xf32>, vector<3x32x16xf32>, vector<3x128x16xf32> -> vector<3x128x16xf32>
      "tpu.trace_stop"() : () -> ()
      %38 = math.tanh %37 : vector<3x128x16xf32>
      %c0_30 = arith.constant 0 : index
      %c0_31 = arith.constant 0 : index
      %c0_32 = arith.constant 0 : index
      %39 = vector.load %arg10[%c0_30, %c0_31, %c0_32] : memref<3x1x16xf32, #tpu.memory_space<vmem>>, vector<3x1x16xf32>
      %40 = vector.broadcast %39 : vector<3x1x16xf32> to vector<3x128x16xf32>
      %41 = arith.mulf %38, %40 : vector<3x128x16xf32>
      %cst_33 = arith.constant dense<0.000000e+00> : vector<3x128xf32>
      %42 = vector.multi_reduction <add>, %41, %cst_33 [2] : vector<3x128x16xf32> to vector<3x128xf32>
      %43 = vector.shape_cast %42 : vector<3x128xf32> to vector<3x128x1xf32>
      %cst_34 = arith.constant dense<0xFF800000> : vector<128x1xf32>
      %44 = vector.multi_reduction <maximumf>, %43, %cst_34 [0] : vector<3x128x1xf32> to vector<128x1xf32>
      %45 = vector.shape_cast %44 : vector<128x1xf32> to vector<1x128x1xf32>
      %46 = vector.broadcast %45 : vector<1x128x1xf32> to vector<3x128x1xf32>
      %47 = arith.subf %43, %46 : vector<3x128x1xf32>
      %48 = math.exp %47 : vector<3x128x1xf32>
      %cst_35 = arith.constant dense<0.000000e+00> : vector<128x1xf32>
      %49 = vector.multi_reduction <add>, %48, %cst_35 [0] : vector<3x128x1xf32> to vector<128x1xf32>
      %50 = vector.shape_cast %49 : vector<128x1xf32> to vector<1x128x1xf32>
      %51 = tpu.reciprocal %50 {approx = true} : vector<1x128x1xf32> -> vector<1x128x1xf32>
      %52 = arith.mulf %50, %51 : vector<1x128x1xf32>
      %cst_36 = arith.constant 2.000000e+00 : f32
      %53 = vector.broadcast %cst_36 : f32 to vector<1x128x1xf32>
      %54 = arith.subf %53, %52 : vector<1x128x1xf32>
      %55 = arith.mulf %51, %54 : vector<1x128x1xf32>
      %56 = vector.broadcast %55 : vector<1x128x1xf32> to vector<3x128x1xf32>
      %57 = arith.mulf %48, %56 : vector<3x128x1xf32>
      %58 = vector.broadcast %57 : vector<3x128x1xf32> to vector<3x128x32xf32>
      %59 = arith.mulf %58, %35 : vector<3x128x32xf32>
      %cst_37 = arith.constant dense<0.000000e+00> : vector<128x32xf32>
      %60 = vector.multi_reduction <add>, %59, %cst_37 [0] : vector<3x128x32xf32> to vector<128x32xf32>
      %c0_38 = arith.constant 0 : index
      %c0_39 = arith.constant 0 : index
      %61 = vector.load %arg11[%c0_38, %c0_39] : memref<128x32xf32, #tpu.memory_space<vmem>>, vector<128x32xf32>
      tpu.vector_store %arg11[%c0_38, %c0_39], %60 {strides = array<i32>} : memref<128x32xf32, #tpu.memory_space<vmem>>, vector<128x32xf32>,
    } else {
    }
    return
  }
  func.func @transform_0(%arg0: i32, %arg1: i32) -> (i32, i32, i32) {
    %c0_i32 = arith.constant 0 : i32
    %c0_i32_0 = arith.constant 0 : i32
    return %c0_i32, %arg0, %arg1 : i32, i32, i32
  }
  func.func @transform_1(%arg0: i32, %arg1: i32) -> (i32, i32) {
    %c0_i32 = arith.constant 0 : i32
    %c0_i32_0 = arith.constant 0 : i32
    return %arg1, %c0_i32 : i32, i32
  }
  func.func @transform_2(%arg0: i32, %arg1: i32) -> (i32, i32) {
    %c0_i32 = arith.constant 0 : i32
    %c0_i32_0 = arith.constant 0 : i32
    return %arg0, %c0_i32 : i32, i32
  }
  func.func @transform_3(%arg0: i32, %arg1: i32) -> (i32, i32) {
    %c0_i32 = arith.constant 0 : i32
    %c0_i32_0 = arith.constant 0 : i32
    %c0_i32_1 = arith.constant 0 : i32
    return %c0_i32, %c0_i32_0 : i32, i32
  }
  func.func @transform_4(%arg0: i32, %arg1: i32) -> (i32, i32) {
    %c0_i32 = arith.constant 0 : i32
    %c0_i32_0 = arith.constant 0 : i32
    %c0_i32_1 = arith.constant 0 : i32
    return %c0_i32, %c0_i32_0 : i32, i32
  }
  func.func @transform_5(%arg0: i32, %arg1: i32) -> (i32, i32) {
    %c0_i32 = arith.constant 0 : i32
    %c0_i32_0 = arith.constant 0 : i32
    %c0_i32_1 = arith.constant 0 : i32
    return %c0_i32, %c0_i32_0 : i32, i32
  }
  func.func @transform_6(%arg0: i32, %arg1: i32) -> (i32, i32) {
    %c0_i32 = arith.constant 0 : i32
    %c0_i32_0 = arith.constant 0 : i32
    %c0_i32_1 = arith.constant 0 : i32
    return %c0_i32, %c0_i32_0 : i32, i32
  }
  func.func @transform_7(%arg0: i32, %arg1: i32) -> (i32, i32, i32) {
    %c0_i32 = arith.constant 0 : i32
    %c0_i32_0 = arith.constant 0 : i32
    %c0_i32_1 = arith.constant 0 : i32
    %c0_i32_2 = arith.constant 0 : i32
    return %c0_i32, %c0_i32_0, %c0_i32_1 : i32, i32, i32
  }
  func.func @transform_8(%arg0: i32, %arg1: i32) -> (i32, i32, i32) {
    %c0_i32 = arith.constant 0 : i32
    %c0_i32_0 = arith.constant 0 : i32
    %c0_i32_1 = arith.constant 0 : i32
    %c0_i32_2 = arith.constant 0 : i32
    return %c0_i32, %c0_i32_0, %c0_i32_1 : i32, i32, i32
  }
  func.func @transform_9(%arg0: i32, %arg1: i32) -> (i32, i32) {
    %c0_i32 = arith.constant 0 : i32
    %c0_i32_0 = arith.constant 0 : i32
    return %arg0, %c0_i32 : i32, i32
  }
}

</mosaic_0001>

<bundles_post_ra>
// kernel: tpu_custom_call.1
= control target key start
LH: loop header
LB: loop body
LE: loop exit
PB: predicated region body
PF: predicated region fallthrough
CT: control target
= control target key end

     0   :  { %s6311_s0 = inlined_call_operand.vmem [shape: s8[3,256,256], index: 0, kind: input, shape index: {}]   ;;  %s6312_s1 = inlined_call_operand.vmem [shape: bf16[256,64], index: 1, kind: input, shape index: {}]   ;;  %s6313_s2 = inlined_call_operand.vmem [shape: f32[256,64], index: 2, kind: input, shape index: {}]   ;;  %s6314_s3 = inlined_call_operand.vmem [shape: f32[64,32], index: 3, kind: input, shape index: {}]   ;;  %s6315_s4 = inlined_call_operand.vmem [shape: f32[1,32], index: 4, kind: input, shape index: {}]   ;;  %s6316_s5 = inlined_call_operand.vmem [shape: f32[32,32], index: 5, kind: input, shape index: {}]   ;;  %s6317_s6 = inlined_call_operand.vmem [shape: f32[1,32], index: 6, kind: input, shape index: {}]   ;;  %s6318_s7 = inlined_call_operand.vmem [shape: f32[3,32,16], index: 7, kind: input, shape index: {}]   ;;  %s6319_s8 = inlined_call_operand.vmem [shape: f32[3,1,16], index: 8, kind: input, shape index: {}]   ;;  %s6320_s9 = inlined_call_operand.vmem [shape: f32[256,32], index: 9, kind: output, shape index: {}]  }
   0x1   :  { %6418 = sst [smem:[#allocation50_spill]] %s6311_s0 }
   0x2   :  { %s4722_s30 = smov 0   ;;  %s4724_s10 = smov 0  }
   0x3   :  { %s4726_s11 = smov 0   ;;  %s4728_s12 = smov 0  }
   0x4   :  { %s4730_s13 = smov 0   ;;  %s4732_s14 = smov 0  }
   0x5   :  { %s4734_s15 = smov 0  }
   0x6 LB: > { %s28_s16 = sadd.s32 1, %s4661_s13  ;;  %s31_s17 = sadd.s32 1, %s4665_s14  ;;  %s4669_s15 = sphi %s4734_s15, %s19_s15   ;;  %s4665_s14 = sphi %s4732_s14, %s6569_s14   ;;  %s4661_s13 = sphi %s4730_s13, %s6568_s13   ;;  %s4657_s12 = sphi %s4728_s12, %s6567_s12   ;;  %s4653_s11 = sphi %s4726_s11, %s6566_s11   ;;  %s4649_s10 = sphi %s4724_s10, %s6565_s10   ;;  %s4645_s30 = sphi %s4722_s30, %s6564_s30  }
   0x7   : > { %p29_p0 = scmp.ge.s32.totalorder %s28_s16, 2  ;;  %p47_p1 = scmp.ne.s32.totalorder %s4649_s10, %s4645_s30 }
   0x8   : > { %p48_p2 = scmp.eq.s32.totalorder %s4669_s15, 0  ;;  %s40_s21 = sadd.s32 1, %s4649_s10 }
   0x9   : > { %s6571_s16 = smov (%p29_p0, %s28_s16), 0  ;;  %s6573_s17 = smov (!%p29_p0, %s31_s17), %s4665_s14 }
   0xa   : > { %p49_p3 = por %p48_p2, %p47_p1  ;;  %p33_p4 = scmp.ge.s32.totalorder %s6573_s17, 2 }
   0xb   : > { %s36_s18 = ssub.s32 %s4661_s13, %s6571_s16  ;;  %p3555_p6 = scmp.ge.s32.totalorder %s4669_s15, 4 }
   0xc   : > { %s6575_s17 = smov (%p33_p4, %s6573_s17), 0 }
   0xd   : > { %6419 = sst [smem:[#allocation4_spill]] %s6575_s17  ;;  %s35_s19 = ssub.s32 %s4665_s14, %s6575_s17 }
   0xe   : > { %s37_s20 = sor.u32 %s36_s18, %s35_s19  ;;  %295 = sbr.rel (%p3555_p6) target bundleno = 37 (0x25), region = 40 }
   0xf   : > { %p38_p5 = scmp.eq.s32.totalorder %s37_s20, 0 }
  0x11   : > { %s4773_s22 = scalar_select %p38_p5, %s4649_s10, %s40_s21  }
  0x15   : > { %298 = sbr.rel (!%p49_p3) target bundleno = 37 (0x25), region = 44  ;;  %s300_s23 = sand.u32 (%p49_p3), 1, %s4649_s10  }
  0x16   : > { %s3727_s24 = sshll.u32 (%p49_p3), %s4665_s14, 3  ;;  %s4324_s25 = smul.u32 (%p49_p3), 96, %s300_s23 }
  0x17   : > { %s305_s26 = sadd.s32 (%p49_p3), %s4661_s13, %s3727_s24  ;;  %s6420_s0 = sld [smem:[#allocation50_spill]] (%p49_p3) }
  0x18   : > { %s3558_s27 = sshll.u32 (%p49_p3), %s305_s26, 3  ;;  %s302_s19 = scalar_lea.vmem (%p49_p3), [#allocation3], %s4324_s25 }
  0x1d   : > { %s307_s18 = scalar_lea.vmem %s6420_s0, %s3558_s27 }
  0x1e   : > { %v357_v0 = vld [vmem:[%s307_s18] sm:$0xff]  ;;  %v359_v1 = vld [vmem:[%s307_s18 + $0x10] sm:$0xff] }
  0x1f   : > { %v361_v2 = vld [vmem:[%s307_s18 + $0x20] sm:$0xff]  ;;  %358 = vst [vmem:[%s302_s19] sm:$0xff] %v357_v0  ;;  %360 = vst [vmem:[%s302_s19 + $0x8] sm:$0xff] %v359_v1  ;;  %v363_v3 = vld [vmem:[%s307_s18 + $0x30] sm:$0xff] }
  0x20   : > { %362 = vst [vmem:[%s302_s19 + $0x10] sm:$0xff] %v361_v2  ;;  %v365_v4 = vld [vmem:[%s307_s18 + $0x80] sm:$0xff]  ;;  %v367_v5 = vld [vmem:[%s307_s18 + $0x90] sm:$0xff]  ;;  %364 = vst [vmem:[%s302_s19 + $0x18] sm:$0xff] %v363_v3 }
  0x21   : > { %366 = vst [vmem:[%s302_s19 + $0x20] sm:$0xff] %v365_v4  ;;  %368 = vst [vmem:[%s302_s19 + $0x28] sm:$0xff] %v367_v5  ;;  %v369_v6 = vld [vmem:[%s307_s18 + $0xa0] sm:$0xff]  ;;  %v371_v7 = vld [vmem:[%s307_s18 + $0xb0] sm:$0xff] }
  0x22   : > { %v373_v8 = vld [vmem:[%s307_s18 + $0x100] sm:$0xff]  ;;  %370 = vst [vmem:[%s302_s19 + $0x30] sm:$0xff] %v369_v6  ;;  %372 = vst [vmem:[%s302_s19 + $0x38] sm:$0xff] %v371_v7  ;;  %v375_v9 = vld [vmem:[%s307_s18 + $0x110] sm:$0xff] }
  0x23   : > { %374 = vst [vmem:[%s302_s19 + $0x40] sm:$0xff] %v373_v8  ;;  %v377_v10 = vld [vmem:[%s307_s18 + $0x120] sm:$0xff]  ;;  %v379_v11 = vld [vmem:[%s307_s18 + $0x130] sm:$0xff]  ;;  %376 = vst [vmem:[%s302_s19 + $0x48] sm:$0xff] %v375_v9 }
  0x24   : > { %378 = vst [vmem:[%s302_s19 + $0x50] sm:$0xff] %v377_v10  ;;  %380 = vst [vmem:[%s302_s19 + $0x58] sm:$0xff] %v379_v11 }
  0x25 PF: > { %p3559_p7 = scmp.ge.s32.totalorder %s4669_s15, 1  ;;  %p403_p8 = scmp.lt.s32.totalorder %s4669_s15, 5 }
  0x27   : > { %p404_p9 = pnand %p3559_p7, %p403_p8 }
  0x28   : > { %s410_s20 = sand.u32 (!%p404_p9), 1, %s4645_s30   ;;  %s3560_s21 = sshll.u32 (!%p404_p9), %s4653_s11, 4 }
  0x29   : > { %407 = sbr.rel (%p404_p9) target bundleno = 1393 (0x571), region = 90  ;;  %p457_p10 = scmp.lt.s32.totalorder (!%p404_p9), %s3560_s21, 31 }
  0x2a   : > { %s4325_s23 = smul.u32 (!%p404_p9), 96, %s410_s20  ;;  %s3562_s24 = sshll.u32 (!%p404_p9), %s4657_s12, 4 }
  0x2b   : > { %p463_p11 = scmp.lt.s32.totalorder (!%p404_p9), %s3562_s24, 31  ;;  %p3566_p12 = scmp.ne.s32.totalorder (!%p404_p9), %s4653_s11, 0 }
  0x2c   : > { %s4802_s12 = scalar_lea.vmem (!%p404_p9), [#allocation3], %s4325_s23 }
  0x30   : > { %s6577_s21 = smov (!%p457_p10, %s3560_s21), 31  ;;  %s6579_s24 = smov (!%p463_p11, %s3562_s24), 31 }
  0x31   : > { %s3561_s25 = sshll.u32 %s6577_s21, 2  ;;  %s3563_s29 = sshll.u32 %s6579_s24, 3  ;;  %vm479_vm0 = vcmask (!%p3566_p12), 523264   ;;  %v4671_v12 = vmov (!%p3566_p12), 0.0  }
  0x32   : > { %s4790_s28 = scalar_lea.vmem %s6312_s1, %s3561_s25  ;;  %s4795_s0 = scalar_lea.vmem %s6313_s2, %s3563_s29  ;;  %480 = vst.msk [vmem:[#allocation2] sm:$0xff] (!%p3566_p12), %vm479_vm0, %v4671_v12  ;;  %481 = vst.msk [vmem:[#allocation2 + $0x8] sm:$0xff] (!%p3566_p12), %vm479_vm0, %v4671_v12 }
  0x33   : > { %s4800_s20 = scalar_lea.vmem %s6320_s9, %s3563_s29  ;;  %478 = sbr.rel (%p3566_p12) target bundleno = 74 (0x4a), region = 98  ;;  %482 = vst.msk [vmem:[#allocation2 + $0x10] sm:$0xff] (!%p3566_p12), %vm479_vm0, %v4671_v12  ;;  %483 = vst.msk [vmem:[#allocation2 + $0x18] sm:$0xff] (!%p3566_p12), %vm479_vm0, %v4671_v12 }
  0x34   : > { %484 = vst.msk [vmem:[#allocation2 + $0x20] sm:$0xff] (!%p3566_p12), %vm479_vm0, %v4671_v12  ;;  %485 = vst.msk [vmem:[#allocation2 + $0x28] sm:$0xff] (!%p3566_p12), %vm479_vm0, %v4671_v12 }
  0x35   : > { %486 = vst.msk [vmem:[#allocation2 + $0x30] sm:$0xff] (!%p3566_p12), %vm479_vm0, %v4671_v12  ;;  %487 = vst.msk [vmem:[#allocation2 + $0x38] sm:$0xff] (!%p3566_p12), %vm479_vm0, %v4671_v12 }
  0x36   : > { %488 = vst.msk [vmem:[#allocation2 + $0x40] sm:$0xff] (!%p3566_p12), %vm479_vm0, %v4671_v12  ;;  %489 = vst.msk [vmem:[#allocation2 + $0x48] sm:$0xff] (!%p3566_p12), %vm479_vm0, %v4671_v12 }
  0x37   : > { %490 = vst.msk [vmem:[#allocation2 + $0x50] sm:$0xff] (!%p3566_p12), %vm479_vm0, %v4671_v12  ;;  %491 = vst.msk [vmem:[#allocation2 + $0x58] sm:$0xff] (!%p3566_p12), %vm479_vm0, %v4671_v12 }
  0x38   : > { %492 = vst.msk [vmem:[#allocation2 + $0x60] sm:$0xff] (!%p3566_p12), %vm479_vm0, %v4671_v12  ;;  %493 = vst.msk [vmem:[#allocation2 + $0x68] sm:$0xff] (!%p3566_p12), %vm479_vm0, %v4671_v12 }
  0x39   : > { %494 = vst.msk [vmem:[#allocation2 + $0x70] sm:$0xff] (!%p3566_p12), %vm479_vm0, %v4671_v12  ;;  %495 = vst.msk [vmem:[#allocation2 + $0x78] sm:$0xff] (!%p3566_p12), %vm479_vm0, %v4671_v12 }
  0x3a   : > { %496 = vst.msk [vmem:[#allocation2 + $0x80] sm:$0xff] %vm479_vm0, %v4671_v12  ;;  %497 = vst.msk [vmem:[#allocation2 + $0x88] sm:$0xff] %vm479_vm0, %v4671_v12 }
  0x3b   : > { %498 = vst.msk [vmem:[#allocation2 + $0x90] sm:$0xff] %vm479_vm0, %v4671_v12  ;;  %499 = vst.msk [vmem:[#allocation2 + $0x98] sm:$0xff] %vm479_vm0, %v4671_v12 }
  0x3c   : > { %500 = vst.msk [vmem:[#allocation2 + $0xa0] sm:$0xff] %vm479_vm0, %v4671_v12  ;;  %501 = vst.msk [vmem:[#allocation2 + $0xa8] sm:$0xff] %vm479_vm0, %v4671_v12 }
  0x3d   : > { %502 = vst.msk [vmem:[#allocation2 + $0xb0] sm:$0xff] %vm479_vm0, %v4671_v12  ;;  %503 = vst.msk [vmem:[#allocation2 + $0xb8] sm:$0xff] %vm479_vm0, %v4671_v12 }
  0x3e   : > { %504 = vst.msk [vmem:[#allocation2 + $0xc0] sm:$0xff] %vm479_vm0, %v4671_v12  ;;  %505 = vst.msk [vmem:[#allocation2 + $0xc8] sm:$0xff] %vm479_vm0, %v4671_v12 }
  0x3f   : > { %506 = vst.msk [vmem:[#allocation2 + $0xd0] sm:$0xff] %vm479_vm0, %v4671_v12  ;;  %507 = vst.msk [vmem:[#allocation2 + $0xd8] sm:$0xff] %vm479_vm0, %v4671_v12 }
  0x40   : > { %508 = vst.msk [vmem:[#allocation2 + $0xe0] sm:$0xff] %vm479_vm0, %v4671_v12  ;;  %509 = vst.msk [vmem:[#allocation2 + $0xe8] sm:$0xff] %vm479_vm0, %v4671_v12 }
  0x41   : > { %510 = vst.msk [vmem:[#allocation2 + $0xf0] sm:$0xff] %vm479_vm0, %v4671_v12  ;;  %511 = vst.msk [vmem:[#allocation2 + $0xf8] sm:$0xff] %vm479_vm0, %v4671_v12 }
  0x42   : > { %512 = vst.msk [vmem:[#allocation2 + $0x100] sm:$0xff] %vm479_vm0, %v4671_v12  ;;  %513 = vst.msk [vmem:[#allocation2 + $0x108] sm:$0xff] %vm479_vm0, %v4671_v12 }
  0x43   : > { %514 = vst.msk [vmem:[#allocation2 + $0x110] sm:$0xff] %vm479_vm0, %v4671_v12  ;;  %515 = vst.msk [vmem:[#allocation2 + $0x118] sm:$0xff] %vm479_vm0, %v4671_v12 }
  0x44   : > { %516 = vst.msk [vmem:[#allocation2 + $0x120] sm:$0xff] %vm479_vm0, %v4671_v12  ;;  %517 = vst.msk [vmem:[#allocation2 + $0x128] sm:$0xff] %vm479_vm0, %v4671_v12 }
  0x45   : > { %518 = vst.msk [vmem:[#allocation2 + $0x130] sm:$0xff] %vm479_vm0, %v4671_v12  ;;  %519 = vst.msk [vmem:[#allocation2 + $0x138] sm:$0xff] %vm479_vm0, %v4671_v12 }
  0x46   : > { %520 = vst.msk [vmem:[#allocation2 + $0x140] sm:$0xff] %vm479_vm0, %v4671_v12  ;;  %521 = vst.msk [vmem:[#allocation2 + $0x148] sm:$0xff] %vm479_vm0, %v4671_v12 }
  0x47   : > { %522 = vst.msk [vmem:[#allocation2 + $0x150] sm:$0xff] %vm479_vm0, %v4671_v12  ;;  %523 = vst.msk [vmem:[#allocation2 + $0x158] sm:$0xff] %vm479_vm0, %v4671_v12 }
  0x48   : > { %524 = vst.msk [vmem:[#allocation2 + $0x160] sm:$0xff] %vm479_vm0, %v4671_v12  ;;  %525 = vst.msk [vmem:[#allocation2 + $0x168] sm:$0xff] %vm479_vm0, %v4671_v12 }
  0x49   : > { %526 = vst.msk [vmem:[#allocation2 + $0x170] sm:$0xff] %vm479_vm0, %v4671_v12  ;;  %527 = vst.msk [vmem:[#allocation2 + $0x178] sm:$0xff] %vm479_vm0, %v4671_v12 }
  0x4a PF: > { %v4383_v13 = vld [vmem:[%s4790_s28] sm:$0xff]   ;;  %v4384_v14 = vld [vmem:[%s4790_s28 + $0x8] sm:$0xff]   ;;  %v4385_v15 = vld [vmem:[%s4790_s28 + $0x10] sm:$0xff]   ;;  %vm949_vm1 = vcmask 523264   ;;  %p3575_p13 = scmp.ne.s32.totalorder %s4653_s11, 1 }
  0x4b   : > { %3928 = vmatprep.subr.bf16.mxu0 %v4383_v13  ;;  %4304 = vmatprep.subr.bf16.mxu1 %v4383_v13  ;;  %v4386_v16 = vld [vmem:[%s4790_s28 + $0x18] sm:$0xff]   ;;  %v528_v17 = vld [vmem:[%s4802_s12] sm:$0xff]  ;;  %v534_v18 = vld [vmem:[%s4802_s12 + $0x30] sm:$0xff] }
  0x4c   : > { %3929 = vmatpush3.bf16.msra.mxu0 %v4383_v13  ;;  %4312 = vmatpush3.bf16.msra.mxu1 %v4383_v13  ;;  %v540_v19 = vunpack.c.l.s8.bf16 %v528_v17  ;;  %v552_v20 = vunpack.c.l.s8.bf16 %v534_v18  ;;  %v4387_v21 = vld [vmem:[%s4790_s28 + $0x20] sm:$0xff]   ;;  %v4388_v22 = vld [vmem:[%s4790_s28 + $0x28] sm:$0xff]   ;;  %v4389_v23 = vld [vmem:[%s4790_s28 + $0x30] sm:$0xff]   ;;  %v541_v27 = vunpack.c.h.s8.bf16 %v528_v17  ;;  %v553_v28 = vunpack.c.h.s8.bf16 %v534_v18 }
  0x4d   : > { %3930 = vmatprep.subr.bf16.mxu0 %v4384_v14  ;;  %4305 = vmatprep.subr.bf16.mxu1 %v4384_v14  ;;  %v4390_v24 = vld [vmem:[%s4790_s28 + $0x38] sm:$0xff]   ;;  %v529_v25 = vld [vmem:[%s4802_s12 + $0x8] sm:$0xff]  ;;  %v530_v31 = vld [vmem:[%s4802_s12 + $0x10] sm:$0xff] }
  0x4e   : > { %3944 = vmatprep.mubr.bf16.mxu0 %v540_v19  ;;  %3968 = vmatprep.mubr.bf16.mxu1 %v552_v20  ;;  %v535_v26 = vld [vmem:[%s4802_s12 + $0x38] sm:$0xff]  ;;  %v542_v29 = vunpack.c.l.s8.bf16 %v529_v25  ;;  %v536_v32 = vld [vmem:[%s4802_s12 + $0x40] sm:$0xff]  ;;  %v543_v33 = vunpack.c.h.s8.bf16 %v529_v25  ;;  %v544_v35 = vunpack.c.l.s8.bf16 %v530_v31  ;;  %v537_v38 = vld [vmem:[%s4802_s12 + $0x48] sm:$0xff]  ;;  %v545_v39 = vunpack.c.h.s8.bf16 %v530_v31 }
  0x4f   : > { %v554_v30 = vunpack.c.l.s8.bf16 %v535_v26  ;;  %v555_v34 = vunpack.c.h.s8.bf16 %v535_v26  ;;  %v556_v36 = vunpack.c.l.s8.bf16 %v536_v32  ;;  %v531_v37 = vld [vmem:[%s4802_s12 + $0x18] sm:$0xff]  ;;  %v557_v40 = vunpack.c.h.s8.bf16 %v536_v32  ;;  %v532_v43 = vld [vmem:[%s4802_s12 + $0x20] sm:$0xff]  ;;  %v538_v44 = vld [vmem:[%s4802_s12 + $0x50] sm:$0xff] }
  0x50   : > { %3931 = vmatpush3.bf16.msra.mxu0 %v4384_v14  ;;  %4313 = vmatpush3.bf16.msra.mxu1 %v4384_v14  ;;  %v546_v41 = vunpack.c.l.s8.bf16 %v531_v37  ;;  %v558_v42 = vunpack.c.l.s8.bf16 %v537_v38  ;;  %v547_v45 = vunpack.c.h.s8.bf16 %v531_v37  ;;  %v559_v46 = vunpack.c.h.s8.bf16 %v537_v38  ;;  %v533_v49 = vld [vmem:[%s4802_s12 + $0x28] sm:$0xff]  ;;  %v539_v50 = vld [vmem:[%s4802_s12 + $0x58] sm:$0xff]  ;;  %v566_v57 = vld [vmem:[#allocation2 + $0x10] sm:$0xff] }
  0x51   : > { %3932 = vmatprep.subr.bf16.mxu0 %v4385_v15  ;;  %4306 = vmatprep.subr.bf16.mxu1 %v4385_v15  ;;  %v548_v47 = vunpack.c.l.s8.bf16 %v532_v43  ;;  %v560_v48 = vunpack.c.l.s8.bf16 %v538_v44  ;;  %v549_v51 = vunpack.c.h.s8.bf16 %v532_v43  ;;  %v561_v52 = vunpack.c.h.s8.bf16 %v538_v44  ;;  %v590_v58 = vld [vmem:[#allocation2 + $0xd0] sm:$0xff]  ;;  %v564_v59 = vld [vmem:[#allocation2] sm:$0xff]  ;;  %v567_v63 = vld [vmem:[#allocation2 + $0x18] sm:$0xff] }
  0x52   : > { %v550_v53 = vunpack.c.l.s8.bf16 %v533_v49  ;;  %v562_v54 = vunpack.c.l.s8.bf16 %v539_v50  ;;  %v551_v55 = vunpack.c.h.s8.bf16 %v533_v49  ;;  %v563_v56 = vunpack.c.h.s8.bf16 %v539_v50  ;;  %v588_v60 = vld [vmem:[#allocation2 + $0xc0] sm:$0xff]  ;;  %v591_v0 = vld [vmem:[#allocation2 + $0xd8] sm:$0xff]  ;;  %v565_v5 = vld [vmem:[#allocation2 + $0x8] sm:$0xff] }
  0x53   : > { %v589_v6 = vld [vmem:[#allocation2 + $0xc8] sm:$0xff]  ;;  %v570_v17 = vld [vmem:[#allocation2 + $0x30] sm:$0xff]  ;;  %v568_v19 = vld [vmem:[#allocation2 + $0x20] sm:$0xff] }
  0x54   : > { %3933 = vmatpush3.bf16.msra.mxu0 %v4385_v15  ;;  %4314 = vmatpush3.bf16.msra.mxu1 %v4385_v15  ;;  %v594_v18 = vld [vmem:[#allocation2 + $0xf0] sm:$0xff]  ;;  %v592_v20 = vld [vmem:[#allocation2 + $0xe0] sm:$0xff] }
  0x55   : > { %3934 = vmatprep.subr.bf16.mxu0 %v4386_v16  ;;  %4307 = vmatprep.subr.bf16.mxu1 %v4386_v16  ;;  %v572_v43 = vld [vmem:[#allocation2 + $0x40] sm:$0xff] }
  0x56   : > { %v596_v44 = vld [vmem:[#allocation2 + $0x100] sm:$0xff] }
  0x58   : > { %3935 = vmatpush3.bf16.msra.mxu0 %v4386_v16  ;;  %4315 = vmatpush3.bf16.msra.mxu1 %v4386_v16 }
  0x59   : > { %3936 = vmatprep.subr.bf16.mxu0 %v4387_v21  ;;  %4308 = vmatprep.subr.bf16.mxu1 %v4387_v21 }
  0x5c   : > { %3937 = vmatpush3.bf16.msra.mxu0 %v4387_v21  ;;  %4316 = vmatpush3.bf16.msra.mxu1 %v4387_v21 }
  0x5d   : > { %3938 = vmatprep.subr.bf16.mxu0 %v4388_v22  ;;  %4309 = vmatprep.subr.bf16.mxu1 %v4388_v22 }
  0x60   : > { %3939 = vmatpush3.bf16.msra.mxu0 %v4388_v22  ;;  %4317 = vmatpush3.bf16.msra.mxu1 %v4388_v22 }
  0x61   : > { %3940 = vmatprep.subr.bf16.mxu0 %v4389_v23  ;;  %4310 = vmatprep.subr.bf16.mxu1 %v4389_v23 }
  0x64   : > { %3941 = vmatpush3.bf16.msra.mxu0 %v4389_v23  ;;  %4318 = vmatpush3.bf16.msra.mxu1 %v4389_v23  ;;  %v571_v23 = vld [vmem:[#allocation2 + $0x38] sm:$0xff] }
  0x65   : > { %3942 = vmatprep.subr.bf16.mxu0 %v4390_v24  ;;  %4311 = vmatprep.subr.bf16.mxu1 %v4390_v24 }
  0x68   : > { %3943 = vmatpush3.bf16.msra.mxu0 %v4390_v24  ;;  %4319 = vmatpush3.bf16.msra.mxu1 %v4390_v24  ;;  %v595_v24 = vld [vmem:[#allocation2 + $0xf8] sm:$0xff] }
  0x6b   : > { %3945 = vmatmul.mubr.bf16.vlgmr.msra.gmra.mrb[0].mxu0 %v541_v27  ;;  %3969 = vmatmul.mubr.bf16.vlgmr.msra.gmra.mrb[0].mxu1 %v553_v28 }
  0x6c   : > { %3948 = vmatprep.mubr.bf16.mxu0 %v542_v29  ;;  %3972 = vmatprep.mubr.bf16.mxu1 %v554_v30  ;;  %v569_v29 = vld [vmem:[#allocation2 + $0x28] sm:$0xff] }
  0x6d   : > { %v593_v30 = vld [vmem:[#allocation2 + $0xe8] sm:$0xff] }
  0x73   : > { %3949 = vmatmul.mubr.bf16.gmra.mrb[4].mxu0 %v543_v33  ;;  %3973 = vmatmul.mubr.bf16.gmra.mrb[4].mxu1 %v555_v34 }
  0x74   : > { %3952 = vmatprep.mubr.bf16.mxu0 %v544_v35  ;;  %3976 = vmatprep.mubr.bf16.mxu1 %v556_v36 }
  0x7b   : > { %3953 = vmatmul.mubr.bf16.gmra.mrb[8].mxu0 %v545_v39  ;;  %3977 = vmatmul.mubr.bf16.gmra.mrb[8].mxu1 %v557_v40 }
  0x7c   : > { %3956 = vmatprep.mubr.bf16.mxu0 %v546_v41  ;;  %3980 = vmatprep.mubr.bf16.mxu1 %v558_v42  ;;  %v574_v41 = vld [vmem:[#allocation2 + $0x50] sm:$0xff] }
  0x7d   : > { %v598_v42 = vld [vmem:[#allocation2 + $0x110] sm:$0xff] }
  0x83   : > { %3957 = vmatmul.mubr.bf16.gmra.mrb[12].mxu0 %v547_v45  ;;  %3981 = vmatmul.mubr.bf16.gmra.mrb[12].mxu1 %v559_v46 }
  0x84   : > { %3960 = vmatprep.mubr.bf16.mxu0 %v548_v47  ;;  %3984 = vmatprep.mubr.bf16.mxu1 %v560_v48  ;;  %v575_v47 = vld [vmem:[#allocation2 + $0x58] sm:$0xff] }
  0x85   : > { %v599_v48 = vld [vmem:[#allocation2 + $0x118] sm:$0xff] }
  0x8b   : > { %3961 = vmatmul.mubr.bf16.gmra.mrb[16].mxu0 %v549_v51  ;;  %3985 = vmatmul.mubr.bf16.gmra.mrb[16].mxu1 %v561_v52 }
  0x8c   : > { %3964 = vmatprep.mubr.bf16.mxu0 %v550_v53  ;;  %3988 = vmatprep.mubr.bf16.mxu1 %v562_v54  ;;  %v573_v53 = vld [vmem:[#allocation2 + $0x48] sm:$0xff] }
  0x8d   : > { %v597_v54 = vld [vmem:[#allocation2 + $0x108] sm:$0xff] }
  0x93   : > { %3965 = vmatmul.mubr.bf16.gmra.mrb[20].mxu0 %v551_v55  ;;  %3989 = vmatmul.mubr.bf16.gmra.mrb[20].mxu1 %v563_v56 }
 0x13e   : > { %v3946_v61 = vpop.f32.mrb[0].mxu0  ;;  %v3970_v62 = vpop.f32.mrb[0].mxu1 }
 0x13f   : > { %v903_v1 = vadd.f32 %v3946_v61, %v566_v57  ;;  %v927_v2 = vadd.f32 %v3970_v62, %v590_v58  ;;  %v710_v3 = vpop.f32.mrb[1].mxu0  ;;  %v806_v4 = vpop.f32.mrb[1].mxu1 }
 0x140   : > { %v901_v7 = vadd.f32 %v710_v3, %v564_v59  ;;  %v925_v8 = vadd.f32 %v806_v4, %v588_v60  ;;  %v3947_v9 = vpop.f32.mrb[2].mxu0  ;;  %v3971_v10 = vpop.f32.mrb[2].mxu1  ;;  %v576_v3 = vld [vmem:[#allocation2 + $0x60] sm:$0xff] }
 0x141   : > { %952 = vst.msk [vmem:[#allocation2 + $0x10] sm:$0xff] %vm949_vm1, %v903_v1  ;;  %976 = vst.msk [vmem:[#allocation2 + $0xd0] sm:$0xff] %vm949_vm1, %v927_v2  ;;  %v904_v11 = vadd.f32 %v3947_v9, %v567_v63  ;;  %v928_v12 = vadd.f32 %v3971_v10, %v591_v0  ;;  %v713_v13 = vpop.f32.mrb[3].mxu0  ;;  %v809_v14 = vpop.f32.mrb[3].mxu1  ;;  %v578_v1 = vld [vmem:[#allocation2 + $0x70] sm:$0xff]  ;;  %v600_v4 = vld [vmem:[#allocation2 + $0x120] sm:$0xff] }
 0x142   : > { %950 = vst.msk [vmem:[#allocation2] sm:$0xff] %vm949_vm1, %v901_v7  ;;  %974 = vst.msk [vmem:[#allocation2 + $0xc0] sm:$0xff] %vm949_vm1, %v925_v8  ;;  %v902_v15 = vadd.f32 %v713_v13, %v565_v5  ;;  %v926_v16 = vadd.f32 %v809_v14, %v589_v6  ;;  %v602_v2 = vld [vmem:[#allocation2 + $0x130] sm:$0xff]  ;;  %v579_v7 = vld [vmem:[#allocation2 + $0x78] sm:$0xff] }
 0x143   : > { %953 = vst.msk [vmem:[#allocation2 + $0x18] sm:$0xff] %vm949_vm1, %v904_v11  ;;  %977 = vst.msk [vmem:[#allocation2 + $0xd8] sm:$0xff] %vm949_vm1, %v928_v12  ;;  %v603_v8 = vld [vmem:[#allocation2 + $0x138] sm:$0xff]  ;;  %v577_v13 = vld [vmem:[#allocation2 + $0x68] sm:$0xff] }
 0x144   : > { %951 = vst.msk [vmem:[#allocation2 + $0x8] sm:$0xff] %vm949_vm1, %v902_v15  ;;  %975 = vst.msk [vmem:[#allocation2 + $0xc8] sm:$0xff] %vm949_vm1, %v926_v16  ;;  %v601_v14 = vld [vmem:[#allocation2 + $0x128] sm:$0xff] }
 0x146   : > { %v3950_v21 = vpop.f32.mrb[4].mxu0  ;;  %v3974_v22 = vpop.f32.mrb[4].mxu1 }
 0x147   : > { %v907_v25 = vadd.f32 %v3950_v21, %v570_v17  ;;  %v931_v26 = vadd.f32 %v3974_v22, %v594_v18  ;;  %v726_v27 = vpop.f32.mrb[5].mxu0  ;;  %v822_v28 = vpop.f32.mrb[5].mxu1 }
 0x148   : > { %v905_v31 = vadd.f32 %v726_v27, %v568_v19  ;;  %v929_v32 = vadd.f32 %v822_v28, %v592_v20  ;;  %v3951_v33 = vpop.f32.mrb[6].mxu0  ;;  %v3975_v34 = vpop.f32.mrb[6].mxu1  ;;  %v580_v27 = vld [vmem:[#allocation2 + $0x80] sm:$0xff] }
 0x149   : > { %956 = vst.msk [vmem:[#allocation2 + $0x30] sm:$0xff] %vm949_vm1, %v907_v25  ;;  %980 = vst.msk [vmem:[#allocation2 + $0xf0] sm:$0xff] %vm949_vm1, %v931_v26  ;;  %v908_v35 = vadd.f32 %v3951_v33, %v571_v23  ;;  %v932_v36 = vadd.f32 %v3975_v34, %v595_v24  ;;  %v729_v37 = vpop.f32.mrb[7].mxu0  ;;  %v825_v38 = vpop.f32.mrb[7].mxu1  ;;  %v582_v25 = vld [vmem:[#allocation2 + $0x90] sm:$0xff]  ;;  %v604_v28 = vld [vmem:[#allocation2 + $0x140] sm:$0xff] }
 0x14a   : > { %954 = vst.msk [vmem:[#allocation2 + $0x20] sm:$0xff] %vm949_vm1, %v905_v31  ;;  %978 = vst.msk [vmem:[#allocation2 + $0xe0] sm:$0xff] %vm949_vm1, %v929_v32  ;;  %v906_v39 = vadd.f32 %v729_v37, %v569_v29  ;;  %v930_v40 = vadd.f32 %v825_v38, %v593_v30  ;;  %v606_v26 = vld [vmem:[#allocation2 + $0x150] sm:$0xff]  ;;  %v583_v31 = vld [vmem:[#allocation2 + $0x98] sm:$0xff] }
 0x14b   : > { %957 = vst.msk [vmem:[#allocation2 + $0x38] sm:$0xff] %vm949_vm1, %v908_v35  ;;  %981 = vst.msk [vmem:[#allocation2 + $0xf8] sm:$0xff] %vm949_vm1, %v932_v36  ;;  %v607_v32 = vld [vmem:[#allocation2 + $0x158] sm:$0xff]  ;;  %v581_v37 = vld [vmem:[#allocation2 + $0x88] sm:$0xff] }
 0x14c   : > { %955 = vst.msk [vmem:[#allocation2 + $0x28] sm:$0xff] %vm949_vm1, %v906_v39  ;;  %979 = vst.msk [vmem:[#allocation2 + $0xe8] sm:$0xff] %vm949_vm1, %v930_v40  ;;  %v605_v38 = vld [vmem:[#allocation2 + $0x148] sm:$0xff] }
 0x14e   : > { %v3954_v45 = vpop.f32.mrb[8].mxu0  ;;  %v3978_v46 = vpop.f32.mrb[8].mxu1 }
 0x14f   : > { %v911_v49 = vadd.f32 %v3954_v45, %v574_v41  ;;  %v935_v50 = vadd.f32 %v3978_v46, %v598_v42  ;;  %v742_v51 = vpop.f32.mrb[9].mxu0  ;;  %v838_v52 = vpop.f32.mrb[9].mxu1 }
 0x150   : > { %v909_v55 = vadd.f32 %v742_v51, %v572_v43  ;;  %v933_v56 = vadd.f32 %v838_v52, %v596_v44  ;;  %v3955_v57 = vpop.f32.mrb[10].mxu0  ;;  %v3979_v58 = vpop.f32.mrb[10].mxu1  ;;  %v584_v51 = vld [vmem:[#allocation2 + $0xa0] sm:$0xff] }
 0x151   : > { %960 = vst.msk [vmem:[#allocation2 + $0x50] sm:$0xff] %vm949_vm1, %v911_v49  ;;  %984 = vst.msk [vmem:[#allocation2 + $0x110] sm:$0xff] %vm949_vm1, %v935_v50  ;;  %v912_v59 = vadd.f32 %v3955_v57, %v575_v47  ;;  %v936_v60 = vadd.f32 %v3979_v58, %v599_v48  ;;  %v745_v61 = vpop.f32.mrb[11].mxu0  ;;  %v841_v62 = vpop.f32.mrb[11].mxu1  ;;  %v586_v49 = vld [vmem:[#allocation2 + $0xb0] sm:$0xff]  ;;  %v608_v52 = vld [vmem:[#allocation2 + $0x160] sm:$0xff] }
 0x152   : > { %958 = vst.msk [vmem:[#allocation2 + $0x40] sm:$0xff] %vm949_vm1, %v909_v55  ;;  %982 = vst.msk [vmem:[#allocation2 + $0x100] sm:$0xff] %vm949_vm1, %v933_v56  ;;  %v910_v63 = vadd.f32 %v745_v61, %v573_v53  ;;  %v934_v0 = vadd.f32 %v841_v62, %v597_v54  ;;  %v610_v50 = vld [vmem:[#allocation2 + $0x170] sm:$0xff]  ;;  %v587_v55 = vld [vmem:[#allocation2 + $0xb8] sm:$0xff] }
 0x153   : > { %961 = vst.msk [vmem:[#allocation2 + $0x58] sm:$0xff] %vm949_vm1, %v912_v59  ;;  %985 = vst.msk [vmem:[#allocation2 + $0x118] sm:$0xff] %vm949_vm1, %v936_v60  ;;  %v611_v56 = vld [vmem:[#allocation2 + $0x178] sm:$0xff]  ;;  %v585_v61 = vld [vmem:[#allocation2 + $0xa8] sm:$0xff] }
 0x154   : > { %959 = vst.msk [vmem:[#allocation2 + $0x48] sm:$0xff] %vm949_vm1, %v910_v63  ;;  %983 = vst.msk [vmem:[#allocation2 + $0x108] sm:$0xff] %vm949_vm1, %v934_v0  ;;  %v609_v62 = vld [vmem:[#allocation2 + $0x168] sm:$0xff] }
 0x156   : > { %v3958_v5 = vpop.f32.mrb[12].mxu0  ;;  %v3982_v6 = vpop.f32.mrb[12].mxu1 }
 0x157   : > { %v915_v9 = vadd.f32 %v3958_v5, %v578_v1  ;;  %v939_v10 = vadd.f32 %v3982_v6, %v602_v2  ;;  %v758_v11 = vpop.f32.mrb[13].mxu0  ;;  %v854_v12 = vpop.f32.mrb[13].mxu1 }
 0x158   : > { %v913_v15 = vadd.f32 %v758_v11, %v576_v3  ;;  %v937_v16 = vadd.f32 %v854_v12, %v600_v4  ;;  %v3959_v17 = vpop.f32.mrb[14].mxu0  ;;  %v3983_v18 = vpop.f32.mrb[14].mxu1 }
 0x159   : > { %964 = vst.msk [vmem:[#allocation2 + $0x70] sm:$0xff] %vm949_vm1, %v915_v9  ;;  %988 = vst.msk [vmem:[#allocation2 + $0x130] sm:$0xff] %vm949_vm1, %v939_v10  ;;  %v916_v19 = vadd.f32 %v3959_v17, %v579_v7  ;;  %v940_v20 = vadd.f32 %v3983_v18, %v603_v8  ;;  %v761_v21 = vpop.f32.mrb[15].mxu0  ;;  %v857_v22 = vpop.f32.mrb[15].mxu1 }
 0x15a   : > { %962 = vst.msk [vmem:[#allocation2 + $0x60] sm:$0xff] %vm949_vm1, %v913_v15  ;;  %986 = vst.msk [vmem:[#allocation2 + $0x120] sm:$0xff] %vm949_vm1, %v937_v16  ;;  %v914_v23 = vadd.f32 %v761_v21, %v577_v13  ;;  %v938_v24 = vadd.f32 %v857_v22, %v601_v14 }
 0x15b   : > { %965 = vst.msk [vmem:[#allocation2 + $0x78] sm:$0xff] %vm949_vm1, %v916_v19  ;;  %989 = vst.msk [vmem:[#allocation2 + $0x138] sm:$0xff] %vm949_vm1, %v940_v20 }
 0x15c   : > { %963 = vst.msk [vmem:[#allocation2 + $0x68] sm:$0xff] %vm949_vm1, %v914_v23  ;;  %987 = vst.msk [vmem:[#allocation2 + $0x128] sm:$0xff] %vm949_vm1, %v938_v24 }
 0x15e   : > { %v3962_v29 = vpop.f32.mrb[16].mxu0  ;;  %v3986_v30 = vpop.f32.mrb[16].mxu1 }
 0x15f   : > { %v919_v33 = vadd.f32 %v3962_v29, %v582_v25  ;;  %v943_v34 = vadd.f32 %v3986_v30, %v606_v26  ;;  %v774_v35 = vpop.f32.mrb[17].mxu0  ;;  %v870_v36 = vpop.f32.mrb[17].mxu1 }
 0x160   : > { %v917_v39 = vadd.f32 %v774_v35, %v580_v27  ;;  %v941_v40 = vadd.f32 %v870_v36, %v604_v28  ;;  %v3963_v41 = vpop.f32.mrb[18].mxu0  ;;  %v3987_v42 = vpop.f32.mrb[18].mxu1 }
 0x161   : > { %968 = vst.msk [vmem:[#allocation2 + $0x90] sm:$0xff] %vm949_vm1, %v919_v33  ;;  %992 = vst.msk [vmem:[#allocation2 + $0x150] sm:$0xff] %vm949_vm1, %v943_v34  ;;  %v920_v43 = vadd.f32 %v3963_v41, %v583_v31  ;;  %v944_v44 = vadd.f32 %v3987_v42, %v607_v32  ;;  %v777_v45 = vpop.f32.mrb[19].mxu0  ;;  %v873_v46 = vpop.f32.mrb[19].mxu1 }
 0x162   : > { %966 = vst.msk [vmem:[#allocation2 + $0x80] sm:$0xff] %vm949_vm1, %v917_v39  ;;  %990 = vst.msk [vmem:[#allocation2 + $0x140] sm:$0xff] %vm949_vm1, %v941_v40  ;;  %v918_v47 = vadd.f32 %v777_v45, %v581_v37  ;;  %v942_v48 = vadd.f32 %v873_v46, %v605_v38 }
 0x163   : > { %969 = vst.msk [vmem:[#allocation2 + $0x98] sm:$0xff] %vm949_vm1, %v920_v43  ;;  %993 = vst.msk [vmem:[#allocation2 + $0x158] sm:$0xff] %vm949_vm1, %v944_v44 }
 0x164   : > { %967 = vst.msk [vmem:[#allocation2 + $0x88] sm:$0xff] %vm949_vm1, %v918_v47  ;;  %991 = vst.msk [vmem:[#allocation2 + $0x148] sm:$0xff] %vm949_vm1, %v942_v48 }
 0x166   : > { %v3966_v53 = vpop.f32.mrb[20].mxu0  ;;  %v3990_v54 = vpop.f32.mrb[20].mxu1  ;;  %1001 = sbr.rel (%p3575_p13) target bundleno = 1393 (0x571), region = 102 }
 0x167   : > { %v923_v57 = vadd.f32 %v3966_v53, %v586_v49  ;;  %v947_v58 = vadd.f32 %v3990_v54, %v610_v50  ;;  %v790_v59 = vpop.f32.mrb[21].mxu0  ;;  %v886_v60 = vpop.f32.mrb[21].mxu1 }
 0x168   : > { %v921_v63 = vadd.f32 %v790_v59, %v584_v51  ;;  %v945_v0 = vadd.f32 %v886_v60, %v608_v52  ;;  %v3967_v1 = vpop.f32.mrb[22].mxu0  ;;  %v3991_v2 = vpop.f32.mrb[22].mxu1 }
 0x169   : > { %972 = vst.msk [vmem:[#allocation2 + $0xb0] sm:$0xff] %vm949_vm1, %v923_v57  ;;  %996 = vst.msk [vmem:[#allocation2 + $0x170] sm:$0xff] %vm949_vm1, %v947_v58  ;;  %v924_v3 = vadd.f32 %v3967_v1, %v587_v55  ;;  %v948_v4 = vadd.f32 %v3991_v2, %v611_v56  ;;  %v793_v5 = vpop.f32.mrb[23].mxu0  ;;  %v889_v6 = vpop.f32.mrb[23].mxu1 }
 0x16a   : > { %970 = vst.msk [vmem:[#allocation2 + $0xa0] sm:$0xff] %vm949_vm1, %v921_v63  ;;  %994 = vst.msk [vmem:[#allocation2 + $0x160] sm:$0xff] %vm949_vm1, %v945_v0  ;;  %v922_v7 = vadd.f32 %v793_v5, %v585_v61  ;;  %v946_v8 = vadd.f32 %v889_v6, %v609_v62 }
 0x16b   : > { %973 = vst.msk [vmem:[#allocation2 + $0xb8] sm:$0xff] %vm949_vm1, %v924_v3  ;;  %997 = vst.msk [vmem:[#allocation2 + $0x178] sm:$0xff] %vm949_vm1, %v948_v4 }
 0x16c   : > { %971 = vst.msk [vmem:[#allocation2 + $0xa8] sm:$0xff] %vm949_vm1, %v922_v7  ;;  %995 = vst.msk [vmem:[#allocation2 + $0x168] sm:$0xff] %vm949_vm1, %v946_v8 }
 0x16d   : > { %v1114_v9 = vld [vmem:[%s6314_s3] sm:$0xff]  ;;  %v1115_v10 = vld [vmem:[%s6314_s3 + $0x8] sm:$0xff]  ;;  %v1116_v11 = vld [vmem:[%s6314_s3 + $0x10] sm:$0xff]  ;;  %vm1637_vm2 = vcmask 261120   ;;  %vm2843_vm3 = vcmask 130048  }
 0x16e   : > { %v4256_v12 = vpack.c.bf16 %v1115_v10, %v1114_v9  ;;  %v1117_v13 = vld [vmem:[%s6314_s3 + $0x18] sm:$0xff]  ;;  %v1118_v15 = vld [vmem:[%s6314_s3 + $0x20] sm:$0xff]  ;;  %v1119_v16 = vld [vmem:[%s6314_s3 + $0x28] sm:$0xff] }
 0x16f   : > { %v4260_v14 = vpack.c.bf16 %v1117_v13, %v1116_v11  ;;  %v1002_v17 = vld [vmem:[#allocation2] sm:$0xff]  ;;  %v4264_v20 = vpack.c.bf16 %v1119_v16, %v1118_v15  ;;  %v1120_v21 = vld [vmem:[%s6314_s3 + $0x30] sm:$0xff]  ;;  %v1121_v22 = vld [vmem:[%s6314_s3 + $0x38] sm:$0xff] }
 0x170   : > { %4257 = vmatprep.subr.bf16.mxu0 %v4256_v12  ;;  %v4941_v18 = vld [vmem:[%s4795_s0] sm:$0xff]  ;;  %v4268_v23 = vpack.c.bf16 %v1121_v22, %v1120_v21  ;;  %v1003_v24 = vld [vmem:[#allocation2 + $0x8] sm:$0xff]  ;;  %v1004_v26 = vld [vmem:[#allocation2 + $0x10] sm:$0xff] }
 0x171   : > { %4259 = vmatpush3.bf16.msra.mxu0 %v4256_v12  ;;  %v1066_v19 = vadd.f32 %v4941_v18, %v1002_v17  ;;  %v4952_v25 = vld [vmem:[%s4795_s0 + $0x8] sm:$0xff]  ;;  %v4955_v27 = vld [vmem:[%s4795_s0 + $0x10] sm:$0xff]  ;;  %v1005_v30 = vld [vmem:[#allocation2 + $0x18] sm:$0xff] }
 0x172   : > { %4261 = vmatprep.subr.bf16.mxu0 %v4260_v14  ;;  %v1067_v28 = vadd.f32 %v4952_v25, %v1003_v24  ;;  %v1068_v29 = vadd.f32 %v4955_v27, %v1004_v26  ;;  %v4960_v31 = vld [vmem:[%s4795_s0 + $0x18] sm:$0xff]  ;;  %v1006_v32 = vld [vmem:[#allocation2 + $0x20] sm:$0xff]  ;;  %v1007_v36 = vld [vmem:[#allocation2 + $0x28] sm:$0xff] }
 0x173   : > { %4008 = vmatprep.mubr.msk.f32.mxu0 %vm949_vm1, %v1066_v19  ;;  %v4963_v33 = vld [vmem:[%s4795_s0 + $0x20] sm:$0xff]  ;;  %v1069_v34 = vadd.f32 %v4960_v31, %v1005_v30  ;;  %v4970_v37 = vld [vmem:[%s4795_s0 + $0x28] sm:$0xff]  ;;  %v1008_v38 = vld [vmem:[#allocation2 + $0x30] sm:$0xff] }
 0x174   : > { %v1070_v35 = vadd.f32 %v4963_v33, %v1006_v32  ;;  %v4973_v39 = vld [vmem:[%s4795_s0 + $0x30] sm:$0xff]  ;;  %v1071_v40 = vadd.f32 %v4970_v37, %v1007_v36  ;;  %v1009_v41 = vld [vmem:[#allocation2 + $0x38] sm:$0xff]  ;;  %v1626_v44 = vld [vmem:[%s6316_s5] sm:$0xff] }
 0x175   : > { %4263 = vmatpush3.bf16.msra.mxu0 %v4260_v14  ;;  %v4978_v42 = vld [vmem:[%s4795_s0 + $0x38] sm:$0xff]  ;;  %v1072_v43 = vadd.f32 %v4973_v39, %v1008_v38  ;;  %v1627_v45 = vld [vmem:[%s6316_s5 + $0x8] sm:$0xff]  ;;  %v1628_v46 = vld [vmem:[%s6316_s5 + $0x10] sm:$0xff] }
 0x176   : > { %4265 = vmatprep.subr.bf16.mxu0 %v4264_v20  ;;  %v1010_v47 = vld [vmem:[#allocation2 + $0x40] sm:$0xff]  ;;  %v4272_v49 = vpack.c.bf16 %v1627_v45, %v1626_v44  ;;  %v1629_v50 = vld [vmem:[%s6316_s5 + $0x18] sm:$0xff]  ;;  %v1073_v52 = vadd.f32 %v4978_v42, %v1009_v41  ;;  %v1011_v54 = vld [vmem:[#allocation2 + $0x48] sm:$0xff] }
 0x177   : > { %v4992_v48 = vld [vmem:[%s4795_s0 + $0x40] sm:$0xff]  ;;  %v4276_v51 = vpack.c.bf16 %v1629_v50, %v1628_v46  ;;  %v5002_v55 = vld [vmem:[%s4795_s0 + $0x48] sm:$0xff]  ;;  %v1012_v56 = vld [vmem:[#allocation2 + $0x50] sm:$0xff] }
 0x178   : > { %v1074_v53 = vadd.f32 %v4992_v48, %v1010_v47  ;;  %v5005_v57 = vld [vmem:[%s4795_s0 + $0x50] sm:$0xff]  ;;  %4320 = vmatprep.subr.bf16.mxu1 %v4272_v49  ;;  %v1075_v58 = vadd.f32 %v5002_v55, %v1011_v54  ;;  %v1013_v60 = vld [vmem:[#allocation2 + $0x58] sm:$0xff]  ;;  %v1014_v62 = vld [vmem:[#allocation2 + $0x60] sm:$0xff] }
 0x179   : > { %4267 = vmatpush3.bf16.msra.mxu0 %v4264_v20  ;;  %4322 = vmatpush3.bf16.msra.mxu1 %v4272_v49  ;;  %v1076_v59 = vadd.f32 %v5005_v57, %v1012_v56  ;;  %v5012_v61 = vld [vmem:[%s4795_s0 + $0x58] sm:$0xff]  ;;  %v5015_v63 = vld [vmem:[%s4795_s0 + $0x60] sm:$0xff]  ;;  %v1015_v2 = vld [vmem:[#allocation2 + $0x68] sm:$0xff] }
 0x17a   : > { %4269 = vmatprep.subr.bf16.mxu0 %v4268_v23  ;;  %4321 = vmatprep.subr.bf16.mxu1 %v4276_v51  ;;  %v1077_v0 = vadd.f32 %v5012_v61, %v1013_v60  ;;  %v1078_v1 = vadd.f32 %v5015_v63, %v1014_v62  ;;  %v5022_v3 = vld [vmem:[%s4795_s0 + $0x68] sm:$0xff]  ;;  %v1016_v4 = vld [vmem:[#allocation2 + $0x70] sm:$0xff]  ;;  %v1017_v8 = vld [vmem:[#allocation2 + $0x78] sm:$0xff] }
 0x17b   : > { %v5025_v5 = vld [vmem:[%s4795_s0 + $0x70] sm:$0xff]  ;;  %v1079_v6 = vadd.f32 %v5022_v3, %v1015_v2  ;;  %v5032_v9 = vld [vmem:[%s4795_s0 + $0x78] sm:$0xff]  ;;  %v1018_v10 = vld [vmem:[#allocation2 + $0x80] sm:$0xff] }
 0x17c   : > { %v1080_v7 = vadd.f32 %v5025_v5, %v1016_v4  ;;  %v1081_v11 = vadd.f32 %v5032_v9, %v1017_v8  ;;  %v1082_v12 = vadd.f32 %v4941_v18, %v1018_v10  ;;  %v1019_v13 = vld [vmem:[#allocation2 + $0x88] sm:$0xff]  ;;  %v1020_v14 = vld [vmem:[#allocation2 + $0x90] sm:$0xff]  ;;  %v1021_v17 = vld [vmem:[#allocation2 + $0x98] sm:$0xff] }
 0x17d   : > { %4271 = vmatpush3.bf16.msra.mxu0 %v4268_v23  ;;  %4323 = vmatpush3.bf16.msra.mxu1 %v4276_v51  ;;  %v1083_v15 = vadd.f32 %v4952_v25, %v1019_v13  ;;  %v1084_v16 = vadd.f32 %v4955_v27, %v1020_v14  ;;  %v1022_v19 = vld [vmem:[#allocation2 + $0xa0] sm:$0xff]  ;;  %v1085_v20 = vadd.f32 %v4960_v31, %v1021_v17  ;;  %v1023_v22 = vld [vmem:[#allocation2 + $0xa8] sm:$0xff]  ;;  %v1024_v23 = vld [vmem:[#allocation2 + $0xb0] sm:$0xff] }
 0x17e   : > { %4273 = vmatprep.subr.bf16.mxu0 %v4272_v49  ;;  %v1086_v21 = vadd.f32 %v4963_v33, %v1022_v19  ;;  %v1087_v24 = vadd.f32 %v4970_v37, %v1023_v22  ;;  %v1088_v26 = vadd.f32 %v4973_v39, %v1024_v23  ;;  %v1030_v41 = vld [vmem:[#allocation2 + $0xe0] sm:$0xff]  ;;  %v1031_v45 = vld [vmem:[#allocation2 + $0xe8] sm:$0xff]  ;;  %v1032_v46 = vld [vmem:[#allocation2 + $0xf0] sm:$0xff] }
 0x17f   : > { %v1094_v44 = vadd.f32 %v5015_v63, %v1030_v41  ;;  %v1095_v47 = vadd.f32 %v5022_v3, %v1031_v45  ;;  %v1033_v50 = vld [vmem:[#allocation2 + $0xf8] sm:$0xff]  ;;  %v1035_v54 = vld [vmem:[#allocation2 + $0x108] sm:$0xff]  ;;  %v1036_v56 = vld [vmem:[#allocation2 + $0x110] sm:$0xff] }
 0x180   : > { %4009 = vmatmul.mubr.msk.f32.vlgmr.msra.gmra.mrb[0].mxu0 %vm949_vm1, %v1067_v28  ;;  %v1025_v28 = vld [vmem:[#allocation2 + $0xb8] sm:$0xff]  ;;  %v1038_v62 = vld [vmem:[#allocation2 + $0x120] sm:$0xff]  ;;  %v1040_v2 = vld [vmem:[#allocation2 + $0x130] sm:$0xff] }
 0x181   : > { %4011 = vmatprep.mubr.msk.f32.mxu0 %vm949_vm1, %v1068_v29  ;;  %4275 = vmatpush3.bf16.msra.mxu0 %v4272_v49  ;;  %v1026_v29 = vld [vmem:[#allocation2 + $0xc0] sm:$0xff]  ;;  %v1089_v30 = vadd.f32 %v4978_v42, %v1025_v28  ;;  %v1096_v49 = vadd.f32 %v5025_v5, %v1032_v46  ;;  %v1037_v60 = vld [vmem:[#allocation2 + $0x118] sm:$0xff]  ;;  %v1044_v8 = vld [vmem:[#allocation2 + $0x150] sm:$0xff] }
 0x182   : > { %4277 = vmatprep.subr.bf16.mxu0 %v4276_v51  ;;  %v1090_v32 = vadd.f32 %v4992_v48, %v1026_v29  ;;  %v1041_v4 = vld [vmem:[#allocation2 + $0x138] sm:$0xff]  ;;  %v1048_v13 = vld [vmem:[#allocation2 + $0x170] sm:$0xff] }
 0x183   : > { %v1045_v10 = vld [vmem:[#allocation2 + $0x158] sm:$0xff]  ;;  %v2137_v45 = vld [vmem:[%s6318_s7 + $0x10] sm:$0xff] }
 0x184   : > { %4012 = vmatmul.mubr.msk.f32.gmra.mrb[2].mxu0 %vm949_vm1, %v1069_v34  ;;  %v1027_v34 = vld [vmem:[#allocation2 + $0xc8] sm:$0xff]  ;;  %v1049_v14 = vld [vmem:[#allocation2 + $0x178] sm:$0xff] }
 0x185   : > { %4014 = vmatprep.mubr.msk.f32.mxu0 %vm949_vm1, %v1070_v35  ;;  %4279 = vmatpush3.bf16.msra.mxu0 %v4276_v51  ;;  %v1028_v35 = vld [vmem:[#allocation2 + $0xd0] sm:$0xff]  ;;  %v1091_v36 = vadd.f32 %v5002_v55, %v1027_v34  ;;  %v1034_v51 = vld [vmem:[#allocation2 + $0x100] sm:$0xff]  ;;  %v2138_v46 = vld [vmem:[%s6318_s7 + $0x18] sm:$0xff] }
 0x186   : > { %v1092_v38 = vadd.f32 %v5005_v57, %v1028_v35 }
 0x188   : > { %4015 = vmatmul.mubr.msk.f32.gmra.mrb[4].mxu0 %vm949_vm1, %v1071_v40  ;;  %v1029_v40 = vld [vmem:[#allocation2 + $0xd8] sm:$0xff] }
 0x189   : > { %4017 = vmatprep.mubr.msk.f32.mxu0 %vm949_vm1, %v1072_v43  ;;  %v1093_v43 = vadd.f32 %v5012_v61, %v1029_v40 }
 0x18c   : > { %4018 = vmatmul.mubr.msk.f32.gmra.mrb[6].mxu0 %vm949_vm1, %v1073_v52  ;;  %v1097_v52 = vadd.f32 %v5032_v9, %v1033_v50 }
 0x18d   : > { %4020 = vmatprep.mubr.msk.f32.mxu0 %vm949_vm1, %v1074_v53  ;;  %v1098_v53 = vadd.f32 %v4941_v18, %v1034_v51  ;;  %v1102_v18 = vadd.f32 %v4963_v33, %v1038_v62 }
 0x190   : > { %4021 = vmatmul.mubr.msk.f32.gmra.mrb[8].mxu0 %vm949_vm1, %v1075_v58  ;;  %v1099_v58 = vadd.f32 %v4952_v25, %v1035_v54 }
 0x191   : > { %4023 = vmatprep.mubr.msk.f32.mxu0 %vm949_vm1, %v1076_v59  ;;  %v1100_v59 = vadd.f32 %v4955_v27, %v1036_v56  ;;  %v1104_v27 = vadd.f32 %v4973_v39, %v1040_v2  ;;  %v1108_v39 = vadd.f32 %v5005_v57, %v1044_v8  ;;  %v1112_v57 = vadd.f32 %v5025_v5, %v1048_v13  ;;  %v5111_v5 = vld [vmem:[%s6315_s4] ss:$0 sm:$0xff] }
 0x194   : > { %4024 = vmatmul.mubr.msk.f32.gmra.mrb[10].mxu0 %vm949_vm1, %v1077_v0  ;;  %v1101_v0 = vadd.f32 %v4960_v31, %v1037_v60  ;;  %v1105_v31 = vadd.f32 %v4978_v42, %v1041_v4  ;;  %v1109_v42 = vadd.f32 %v5012_v61, %v1045_v10  ;;  %v2135_v61 = vld [vmem:[%s6318_s7] sm:$0xff] }
 0x195   : > { %4026 = vmatprep.mubr.msk.f32.mxu0 %vm949_vm1, %v1078_v1  ;;  %v1039_v1 = vld [vmem:[#allocation2 + $0x128] sm:$0xff] }
 0x196   : > { %v1103_v25 = vadd.f32 %v4970_v37, %v1039_v1 }
 0x198   : > { %4027 = vmatmul.mubr.msk.f32.gmra.mrb[12].mxu0 %vm949_vm1, %v1079_v6  ;;  %v1042_v6 = vld [vmem:[#allocation2 + $0x140] sm:$0xff] }
 0x199   : > { %4029 = vmatprep.mubr.msk.f32.mxu0 %vm949_vm1, %v1080_v7  ;;  %v1106_v33 = vadd.f32 %v4992_v48, %v1042_v6  ;;  %v1043_v7 = vld [vmem:[#allocation2 + $0x148] sm:$0xff] }
 0x19a   : > { %v1107_v37 = vadd.f32 %v5002_v55, %v1043_v7 }
 0x19c   : > { %4030 = vmatmul.mubr.msk.f32.gmra.mrb[14].mxu0 %vm949_vm1, %v1081_v11  ;;  %v1046_v11 = vld [vmem:[#allocation2 + $0x160] sm:$0xff] }
 0x19d   : > { %4032 = vmatprep.mubr.msk.f32.mxu0 %vm949_vm1, %v1082_v12  ;;  %v1110_v48 = vadd.f32 %v5015_v63, %v1046_v11  ;;  %v1047_v12 = vld [vmem:[#allocation2 + $0x168] sm:$0xff] }
 0x19e   : > { %v1111_v55 = vadd.f32 %v5022_v3, %v1047_v12  ;;  %v2136_v63 = vld [vmem:[%s6318_s7 + $0x8] sm:$0xff] }
 0x19f   : > { %v4280_v3 = vpack.c.bf16 %v2136_v63, %v2135_v61 }
 0x1a0   : > { %4033 = vmatmul.mubr.msk.f32.gmra.mrb[16].mxu0 %vm949_vm1, %v1083_v15  ;;  %v1113_v15 = vadd.f32 %v5032_v9, %v1049_v14 }
 0x1a1   : > { %4035 = vmatprep.mubr.msk.f32.mxu0 %vm949_vm1, %v1084_v16  ;;  %4281 = vmatprep.subr.bf16.mxu1 %v4280_v3 }
 0x1a4   : > { %4036 = vmatmul.mubr.msk.f32.gmra.mrb[18].mxu0 %vm949_vm1, %v1085_v20 }
 0x1a5   : > { %4038 = vmatprep.mubr.msk.f32.mxu0 %vm949_vm1, %v1086_v21 }
 0x1a8   : > { %4039 = vmatmul.mubr.msk.f32.gmra.mrb[20].mxu0 %vm949_vm1, %v1087_v24 }
 0x1a9   : > { %4041 = vmatprep.mubr.msk.f32.mxu0 %vm949_vm1, %v1088_v26 }
 0x1ac   : > { %4042 = vmatmul.mubr.msk.f32.gmra.mrb[22].mxu0 %vm949_vm1, %v1089_v30 }
 0x1ad   : > { %4044 = vmatprep.mubr.msk.f32.mxu0 %vm949_vm1, %v1090_v32 }
 0x1b0   : > { %4045 = vmatmul.mubr.msk.f32.gmra.mrb[24].mxu0 %vm949_vm1, %v1091_v36 }
 0x1b1   : > { %4047 = vmatprep.mubr.msk.f32.mxu0 %vm949_vm1, %v1092_v38 }
 0x1b4   : > { %4048 = vmatmul.mubr.msk.f32.gmra.mrb[26].mxu0 %vm949_vm1, %v1093_v43 }
 0x1b5   : > { %4050 = vmatprep.mubr.msk.f32.mxu0 %vm949_vm1, %v1094_v44 }
 0x1b8   : > { %4051 = vmatmul.mubr.msk.f32.gmra.mrb[28].mxu0 %vm949_vm1, %v1095_v47 }
 0x1b9   : > { %4053 = vmatprep.mubr.msk.f32.mxu0 %vm949_vm1, %v1096_v49 }
 0x1bc   : > { %4054 = vmatmul.mubr.msk.f32.gmra.mrb[30].mxu0 %vm949_vm1, %v1097_v52 }
 0x1bd   : > { %4056 = vmatprep.mubr.msk.f32.mxu0 %vm949_vm1, %v1098_v53  ;;  %v4284_v53 = vpack.c.bf16 %v2138_v46, %v2137_v45 }
 0x1c0   : > { %4057 = vmatmul.mubr.msk.f32.gmra.mrb[32].mxu0 %vm949_vm1, %v1099_v58 }
 0x1c1   : > { %4059 = vmatprep.mubr.msk.f32.mxu0 %vm949_vm1, %v1100_v59 }
 0x1c4   : > { %4060 = vmatmul.mubr.msk.f32.gmra.mrb[34].mxu0 %vm949_vm1, %v1101_v0 }
 0x1c5   : > { %4062 = vmatprep.mubr.msk.f32.mxu0 %vm949_vm1, %v1102_v18 }
 0x1c8   : > { %4063 = vmatmul.mubr.msk.f32.gmra.mrb[36].mxu0 %vm949_vm1, %v1103_v25 }
 0x1c9   : > { %4065 = vmatprep.mubr.msk.f32.mxu0 %vm949_vm1, %v1104_v27 }
 0x1cc   : > { %4066 = vmatmul.mubr.msk.f32.gmra.mrb[38].mxu0 %vm949_vm1, %v1105_v31 }
 0x1cd   : > { %4068 = vmatprep.mubr.msk.f32.mxu0 %vm949_vm1, %v1106_v33 }
 0x1d0   : > { %4069 = vmatmul.mubr.msk.f32.gmra.mrb[40].mxu0 %vm949_vm1, %v1107_v37 }
 0x1d1   : > { %4071 = vmatprep.mubr.msk.f32.mxu0 %vm949_vm1, %v1108_v39 }
 0x1d4   : > { %4072 = vmatmul.mubr.msk.f32.gmra.mrb[42].mxu0 %vm949_vm1, %v1109_v42 }
 0x1d5   : > { %4074 = vmatprep.mubr.msk.f32.mxu0 %vm949_vm1, %v1110_v48 }
 0x1d8   : > { %4075 = vmatmul.mubr.msk.f32.gmra.mrb[44].mxu0 %vm949_vm1, %v1111_v55 }
 0x1d9   : > { %4077 = vmatprep.mubr.msk.f32.mxu0 %vm949_vm1, %v1112_v57 }
 0x1dc   : > { %4078 = vmatmul.mubr.msk.f32.gmra.mrb[46].mxu0 %vm949_vm1, %v1113_v15 }
 0x253   : > { %v4010_v9 = vpop.f32.mrb[0].mxu0 }
 0x254   : > { %v1345_v16 = vadd.f32 %v4010_v9, %v5111_v5  ;;  %v1339_v17 = vpop.f32.mrb[1].mxu0 }
 0x255   : > { %v1340_v19 = vadd.f32 %v5111_v5, %v1339_v17 }
 0x256   : > { %v1579_v22 = vmax.f32 %v1345_v16, 0.0 }
 0x257   : > { %v1578_v20 = vmax.f32 %v1340_v19, 0.0  ;;  %v4013_v21 = vpop.f32.mrb[2].mxu0 }
 0x258   : > { %v1355_v23 = vadd.f32 %v4013_v21, %v5111_v5  ;;  %v1349_v24 = vpop.f32.mrb[3].mxu0 }
 0x259   : > { %v1350_v26 = vadd.f32 %v5111_v5, %v1349_v24  ;;  %4088 = vmatprep.mubr.msk.f32.mxu0 %vm1637_vm2, %v1578_v20 }
 0x25a   : > { %4089 = vmatmul.mubr.msk.f32.vlgmr.msra.gmra.mrb[48].mxu0 %vm1637_vm2, %v1579_v22  ;;  %v1581_v30 = vmax.f32 %v1355_v23, 0.0 }
 0x25b   : > { %v1580_v28 = vmax.f32 %v1350_v26, 0.0  ;;  %v4016_v29 = vpop.f32.mrb[4].mxu0 }
 0x25c   : > { %v1365_v32 = vadd.f32 %v4016_v29, %v5111_v5  ;;  %v1359_v34 = vpop.f32.mrb[5].mxu0 }
 0x25d   : > { %v1360_v35 = vadd.f32 %v5111_v5, %v1359_v34  ;;  %4091 = vmatprep.mubr.msk.f32.mxu0 %vm1637_vm2, %v1580_v28 }
 0x25e   : > { %v1583_v36 = vmax.f32 %v1365_v32, 0.0  ;;  %4092 = vmatmul.mubr.msk.f32.gmra.mrb[50].mxu0 %vm1637_vm2, %v1581_v30 }
 0x25f   : > { %v1582_v38 = vmax.f32 %v1360_v35, 0.0  ;;  %v4019_v40 = vpop.f32.mrb[6].mxu0 }
 0x260   : > { %v1375_v41 = vadd.f32 %v4019_v40, %v5111_v5  ;;  %v1369_v43 = vpop.f32.mrb[7].mxu0 }
 0x261   : > { %v1370_v44 = vadd.f32 %v5111_v5, %v1369_v43  ;;  %4094 = vmatprep.mubr.msk.f32.mxu0 %vm1637_vm2, %v1582_v38 }
 0x262   : > { %v1585_v47 = vmax.f32 %v1375_v41, 0.0  ;;  %4095 = vmatmul.mubr.msk.f32.gmra.mrb[52].mxu0 %vm1637_vm2, %v1583_v36 }
 0x263   : > { %v1584_v49 = vmax.f32 %v1370_v44, 0.0  ;;  %v4022_v50 = vpop.f32.mrb[8].mxu0 }
 0x264   : > { %v1385_v51 = vadd.f32 %v4022_v50, %v5111_v5  ;;  %v1379_v52 = vpop.f32.mrb[9].mxu0 }
 0x265   : > { %v1380_v54 = vadd.f32 %v5111_v5, %v1379_v52  ;;  %4097 = vmatprep.mubr.msk.f32.mxu1 %vm1637_vm2, %v1584_v49 }
 0x266   : > { %v1587_v56 = vmax.f32 %v1385_v51, 0.0  ;;  %4098 = vmatmul.mubr.msk.f32.vlgmr.msra.gmra.mrb[0].mxu1 %vm1637_vm2, %v1585_v47 }
 0x267   : > { %v1586_v58 = vmax.f32 %v1380_v54, 0.0  ;;  %v4025_v59 = vpop.f32.mrb[10].mxu0  ;;  %4283 = vmatpush3.bf16.msra.mxu1 %v4280_v3 }
 0x268   : > { %v1395_v60 = vadd.f32 %v4025_v59, %v5111_v5  ;;  %v1389_v62 = vpop.f32.mrb[11].mxu0  ;;  %4285 = vmatprep.subr.bf16.mxu1 %v4284_v53 }
 0x269   : > { %v1390_v0 = vadd.f32 %v5111_v5, %v1389_v62  ;;  %4100 = vmatprep.mubr.msk.f32.mxu1 %vm1637_vm2, %v1586_v58 }
 0x26a   : > { %v1589_v18 = vmax.f32 %v1395_v60, 0.0  ;;  %4101 = vmatmul.mubr.msk.f32.gmra.mrb[2].mxu1 %vm1637_vm2, %v1587_v56 }
 0x26b   : > { %v1588_v1 = vmax.f32 %v1390_v0, 0.0  ;;  %v4028_v2 = vpop.f32.mrb[12].mxu0  ;;  %4287 = vmatpush3.bf16.msra.mxu1 %v4284_v53 }
 0x26c   : > { %v1405_v25 = vadd.f32 %v4028_v2, %v5111_v5  ;;  %v1399_v27 = vpop.f32.mrb[13].mxu0 }
 0x26d   : > { %v1400_v4 = vadd.f32 %v5111_v5, %v1399_v27  ;;  %4103 = vmatprep.mubr.msk.f32.mxu1 %vm1637_vm2, %v1588_v1 }
 0x26e   : > { %v1591_v6 = vmax.f32 %v1405_v25, 0.0  ;;  %4104 = vmatmul.mubr.msk.f32.gmra.mrb[4].mxu1 %vm1637_vm2, %v1589_v18 }
 0x26f   : > { %v1590_v31 = vmax.f32 %v1400_v4, 0.0  ;;  %v4031_v33 = vpop.f32.mrb[14].mxu0 }
 0x270   : > { %v1415_v7 = vadd.f32 %v4031_v33, %v5111_v5  ;;  %v1409_v8 = vpop.f32.mrb[15].mxu0 }
 0x271   : > { %v1410_v37 = vadd.f32 %v5111_v5, %v1409_v8  ;;  %4106 = vmatprep.mubr.msk.f32.mxu1 %vm1637_vm2, %v1590_v31 }
 0x272   : > { %v1593_v39 = vmax.f32 %v1415_v7, 0.0  ;;  %4107 = vmatmul.mubr.msk.f32.gmra.mrb[6].mxu1 %vm1637_vm2, %v1591_v6 }
 0x273   : > { %v1592_v10 = vmax.f32 %v1410_v37, 0.0  ;;  %v4034_v11 = vpop.f32.mrb[16].mxu0 }
 0x274   : > { %v1425_v42 = vadd.f32 %v4034_v11, %v5111_v5  ;;  %v1419_v48 = vpop.f32.mrb[17].mxu0 }
 0x275   : > { %v1420_v12 = vadd.f32 %v5111_v5, %v1419_v48  ;;  %4109 = vmatprep.mubr.msk.f32.mxu1 %vm1637_vm2, %v1592_v10 }
 0x276   : > { %v1595_v13 = vmax.f32 %v1425_v42, 0.0  ;;  %4110 = vmatmul.mubr.msk.f32.gmra.mrb[8].mxu1 %vm1637_vm2, %v1593_v39 }
 0x277   : > { %v1594_v55 = vmax.f32 %v1420_v12, 0.0  ;;  %v4037_v57 = vpop.f32.mrb[18].mxu0 }
 0x278   : > { %v1435_v14 = vadd.f32 %v4037_v57, %v5111_v5  ;;  %v1429_v15 = vpop.f32.mrb[19].mxu0 }
 0x279   : > { %v1430_v61 = vadd.f32 %v5111_v5, %v1429_v15  ;;  %4112 = vmatprep.mubr.msk.f32.mxu1 %vm1637_vm2, %v1594_v55 }
 0x27a   : > { %v1597_v63 = vmax.f32 %v1435_v14, 0.0  ;;  %4113 = vmatmul.mubr.msk.f32.gmra.mrb[10].mxu1 %vm1637_vm2, %v1595_v13 }
 0x27b   : > { %v1596_v3 = vmax.f32 %v1430_v61, 0.0  ;;  %v4040_v9 = vpop.f32.mrb[20].mxu0 }
 0x27c   : > { %v1445_v16 = vadd.f32 %v4040_v9, %v5111_v5  ;;  %v1439_v17 = vpop.f32.mrb[21].mxu0 }
 0x27d   : > { %v1440_v19 = vadd.f32 %v5111_v5, %v1439_v17  ;;  %4115 = vmatprep.mubr.msk.f32.mxu1 %vm1637_vm2, %v1596_v3 }
 0x27e   : > { %v1599_v20 = vmax.f32 %v1445_v16, 0.0  ;;  %4116 = vmatmul.mubr.msk.f32.gmra.mrb[12].mxu1 %vm1637_vm2, %v1597_v63 }
 0x27f   : > { %v1598_v21 = vmax.f32 %v1440_v19, 0.0  ;;  %v4043_v22 = vpop.f32.mrb[22].mxu0 }
 0x280   : > { %v1455_v23 = vadd.f32 %v4043_v22, %v5111_v5  ;;  %v1449_v24 = vpop.f32.mrb[23].mxu0 }
 0x281   : > { %v1450_v26 = vadd.f32 %v5111_v5, %v1449_v24  ;;  %4118 = vmatprep.mubr.msk.f32.mxu1 %vm1637_vm2, %v1598_v21 }
 0x282   : > { %v1601_v28 = vmax.f32 %v1455_v23, 0.0  ;;  %4119 = vmatmul.mubr.msk.f32.gmra.mrb[14].mxu1 %vm1637_vm2, %v1599_v20 }
 0x283   : > { %v1600_v29 = vmax.f32 %v1450_v26, 0.0  ;;  %v4046_v30 = vpop.f32.mrb[24].mxu0 }
 0x284   : > { %v1465_v32 = vadd.f32 %v4046_v30, %v5111_v5  ;;  %v1459_v34 = vpop.f32.mrb[25].mxu0 }
 0x285   : > { %v1460_v35 = vadd.f32 %v5111_v5, %v1459_v34  ;;  %4121 = vmatprep.mubr.msk.f32.mxu1 %vm1637_vm2, %v1600_v29 }
 0x286   : > { %v1603_v36 = vmax.f32 %v1465_v32, 0.0  ;;  %4122 = vmatmul.mubr.msk.f32.gmra.mrb[16].mxu1 %vm1637_vm2, %v1601_v28 }
 0x287   : > { %v1602_v38 = vmax.f32 %v1460_v35, 0.0  ;;  %v4049_v40 = vpop.f32.mrb[26].mxu0 }
 0x288   : > { %v1475_v41 = vadd.f32 %v4049_v40, %v5111_v5  ;;  %v1469_v43 = vpop.f32.mrb[27].mxu0 }
 0x289   : > { %v1470_v44 = vadd.f32 %v5111_v5, %v1469_v43  ;;  %4124 = vmatprep.mubr.msk.f32.mxu1 %vm1637_vm2, %v1602_v38 }
 0x28a   : > { %v1605_v45 = vmax.f32 %v1475_v41, 0.0  ;;  %4125 = vmatmul.mubr.msk.f32.gmra.mrb[18].mxu1 %vm1637_vm2, %v1603_v36 }
 0x28b   : > { %v1604_v46 = vmax.f32 %v1470_v44, 0.0  ;;  %v4052_v47 = vpop.f32.mrb[28].mxu0  ;;  %v2139_v44 = vld [vmem:[%s6318_s7 + $0x20] sm:$0xff] }
 0x28c   : > { %v1485_v49 = vadd.f32 %v4052_v47, %v5111_v5  ;;  %v1479_v50 = vpop.f32.mrb[29].mxu0  ;;  %v2142_v47 = vld [vmem:[%s6318_s7 + $0x38] sm:$0xff] }
 0x28d   : > { %v1480_v51 = vadd.f32 %v5111_v5, %v1479_v50  ;;  %4127 = vmatprep.mubr.msk.f32.mxu1 %vm1637_vm2, %v1604_v46  ;;  %v2143_v50 = vld [vmem:[%s6318_s7 + $0x40] sm:$0xff] }
 0x28e   : > { %v1607_v52 = vmax.f32 %v1485_v49, 0.0  ;;  %4128 = vmatmul.mubr.msk.f32.gmra.mrb[20].mxu1 %vm1637_vm2, %v1605_v45  ;;  %v2140_v45 = vld [vmem:[%s6318_s7 + $0x28] sm:$0xff] }
 0x28f   : > { %v1606_v53 = vmax.f32 %v1480_v51, 0.0  ;;  %v4055_v54 = vpop.f32.mrb[30].mxu0  ;;  %v4288_v46 = vpack.c.bf16 %v2140_v45, %v2139_v44  ;;  %v2144_v51 = vld [vmem:[%s6318_s7 + $0x48] sm:$0xff] }
 0x290   : > { %v1495_v56 = vadd.f32 %v4055_v54, %v5111_v5  ;;  %v1489_v58 = vpop.f32.mrb[31].mxu0 }
 0x291   : > { %v1490_v59 = vadd.f32 %v5111_v5, %v1489_v58  ;;  %4130 = vmatprep.mubr.msk.f32.mxu1 %vm1637_vm2, %v1606_v53  ;;  %4289 = vmatprep.subr.bf16.mxu0 %v4288_v46  ;;  %v5236_v53 = vld [vmem:[%s6317_s6] ss:$0 sm:$0xff] }
 0x292   : > { %v1609_v60 = vmax.f32 %v1495_v56, 0.0  ;;  %4131 = vmatmul.mubr.msk.f32.gmra.mrb[22].mxu1 %vm1637_vm2, %v1607_v52  ;;  %4291 = vmatpush3.bf16.msra.mxu0 %v4288_v46  ;;  %v4296_v52 = vpack.c.bf16 %v2144_v51, %v2143_v50 }
 0x293   : > { %v1608_v62 = vmax.f32 %v1490_v59, 0.0  ;;  %v4058_v0 = vpop.f32.mrb[32].mxu0 }
 0x294   : > { %v1505_v18 = vadd.f32 %v4058_v0, %v5111_v5  ;;  %v1499_v1 = vpop.f32.mrb[33].mxu0  ;;  %4297 = vmatprep.subr.bf16.mxu1 %v4296_v52 }
 0x295   : > { %v1500_v2 = vadd.f32 %v5111_v5, %v1499_v1  ;;  %4133 = vmatprep.mubr.msk.f32.mxu1 %vm1637_vm2, %v1608_v62  ;;  %v2146_v62 = vld [vmem:[%s6318_s7 + $0x58] sm:$0xff] }
 0x296   : > { %v1611_v25 = vmax.f32 %v1505_v18, 0.0  ;;  %4134 = vmatmul.mubr.msk.f32.gmra.mrb[24].mxu1 %vm1637_vm2, %v1609_v60  ;;  %v2145_v60 = vld [vmem:[%s6318_s7 + $0x50] sm:$0xff] }
 0x297   : > { %v1610_v27 = vmax.f32 %v1500_v2, 0.0  ;;  %v4061_v4 = vpop.f32.mrb[34].mxu0 }
 0x298   : > { %v1515_v6 = vadd.f32 %v4061_v4, %v5111_v5  ;;  %v1509_v31 = vpop.f32.mrb[35].mxu0 }
 0x299   : > { %v1510_v33 = vadd.f32 %v5111_v5, %v1509_v31  ;;  %4136 = vmatprep.mubr.msk.f32.mxu1 %vm1637_vm2, %v1610_v27  ;;  %v4300_v27 = vpack.c.bf16 %v2146_v62, %v2145_v60 }
 0x29a   : > { %v1613_v7 = vmax.f32 %v1515_v6, 0.0  ;;  %4137 = vmatmul.mubr.msk.f32.gmra.mrb[26].mxu1 %vm1637_vm2, %v1611_v25 }
 0x29b   : > { %v1612_v8 = vmax.f32 %v1510_v33, 0.0  ;;  %v4064_v37 = vpop.f32.mrb[36].mxu0 }
 0x29c   : > { %v1525_v39 = vadd.f32 %v4064_v37, %v5111_v5  ;;  %v1519_v10 = vpop.f32.mrb[37].mxu0 }
 0x29d   : > { %v1520_v11 = vadd.f32 %v5111_v5, %v1519_v10  ;;  %4139 = vmatprep.mubr.msk.f32.mxu1 %vm1637_vm2, %v1612_v8 }
 0x29e   : > { %v1615_v42 = vmax.f32 %v1525_v39, 0.0  ;;  %4140 = vmatmul.mubr.msk.f32.gmra.mrb[28].mxu1 %vm1637_vm2, %v1613_v7 }
 0x29f   : > { %v1614_v48 = vmax.f32 %v1520_v11, 0.0  ;;  %v4067_v12 = vpop.f32.mrb[38].mxu0 }
 0x2a0   : > { %v1535_v13 = vadd.f32 %v4067_v12, %v5111_v5  ;;  %v1529_v55 = vpop.f32.mrb[39].mxu0 }
 0x2a1   : > { %v1530_v57 = vadd.f32 %v5111_v5, %v1529_v55  ;;  %4142 = vmatprep.mubr.msk.f32.mxu1 %vm1637_vm2, %v1614_v48 }
 0x2a2   : > { %v1617_v14 = vmax.f32 %v1535_v13, 0.0  ;;  %4143 = vmatmul.mubr.msk.f32.gmra.mrb[30].mxu1 %vm1637_vm2, %v1615_v42 }
 0x2a3   : > { %v1616_v15 = vmax.f32 %v1530_v57, 0.0  ;;  %v4070_v61 = vpop.f32.mrb[40].mxu0 }
 0x2a4   : > { %v1545_v63 = vadd.f32 %v4070_v61, %v5111_v5  ;;  %v1539_v3 = vpop.f32.mrb[41].mxu0 }
 0x2a5   : > { %v1540_v9 = vadd.f32 %v5111_v5, %v1539_v3  ;;  %4145 = vmatprep.mubr.msk.f32.mxu1 %vm1637_vm2, %v1616_v15 }
 0x2a6   : > { %v1619_v16 = vmax.f32 %v1545_v63, 0.0  ;;  %4146 = vmatmul.mubr.msk.f32.gmra.mrb[32].mxu1 %vm1637_vm2, %v1617_v14 }
 0x2a7   : > { %v1618_v17 = vmax.f32 %v1540_v9, 0.0  ;;  %v4073_v19 = vpop.f32.mrb[42].mxu0 }
 0x2a8   : > { %v1555_v20 = vadd.f32 %v4073_v19, %v5111_v5  ;;  %v1549_v21 = vpop.f32.mrb[43].mxu0 }
 0x2a9   : > { %v1550_v22 = vadd.f32 %v5111_v5, %v1549_v21  ;;  %4148 = vmatprep.mubr.msk.f32.mxu1 %vm1637_vm2, %v1618_v17 }
 0x2aa   : > { %v1621_v23 = vmax.f32 %v1555_v20, 0.0  ;;  %4149 = vmatmul.mubr.msk.f32.gmra.mrb[34].mxu1 %vm1637_vm2, %v1619_v16 }
 0x2ab   : > { %v1620_v24 = vmax.f32 %v1550_v22, 0.0  ;;  %v4076_v26 = vpop.f32.mrb[44].mxu0 }
 0x2ac   : > { %v1565_v28 = vadd.f32 %v4076_v26, %v5111_v5  ;;  %v1559_v29 = vpop.f32.mrb[45].mxu0 }
 0x2ad   : > { %v1560_v30 = vadd.f32 %v5111_v5, %v1559_v29  ;;  %4151 = vmatprep.mubr.msk.f32.mxu1 %vm1637_vm2, %v1620_v24 }
 0x2ae   : > { %v1623_v32 = vmax.f32 %v1565_v28, 0.0  ;;  %4152 = vmatmul.mubr.msk.f32.gmra.mrb[36].mxu1 %vm1637_vm2, %v1621_v23 }
 0x2af   : > { %v1622_v34 = vmax.f32 %v1560_v30, 0.0  ;;  %v4079_v35 = vpop.f32.mrb[46].mxu0 }
 0x2b0   : > { %v1575_v36 = vadd.f32 %v4079_v35, %v5111_v5  ;;  %v1569_v38 = vpop.f32.mrb[47].mxu0 }
 0x2b1   : > { %v1570_v40 = vadd.f32 %v5111_v5, %v1569_v38  ;;  %4154 = vmatprep.mubr.msk.f32.mxu1 %vm1637_vm2, %v1622_v34  ;;  %v2141_v5 = vld [vmem:[%s6318_s7 + $0x30] sm:$0xff] }
 0x2b2   : > { %v1625_v41 = vmax.f32 %v1575_v36, 0.0  ;;  %4155 = vmatmul.mubr.msk.f32.gmra.mrb[38].mxu1 %vm1637_vm2, %v1623_v32  ;;  %v4292_v49 = vpack.c.bf16 %v2142_v47, %v2141_v5 }
 0x2b3   : > { %v1624_v43 = vmax.f32 %v1570_v40, 0.0 }
 0x2b4   : > { %4293 = vmatprep.subr.bf16.mxu0 %v4292_v49 }
 0x2b5   : > { %4157 = vmatprep.mubr.msk.f32.mxu1 %vm1637_vm2, %v1624_v43  ;;  %4295 = vmatpush3.bf16.msra.mxu0 %v4292_v49 }
 0x2b6   : > { %4158 = vmatmul.mubr.msk.f32.gmra.mrb[40].mxu1 %vm1637_vm2, %v1625_v41 }
 0x32d   : > { %v4090_v54 = vpop.f32.mrb[48].mxu0 }
 0x32e   : > { %v5239_v56 = vadd.f32 %v4090_v54, %v5236_v53  ;;  %v1848_v58 = vpop.f32.mrb[49].mxu0 }
 0x32f   : > { %v5242_v59 = vadd.f32 %v5236_v53, %v1848_v58 }
 0x330   : > { %v6366_v1 = vmax.f32 %v5239_v56, 0.0 }
 0x331   : > { %v6369_v0 = vmax.f32 %v5242_v59, 0.0  ;;  %v4093_v18 = vpop.f32.mrb[50].mxu0 }
 0x332   : > { %v5253_v2 = vadd.f32 %v4093_v18, %v5236_v53  ;;  %v1858_v25 = vpop.f32.mrb[51].mxu0 }
 0x333   : > { %v5256_v4 = vadd.f32 %v5236_v53, %v1858_v25  ;;  %4168 = vmatprep.mubr.msk.f32.mxu1 %vm1637_vm2, %v6369_v0 }
 0x334   : > { %6421 = vst [vmem:[#allocation5_spill] sm:$0xff] %v5253_v2  ;;  %4169 = vmatmul.mubr.msk.f32.vlgmr.msra.gmra.mrb[42].mxu1 %vm1637_vm2, %v6366_v1  ;;  %v6354_v33 = vmax.f32 %v5253_v2, 0.0 }
 0x335   : > { %v6363_v6 = vmax.f32 %v5256_v4, 0.0  ;;  %v4096_v31 = vpop.f32.mrb[52].mxu0  ;;  %4299 = vmatpush3.bf16.msra.mxu1 %v4296_v52 }
 0x336   : > { %v5267_v7 = vadd.f32 %v4096_v31, %v5236_v53  ;;  %v1868_v8 = vpop.f32.mrb[53].mxu0  ;;  %4301 = vmatprep.subr.bf16.mxu1 %v4300_v27 }
 0x337   : > { %v5270_v37 = vadd.f32 %v5236_v53, %v1868_v8  ;;  %4171 = vmatprep.mubr.msk.f32.mxu1 %vm1637_vm2, %v6363_v6 }
 0x338   : > { %6422 = vst [vmem:[#allocation6_spill] sm:$0xff] %v5267_v7  ;;  %v6343_v39 = vmax.f32 %v5267_v7, 0.0  ;;  %4172 = vmatmul.mubr.msk.f32.gmra.mrb[44].mxu1 %vm1637_vm2, %v6354_v33 }
 0x339   : > { %6423 = vst [vmem:[#allocation7_spill] sm:$0xff] %v5270_v37  ;;  %v6349_v10 = vmax.f32 %v5270_v37, 0.0  ;;  %v4099_v11 = vpop.f32.mrb[0].mxu1  ;;  %4303 = vmatpush3.bf16.msra.mxu1 %v4300_v27 }
 0x33a   : > { %v5281_v42 = vadd.f32 %v4099_v11, %v5236_v53  ;;  %v1878_v48 = vpop.f32.mrb[1].mxu1 }
 0x33b   : > { %v5284_v12 = vadd.f32 %v5236_v53, %v1878_v48  ;;  %4174 = vmatprep.mubr.msk.f32.mxu1 %vm1637_vm2, %v6349_v10 }
 0x33c   : > { %6424 = vst [vmem:[#allocation8_spill] sm:$0xff] %v5281_v42  ;;  %v6339_v13 = vmax.f32 %v5281_v42, 0.0  ;;  %4175 = vmatmul.mubr.msk.f32.gmra.mrb[46].mxu1 %vm1637_vm2, %v6343_v39 }
 0x33d   : > { %6425 = vst [vmem:[#allocation9_spill] sm:$0xff] %v5284_v12  ;;  %v6341_v55 = vmax.f32 %v5284_v12, 0.0  ;;  %v4102_v57 = vpop.f32.mrb[2].mxu1 }
 0x33e   : > { %v5295_v14 = vadd.f32 %v4102_v57, %v5236_v53  ;;  %v1888_v15 = vpop.f32.mrb[3].mxu1 }
 0x33f   : > { %v5298_v61 = vadd.f32 %v5236_v53, %v1888_v15  ;;  %4177 = vmatprep.mubr.msk.f32.mxu1 %vm1637_vm2, %v6341_v55 }
 0x340   : > { %6426 = vst [vmem:[#allocation10_spill] sm:$0xff] %v5295_v14  ;;  %v6335_v63 = vmax.f32 %v5295_v14, 0.0  ;;  %4178 = vmatmul.mubr.msk.f32.gmra.mrb[48].mxu1 %vm1637_vm2, %v6339_v13 }
 0x341   : > { %6427 = vst [vmem:[#allocation11_spill] sm:$0xff] %v5298_v61  ;;  %v6337_v3 = vmax.f32 %v5298_v61, 0.0  ;;  %v4105_v9 = vpop.f32.mrb[4].mxu1 }
 0x342   : > { %v5309_v16 = vadd.f32 %v4105_v9, %v5236_v53  ;;  %v1898_v17 = vpop.f32.mrb[5].mxu1 }
 0x343   : > { %v5312_v19 = vadd.f32 %v5236_v53, %v1898_v17  ;;  %4180 = vmatprep.mubr.msk.f32.mxu1 %vm1637_vm2, %v6337_v3 }
 0x344   : > { %6428 = vst [vmem:[#allocation12_spill] sm:$0xff] %v5309_v16  ;;  %v6329_v20 = vmax.f32 %v5309_v16, 0.0  ;;  %4181 = vmatmul.mubr.msk.f32.gmra.mrb[50].mxu1 %vm1637_vm2, %v6335_v63 }
 0x345   : > { %6429 = vst [vmem:[#allocation13_spill] sm:$0xff] %v5312_v19  ;;  %v6333_v21 = vmax.f32 %v5312_v19, 0.0  ;;  %v4108_v22 = vpop.f32.mrb[6].mxu1 }
 0x346   : > { %v5323_v23 = vadd.f32 %v4108_v22, %v5236_v53  ;;  %v1908_v24 = vpop.f32.mrb[7].mxu1 }
 0x347   : > { %v5326_v26 = vadd.f32 %v5236_v53, %v1908_v24  ;;  %4183 = vmatprep.mubr.msk.f32.mxu1 %vm1637_vm2, %v6333_v21 }
 0x348   : > { %6430 = vst [vmem:[#allocation14_spill] sm:$0xff] %v5323_v23  ;;  %v6324_v28 = vmax.f32 %v5323_v23, 0.0  ;;  %4184 = vmatmul.mubr.msk.f32.gmra.mrb[52].mxu1 %vm1637_vm2, %v6329_v20 }
 0x349   : > { %6431 = vst [vmem:[#allocation15_spill] sm:$0xff] %v5326_v26  ;;  %v6325_v29 = vmax.f32 %v5326_v26, 0.0  ;;  %v4111_v30 = vpop.f32.mrb[8].mxu1 }
 0x34a   : > { %v5337_v32 = vadd.f32 %v4111_v30, %v5236_v53  ;;  %v1918_v34 = vpop.f32.mrb[9].mxu1 }
 0x34b   : > { %v5340_v35 = vadd.f32 %v5236_v53, %v1918_v34  ;;  %4186 = vmatprep.mubr.msk.f32.mxu1 %vm1637_vm2, %v6325_v29 }
 0x34c   : > { %6432 = vst [vmem:[#allocation16_spill] sm:$0xff] %v5337_v32  ;;  %v6322_v36 = vmax.f32 %v5337_v32, 0.0  ;;  %4187 = vmatmul.mubr.msk.f32.gmra.mrb[54].mxu1 %vm1637_vm2, %v6324_v28 }
 0x34d   : > { %6433 = vst [vmem:[#allocation17_spill] sm:$0xff] %v5340_v35  ;;  %v6323_v38 = vmax.f32 %v5340_v35, 0.0  ;;  %v4114_v40 = vpop.f32.mrb[10].mxu1 }
 0x34e   : > { %v5351_v41 = vadd.f32 %v4114_v40, %v5236_v53  ;;  %v1928_v43 = vpop.f32.mrb[11].mxu1 }
 0x34f   : > { %v5354_v44 = vadd.f32 %v5236_v53, %v1928_v43  ;;  %4189 = vmatprep.mubr.msk.f32.mxu1 %vm1637_vm2, %v6323_v38 }
 0x350   : > { %v6365_v45 = vmax.f32 %v5351_v41, 0.0  ;;  %4190 = vmatmul.mubr.msk.f32.gmra.mrb[56].mxu1 %vm1637_vm2, %v6322_v36 }
 0x351   : > { %v6368_v46 = vmax.f32 %v5354_v44, 0.0  ;;  %v4117_v5 = vpop.f32.mrb[12].mxu1 }
 0x352   : > { %v5365_v47 = vadd.f32 %v4117_v5, %v5236_v53  ;;  %v1938_v49 = vpop.f32.mrb[13].mxu1 }
 0x353   : > { %v5368_v50 = vadd.f32 %v5236_v53, %v1938_v49  ;;  %4200 = vmatprep.mubr.msk.f32.mxu0 %vm1637_vm2, %v6368_v46 }
 0x354   : > { %6434 = vst [vmem:[#allocation18_spill] sm:$0xff] %v5365_v47  ;;  %v6353_v51 = vmax.f32 %v5365_v47, 0.0  ;;  %4201 = vmatmul.mubr.msk.f32.vlgmr.msra.gmra.mrb[54].mxu0 %vm1637_vm2, %v6365_v45 }
 0x355   : > { %v6360_v52 = vmax.f32 %v5368_v50, 0.0  ;;  %v4120_v54 = vpop.f32.mrb[14].mxu1 }
 0x356   : > { %v5379_v58 = vadd.f32 %v4120_v54, %v5236_v53  ;;  %v1948_v60 = vpop.f32.mrb[15].mxu1 }
 0x357   : > { %v5382_v62 = vadd.f32 %v5236_v53, %v1948_v60  ;;  %4203 = vmatprep.mubr.msk.f32.mxu0 %vm1637_vm2, %v6360_v52  ;;  %v5583_v52 = vld [vmem:[%s6319_s8] ss:$0 sm:$0xff] }
 0x358   : > { %6435 = vst [vmem:[#allocation19_spill] sm:$0xff] %v5379_v58  ;;  %v6342_v18 = vmax.f32 %v5379_v58, 0.0  ;;  %4204 = vmatmul.mubr.msk.f32.gmra.mrb[56].mxu0 %vm1637_vm2, %v6353_v51 }
 0x359   : > { %6436 = vst [vmem:[#allocation20_spill] sm:$0xff] %v5382_v62  ;;  %v6346_v25 = vmax.f32 %v5382_v62, 0.0  ;;  %v4123_v27 = vpop.f32.mrb[16].mxu1 }
 0x35a   : > { %v5393_v31 = vadd.f32 %v4123_v27, %v5236_v53  ;;  %v1958_v8 = vpop.f32.mrb[17].mxu1 }
 0x35b   : > { %v5396_v11 = vadd.f32 %v5236_v53, %v1958_v8  ;;  %4206 = vmatprep.mubr.msk.f32.mxu0 %vm1637_vm2, %v6346_v25 }
 0x35c   : > { %6437 = vst [vmem:[#allocation21_spill] sm:$0xff] %v5393_v31  ;;  %v6338_v48 = vmax.f32 %v5393_v31, 0.0  ;;  %4207 = vmatmul.mubr.msk.f32.gmra.mrb[58].mxu0 %vm1637_vm2, %v6342_v18 }
 0x35d   : > { %6438 = vst [vmem:[#allocation22_spill] sm:$0xff] %v5396_v11  ;;  %v6340_v57 = vmax.f32 %v5396_v11, 0.0  ;;  %v4126_v15 = vpop.f32.mrb[18].mxu1 }
 0x35e   : > { %v5407_v9 = vadd.f32 %v4126_v15, %v5236_v53  ;;  %v1968_v17 = vpop.f32.mrb[19].mxu1 }
 0x35f   : > { %v5410_v22 = vadd.f32 %v5236_v53, %v1968_v17  ;;  %4209 = vmatprep.mubr.msk.f32.mxu0 %vm1637_vm2, %v6340_v57 }
 0x360   : > { %6439 = vst [vmem:[#allocation23_spill] sm:$0xff] %v5407_v9  ;;  %v6334_v24 = vmax.f32 %v5407_v9, 0.0  ;;  %4210 = vmatmul.mubr.msk.f32.gmra.mrb[60].mxu0 %vm1637_vm2, %v6338_v48 }
 0x361   : > { %6440 = vst [vmem:[#allocation24_spill] sm:$0xff] %v5410_v22  ;;  %v6336_v30 = vmax.f32 %v5410_v22, 0.0  ;;  %v4129_v34 = vpop.f32.mrb[20].mxu1 }
 0x362   : > { %v5421_v40 = vadd.f32 %v4129_v34, %v5236_v53  ;;  %v1978_v43 = vpop.f32.mrb[21].mxu1 }
 0x363   : > { %v5424_v5 = vadd.f32 %v5236_v53, %v1978_v43  ;;  %4212 = vmatprep.mubr.msk.f32.mxu0 %vm1637_vm2, %v6336_v30 }
 0x364   : > { %6441 = vst [vmem:[#allocation25_spill] sm:$0xff] %v5421_v40  ;;  %v6326_v49 = vmax.f32 %v5421_v40, 0.0  ;;  %4213 = vmatmul.mubr.msk.f32.gmra.mrb[62].mxu0 %vm1637_vm2, %v6334_v24 }
 0x365   : > { %6442 = vst [vmem:[#allocation26_spill] sm:$0xff] %v5424_v5  ;;  %v6330_v54 = vmax.f32 %v5424_v5, 0.0  ;;  %v4132_v60 = vpop.f32.mrb[22].mxu1 }
 0x366   : > { %v5435_v27 = vadd.f32 %v4132_v60, %v5236_v53  ;;  %v1988_v8 = vpop.f32.mrb[23].mxu1 }
 0x367   : > { %v5438_v15 = vadd.f32 %v5236_v53, %v1988_v8  ;;  %4215 = vmatprep.mubr.msk.f32.mxu0 %vm1637_vm2, %v6330_v54 }
 0x368   : > { %6443 = vst [vmem:[#allocation27_spill] sm:$0xff] %v5435_v27  ;;  %v6328_v17 = vmax.f32 %v5435_v27, 0.0  ;;  %4216 = vmatmul.mubr.msk.f32.gmra.mrb[64].mxu0 %vm1637_vm2, %v6326_v49 }
 0x369   : > { %6444 = vst [vmem:[#allocation28_spill] sm:$0xff] %v5438_v15  ;;  %v6327_v34 = vmax.f32 %v5438_v15, 0.0  ;;  %v4135_v43 = vpop.f32.mrb[24].mxu1 }
 0x36a   : > { %v5449_v60 = vadd.f32 %v4135_v43, %v5236_v53  ;;  %v1998_v36 = vpop.f32.mrb[25].mxu1 }
 0x36b   : > { %v5452_v8 = vadd.f32 %v5236_v53, %v1998_v36  ;;  %4218 = vmatprep.mubr.msk.f32.mxu0 %vm1637_vm2, %v6327_v34 }
 0x36c   : > { %6445 = vst [vmem:[#allocation29_spill] sm:$0xff] %v5449_v60  ;;  %v6332_v38 = vmax.f32 %v5449_v60, 0.0  ;;  %4219 = vmatmul.mubr.msk.f32.gmra.mrb[66].mxu0 %vm1637_vm2, %v6328_v17 }
 0x36d   : > { %6446 = vst [vmem:[#allocation30_spill] sm:$0xff] %v5452_v8  ;;  %v6331_v28 = vmax.f32 %v5452_v8, 0.0  ;;  %v4138_v29 = vpop.f32.mrb[26].mxu1 }
 0x36e   : > { %v5463_v43 = vadd.f32 %v4138_v29, %v5236_v53  ;;  %v2008_v49 = vpop.f32.mrb[27].mxu1 }
 0x36f   : > { %v5466_v36 = vadd.f32 %v5236_v53, %v2008_v49  ;;  %4221 = vmatprep.mubr.msk.f32.mxu0 %vm1637_vm2, %v6331_v28 }
 0x370   : > { %v6364_v34 = vmax.f32 %v5463_v43, 0.0  ;;  %4222 = vmatmul.mubr.msk.f32.gmra.mrb[68].mxu0 %vm1637_vm2, %v6332_v38 }
 0x371   : > { %v6367_v17 = vmax.f32 %v5466_v36, 0.0  ;;  %v4141_v20 = vpop.f32.mrb[28].mxu1 }
 0x372   : > { %v5477_v29 = vadd.f32 %v4141_v20, %v5236_v53  ;;  %v2018_v54 = vpop.f32.mrb[29].mxu1 }
 0x373   : > { %v5480_v49 = vadd.f32 %v5236_v53, %v2018_v54  ;;  %4232 = vmatprep.mubr.msk.f32.mxu1 %vm1637_vm2, %v6367_v17 }
 0x374   : > { %6447 = vst [vmem:[#allocation31_spill] sm:$0xff] %v5477_v29  ;;  %v6350_v28 = vmax.f32 %v5477_v29, 0.0  ;;  %4233 = vmatmul.mubr.msk.f32.vlgmr.msra.gmra.mrb[58].mxu1 %vm1637_vm2, %v6364_v34 }
 0x375   : > { %6448 = vst [vmem:[#allocation32_spill] sm:$0xff] %v5480_v49  ;;  %v6358_v38 = vmax.f32 %v5480_v49, 0.0  ;;  %v4144_v21 = vpop.f32.mrb[30].mxu1 }
 0x376   : > { %v5491_v20 = vadd.f32 %v4144_v21, %v5236_v53  ;;  %v2028_v24 = vpop.f32.mrb[31].mxu1 }
 0x377   : > { %v5494_v54 = vadd.f32 %v5236_v53, %v2028_v24  ;;  %4235 = vmatprep.mubr.msk.f32.mxu1 %vm1637_vm2, %v6358_v38 }
 0x378   : > { %6449 = vst [vmem:[#allocation33_spill] sm:$0xff] %v5491_v20  ;;  %v6344_v63 = vmax.f32 %v5491_v20, 0.0  ;;  %4236 = vmatmul.mubr.msk.f32.gmra.mrb[60].mxu1 %vm1637_vm2, %v6350_v28 }
 0x379   : > { %6450 = vst [vmem:[#allocation34_spill] sm:$0xff] %v5494_v54  ;;  %v6345_v30 = vmax.f32 %v5494_v54, 0.0  ;;  %v4147_v3 = vpop.f32.mrb[32].mxu1 }
 0x37a   : > { %v5505_v21 = vadd.f32 %v4147_v3, %v5236_v53  ;;  %v2038_v48 = vpop.f32.mrb[33].mxu1 }
 0x37b   : > { %v5508_v24 = vadd.f32 %v5236_v53, %v2038_v48  ;;  %4238 = vmatprep.mubr.msk.f32.mxu1 %vm1637_vm2, %v6345_v30 }
 0x37c   : > { %6451 = vst [vmem:[#allocation35_spill] sm:$0xff] %v5505_v21  ;;  %v6348_v13 = vmax.f32 %v5505_v21, 0.0  ;;  %4239 = vmatmul.mubr.msk.f32.gmra.mrb[62].mxu1 %vm1637_vm2, %v6344_v63 }
 0x37d   : > { %6452 = vst [vmem:[#allocation36_spill] sm:$0xff] %v5508_v24  ;;  %v6347_v57 = vmax.f32 %v5508_v24, 0.0  ;;  %v4150_v55 = vpop.f32.mrb[34].mxu1 }
 0x37e   : > { %v5519_v3 = vadd.f32 %v4150_v55, %v5236_v53  ;;  %v2048_v18 = vpop.f32.mrb[35].mxu1 }
 0x37f   : > { %v5522_v48 = vadd.f32 %v5236_v53, %v2048_v18  ;;  %4241 = vmatprep.mubr.msk.f32.mxu1 %vm1637_vm2, %v6347_v57 }
 0x380   : > { %6453 = vst [vmem:[#allocation37_spill] sm:$0xff] %v5519_v3  ;;  %v6352_v39 = vmax.f32 %v5519_v3, 0.0  ;;  %4242 = vmatmul.mubr.msk.f32.gmra.mrb[64].mxu1 %vm1637_vm2, %v6348_v13 }
 0x381   : > { %6454 = vst [vmem:[#allocation38_spill] sm:$0xff] %v5522_v48  ;;  %v6351_v63 = vmax.f32 %v5522_v48, 0.0  ;;  %v4153_v30 = vpop.f32.mrb[36].mxu1 }
 0x382   : > { %v5533_v55 = vadd.f32 %v4153_v30, %v5236_v53  ;;  %v2058_v25 = vpop.f32.mrb[37].mxu1 }
 0x383   : > { %v5536_v18 = vadd.f32 %v5236_v53, %v2058_v25  ;;  %4244 = vmatprep.mubr.msk.f32.mxu1 %vm1637_vm2, %v6351_v63 }
 0x384   : > { %6455 = vst [vmem:[#allocation39_spill] sm:$0xff] %v5533_v55  ;;  %v6356_v57 = vmax.f32 %v5533_v55, 0.0  ;;  %4245 = vmatmul.mubr.msk.f32.gmra.mrb[66].mxu1 %vm1637_vm2, %v6352_v39 }
 0x385   : > { %6456 = vst [vmem:[#allocation40_spill] sm:$0xff] %v5536_v18  ;;  %v6355_v13 = vmax.f32 %v5536_v18, 0.0  ;;  %v4156_v10 = vpop.f32.mrb[38].mxu1 }
 0x386   : > { %v5547_v30 = vadd.f32 %v4156_v10, %v5236_v53  ;;  %v2068_v28 = vpop.f32.mrb[39].mxu1 }
 0x387   : > { %v5550_v25 = vadd.f32 %v5236_v53, %v2068_v28  ;;  %4247 = vmatprep.mubr.msk.f32.mxu1 %vm1637_vm2, %v6355_v13 }
 0x388   : > { %6457 = vst [vmem:[#allocation41_spill] sm:$0xff] %v5547_v30  ;;  %v6359_v63 = vmax.f32 %v5547_v30, 0.0  ;;  %4248 = vmatmul.mubr.msk.f32.gmra.mrb[68].mxu1 %vm1637_vm2, %v6356_v57 }
 0x389   : > { %6458 = vst [vmem:[#allocation42_spill] sm:$0xff] %v5550_v25  ;;  %v6357_v39 = vmax.f32 %v5550_v25, 0.0  ;;  %v4159_v51 = vpop.f32.mrb[40].mxu1 }
 0x38a   : > { %v5561_v10 = vadd.f32 %v4159_v51, %v5236_v53  ;;  %v2078_v33 = vpop.f32.mrb[41].mxu1 }
 0x38b   : > { %v5564_v28 = vadd.f32 %v5236_v53, %v2078_v33  ;;  %4250 = vmatprep.mubr.msk.f32.mxu1 %vm1637_vm2, %v6357_v39 }
 0x38c   : > { %6459 = vst [vmem:[#allocation43_spill] sm:$0xff] %v5561_v10  ;;  %v6362_v13 = vmax.f32 %v5561_v10, 0.0  ;;  %4251 = vmatmul.mubr.msk.f32.gmra.mrb[70].mxu1 %vm1637_vm2, %v6359_v63 }
 0x38d   : > { %6460 = vst [vmem:[#allocation44_spill] sm:$0xff] %v5564_v28  ;;  %v6361_v57 = vmax.f32 %v5564_v28, 0.0 }
 0x38f   : > { %4253 = vmatprep.mubr.msk.f32.mxu1 %vm1637_vm2, %v6361_v57 }
 0x390   : > { %4254 = vmatmul.mubr.msk.f32.gmra.mrb[72].mxu1 %vm1637_vm2, %v6362_v13 }
 0x407   : > { %v4170_v53 = vpop.f32.mrb[42].mxu1 }
 0x408   : > { %4391 = vtanh.f32 %v4170_v53  ;;  %v2261_v33 = vpop.f32.mrb[43].mxu1 }
 0x409   : > { %4393 = vtanh.f32 %v2261_v33 }
 0x40b   : > { %v4173_v51 = vpop.f32.mrb[44].mxu1 }
 0x40c   : > { %4395 = vtanh.f32 %v4173_v51  ;;  %v2271_v39 = vpop.f32.mrb[45].mxu1 }
 0x40d   : > { %4397 = vtanh.f32 %v2271_v39 }
 0x40f   : > { %v4176_v38 = vpop.f32.mrb[46].mxu1 }
 0x410   : > { %4399 = vtanh.f32 %v4176_v38  ;;  %v2281_v63 = vpop.f32.mrb[47].mxu1 }
 0x411   : > { %4401 = vtanh.f32 %v2281_v63 }
 0x412   : > { %v4392_v57 = vpop.eup %4391 }
 0x413   : > { %v4394_v13 = vpop.eup %4393  ;;  %v4179_v6 = vpop.f32.mrb[48].mxu1  ;;  %v2796_v53 = vmul.f32 %v4392_v57, %v5583_v52 }
 0x414   : > { %4403 = vtanh.f32 %v4179_v6  ;;  %v2291_v33 = vpop.f32.mrb[49].mxu1  ;;  %v2795_v38 = vmul.f32 %v4394_v13, %v5583_v52 }
 0x415   : > { %4405 = vtanh.f32 %v2291_v33  ;;  %v2847_v39 = vsel %vm2843_vm3, %v2796_v53, 0.0 }
 0x416   : > { %v4396_v51 = vpop.eup %4395  ;;  %2848 = vadd.xlane.f32.xlu0 %v2847_v39  ;;  %v2844_v17 = vsel %vm2843_vm3, %v2795_v38, 0.0 }
 0x417   : > { %v4398_v34 = vpop.eup %4397  ;;  %v4182_v45 = vpop.f32.mrb[50].mxu1  ;;  %v2798_v1 = vmul.f32 %v4396_v51, %v5583_v52 }
 0x418   : > { %4407 = vtanh.f32 %v4182_v45  ;;  %v2301_v63 = vpop.f32.mrb[51].mxu1  ;;  %v2797_v6 = vmul.f32 %v4398_v34, %v5583_v52 }
 0x419   : > { %4409 = vtanh.f32 %v2301_v63  ;;  %v2853_v57 = vsel %vm2843_vm3, %v2798_v1, 0.0 }
 0x41a   : > { %v4400_v33 = vpop.eup %4399  ;;  %2845 = vadd.xlane.f32.xlu0 %v2844_v17  ;;  %2854 = vadd.xlane.f32.xlu1 %v2853_v57  ;;  %v2850_v45 = vsel %vm2843_vm3, %v2797_v6, 0.0 }
 0x41b   : > { %v4402_v53 = vpop.eup %4401  ;;  %v4185_v13 = vpop.f32.mrb[52].mxu1  ;;  %v2800_v51 = vmul.f32 %v4400_v33, %v5583_v52 }
 0x41c   : > { %4411 = vtanh.f32 %v4185_v13  ;;  %v2311_v39 = vpop.f32.mrb[53].mxu1  ;;  %v2799_v46 = vmul.f32 %v4402_v53, %v5583_v52 }
 0x41d   : > { %4413 = vtanh.f32 %v2311_v39  ;;  %v2859_v13 = vsel %vm2843_vm3, %v2800_v51, 0.0 }
 0x41e   : > { %v4404_v63 = vpop.eup %4403  ;;  %2851 = vadd.xlane.f32.xlu1 %v2850_v45  ;;  %v2856_v1 = vsel %vm2843_vm3, %v2799_v46, 0.0 }
 0x41f   : > { %v4406_v38 = vpop.eup %4405  ;;  %2857 = vadd.xlane.f32.xlu0 %v2856_v1  ;;  %v4188_v34 = vpop.f32.mrb[54].mxu1  ;;  %v2802_v53 = vmul.f32 %v4404_v63, %v5583_v52 }
 0x420   : > { %4415 = vtanh.f32 %v4188_v34  ;;  %v2321_v17 = vpop.f32.mrb[55].mxu1  ;;  %v2801_v57 = vmul.f32 %v4406_v38, %v5583_v52 }
 0x421   : > { %4417 = vtanh.f32 %v2321_v17  ;;  %v2865_v34 = vsel %vm2843_vm3, %v2802_v53, 0.0 }
 0x422   : > { %v4408_v39 = vpop.eup %4407  ;;  %2860 = vadd.xlane.f32.xlu1 %v2859_v13  ;;  %v2862_v6 = vsel %vm2843_vm3, %v2801_v57, 0.0 }
 0x423   : > { %v4410_v33 = vpop.eup %4409  ;;  %2863 = vadd.xlane.f32.xlu0 %v2862_v6  ;;  %v4191_v45 = vpop.f32.mrb[56].mxu1  ;;  %v2804_v38 = vmul.f32 %v4408_v39, %v5583_v52 }
 0x424   : > { %4419 = vtanh.f32 %v4191_v45  ;;  %v2331_v46 = vpop.f32.mrb[57].mxu1  ;;  %v2803_v1 = vmul.f32 %v4410_v33, %v5583_v52 }
 0x425   : > { %4421 = vtanh.f32 %v2331_v46  ;;  %v2871_v45 = vsel %vm2843_vm3, %v2804_v38, 0.0 }
 0x426   : > { %v4412_v17 = vpop.eup %4411  ;;  %2866 = vadd.xlane.f32.xlu1 %v2865_v34  ;;  %v2868_v51 = vsel %vm2843_vm3, %v2803_v1, 0.0 }
 0x427   : > { %v4414_v63 = vpop.eup %4413  ;;  %v4202_v13 = vpop.f32.mrb[54].mxu0  ;;  %2869 = vadd.xlane.f32.xlu0 %v2868_v51  ;;  %v2806_v33 = vmul.f32 %v4412_v17, %v5583_v52 }
 0x428   : > { %4423 = vtanh.f32 %v4202_v13  ;;  %v2454_v57 = vpop.f32.mrb[55].mxu0  ;;  %v2805_v6 = vmul.f32 %v4414_v63, %v5583_v52 }
 0x429   : > { %4425 = vtanh.f32 %v2454_v57  ;;  %v2877_v13 = vsel %vm2843_vm3, %v2806_v33, 0.0  ;;  %v5618_v33 = vld [vmem:[%s6319_s8 + $0x1] ss:$0 sm:$0xff] }
 0x42a   : > { %v4416_v46 = vpop.eup %4415  ;;  %2872 = vadd.xlane.f32.xlu1 %v2871_v45  ;;  %v2874_v53 = vsel %vm2843_vm3, %v2805_v6, 0.0 }
 0x42b   : > { %v4418_v39 = vpop.eup %4417  ;;  %v4205_v34 = vpop.f32.mrb[56].mxu0  ;;  %2875 = vadd.xlane.f32.xlu0 %v2874_v53  ;;  %v2808_v63 = vmul.f32 %v4416_v46, %v5583_v52 }
 0x42c   : > { %4427 = vtanh.f32 %v4205_v34  ;;  %v2464_v1 = vpop.f32.mrb[57].mxu0  ;;  %v2807_v51 = vmul.f32 %v4418_v39, %v5583_v52 }
 0x42d   : > { %4429 = vtanh.f32 %v2464_v1  ;;  %v2883_v34 = vsel %vm2843_vm3, %v2808_v63, 0.0 }
 0x42e   : > { %v4420_v57 = vpop.eup %4419  ;;  %2878 = vadd.xlane.f32.xlu1 %v2877_v13  ;;  %v2880_v38 = vsel %vm2843_vm3, %v2807_v51, 0.0 }
 0x42f   : > { %v4422_v17 = vpop.eup %4421  ;;  %v4208_v45 = vpop.f32.mrb[58].mxu0  ;;  %2881 = vadd.xlane.f32.xlu0 %v2880_v38  ;;  %v2810_v39 = vmul.f32 %v4420_v57, %v5583_v52 }
 0x430   : > { %4431 = vtanh.f32 %v4208_v45  ;;  %v2474_v6 = vpop.f32.mrb[59].mxu0  ;;  %v2809_v53 = vmul.f32 %v4422_v17, %v5583_v52 }
 0x431   : > { %4433 = vtanh.f32 %v2474_v6  ;;  %v2889_v63 = vsel %vm2843_vm3, %v2810_v39, 0.0 }
 0x432   : > { %v4424_v46 = vpop.eup %4423  ;;  %2884 = vadd.xlane.f32.xlu1 %v2883_v34  ;;  %v2886_v1 = vsel %vm2843_vm3, %v2809_v53, 0.0 }
 0x433   : > { %v4426_v51 = vpop.eup %4425  ;;  %v4211_v13 = vpop.f32.mrb[60].mxu0  ;;  %2887 = vadd.xlane.f32.xlu0 %v2886_v1  ;;  %v2812_v52 = vmul.f32 %v4424_v46, %v5618_v33 }
 0x434   : > { %4435 = vtanh.f32 %v4211_v13  ;;  %v2484_v38 = vpop.f32.mrb[61].mxu0  ;;  %v2811_v17 = vmul.f32 %v4426_v51, %v5618_v33 }
 0x435   : > { %4437 = vtanh.f32 %v2484_v38  ;;  %v2895_v13 = vsel %vm2843_vm3, %v2812_v52, 0.0 }
 0x436   : > { %v4428_v57 = vpop.eup %4427  ;;  %2890 = vadd.xlane.f32.xlu1 %v2889_v63  ;;  %v2892_v45 = vsel %vm2843_vm3, %v2811_v17, 0.0 }
 0x437   : > { %v4430_v6 = vpop.eup %4429  ;;  %v4214_v34 = vpop.f32.mrb[62].mxu0  ;;  %2893 = vadd.xlane.f32.xlu0 %v2892_v45  ;;  %v2814_v51 = vmul.f32 %v4428_v57, %v5618_v33 }
 0x438   : > { %4439 = vtanh.f32 %v4214_v34  ;;  %v2494_v53 = vpop.f32.mrb[63].mxu0  ;;  %v2813_v1 = vmul.f32 %v4430_v6, %v5618_v33 }
 0x439   : > { %4441 = vtanh.f32 %v2494_v53  ;;  %v2901_v34 = vsel %vm2843_vm3, %v2814_v51, 0.0 }
 0x43a   : > { %v4432_v38 = vpop.eup %4431  ;;  %2896 = vadd.xlane.f32.xlu1 %v2895_v13  ;;  %v2898_v39 = vsel %vm2843_vm3, %v2813_v1, 0.0 }
 0x43b   : > { %v4434_v46 = vpop.eup %4433  ;;  %v4217_v63 = vpop.f32.mrb[64].mxu0  ;;  %2899 = vadd.xlane.f32.xlu0 %v2898_v39  ;;  %v2816_v6 = vmul.f32 %v4432_v38, %v5618_v33 }
 0x43c   : > { %4443 = vtanh.f32 %v4217_v63  ;;  %v2504_v17 = vpop.f32.mrb[65].mxu0  ;;  %v2815_v45 = vmul.f32 %v4434_v46, %v5618_v33 }
 0x43d   : > { %4445 = vtanh.f32 %v2504_v17  ;;  %v2907_v63 = vsel %vm2843_vm3, %v2816_v6, 0.0 }
 0x43e   : > { %v4436_v53 = vpop.eup %4435  ;;  %2902 = vadd.xlane.f32.xlu1 %v2901_v34  ;;  %v2904_v52 = vsel %vm2843_vm3, %v2815_v45, 0.0 }
 0x43f   : > { %v4438_v57 = vpop.eup %4437  ;;  %v4220_v13 = vpop.f32.mrb[66].mxu0  ;;  %2905 = vadd.xlane.f32.xlu0 %v2904_v52  ;;  %v2818_v46 = vmul.f32 %v4436_v53, %v5618_v33 }
 0x440   : > { %4447 = vtanh.f32 %v4220_v13  ;;  %v2514_v1 = vpop.f32.mrb[67].mxu0  ;;  %v2817_v39 = vmul.f32 %v4438_v57, %v5618_v33 }
 0x441   : > { %4449 = vtanh.f32 %v2514_v1  ;;  %v2913_v13 = vsel %vm2843_vm3, %v2818_v46, 0.0 }
 0x442   : > { %v4440_v17 = vpop.eup %4439  ;;  %2908 = vadd.xlane.f32.xlu1 %v2907_v63  ;;  %v2910_v51 = vsel %vm2843_vm3, %v2817_v39, 0.0 }
 0x443   : > { %v4442_v38 = vpop.eup %4441  ;;  %v4223_v34 = vpop.f32.mrb[68].mxu0  ;;  %2911 = vadd.xlane.f32.xlu0 %v2910_v51  ;;  %v2820_v57 = vmul.f32 %v4440_v17, %v5618_v33 }
 0x444   : > { %4451 = vtanh.f32 %v4223_v34  ;;  %v2524_v45 = vpop.f32.mrb[69].mxu0  ;;  %v2819_v52 = vmul.f32 %v4442_v38, %v5618_v33 }
 0x445   : > { %4453 = vtanh.f32 %v2524_v45  ;;  %v2919_v34 = vsel %vm2843_vm3, %v2820_v57, 0.0 }
 0x446   : > { %v4444_v1 = vpop.eup %4443  ;;  %2914 = vadd.xlane.f32.xlu1 %v2913_v13  ;;  %v2916_v6 = vsel %vm2843_vm3, %v2819_v52, 0.0 }
 0x447   : > { %v4446_v53 = vpop.eup %4445  ;;  %2917 = vadd.xlane.f32.xlu0 %v2916_v6  ;;  %v4234_v63 = vpop.f32.mrb[58].mxu1  ;;  %v2822_v38 = vmul.f32 %v4444_v1, %v5618_v33 }
 0x448   : > { %4455 = vtanh.f32 %v4234_v63  ;;  %v2647_v39 = vpop.f32.mrb[59].mxu1  ;;  %v2821_v51 = vmul.f32 %v4446_v53, %v5618_v33 }
 0x449   : > { %4457 = vtanh.f32 %v2647_v39  ;;  %v2925_v63 = vsel %vm2843_vm3, %v2822_v38, 0.0  ;;  %v5655_v38 = vld [vmem:[%s6319_s8 + $0x2] ss:$0 sm:$0xff] }
 0x44a   : > { %v4448_v45 = vpop.eup %4447  ;;  %2920 = vadd.xlane.f32.xlu1 %v2919_v34  ;;  %v2922_v46 = vsel %vm2843_vm3, %v2821_v51, 0.0 }
 0x44b   : > { %v4450_v17 = vpop.eup %4449  ;;  %2923 = vadd.xlane.f32.xlu0 %v2922_v46  ;;  %v4237_v13 = vpop.f32.mrb[60].mxu1  ;;  %v2824_v53 = vmul.f32 %v4448_v45, %v5618_v33 }
 0x44c   : > { %4459 = vtanh.f32 %v4237_v13  ;;  %v2657_v52 = vpop.f32.mrb[61].mxu1  ;;  %v2823_v6 = vmul.f32 %v4450_v17, %v5618_v33 }
 0x44d   : > { %4461 = vtanh.f32 %v2657_v52  ;;  %v2931_v13 = vsel %vm2843_vm3, %v2824_v53, 0.0 }
 0x44e   : > { %v4452_v39 = vpop.eup %4451  ;;  %2926 = vadd.xlane.f32.xlu1 %v2925_v63  ;;  %v2928_v57 = vsel %vm2843_vm3, %v2823_v6, 0.0 }
 0x44f   : > { %v4454_v1 = vpop.eup %4453  ;;  %2929 = vadd.xlane.f32.xlu0 %v2928_v57  ;;  %v4240_v34 = vpop.f32.mrb[62].mxu1  ;;  %v2826_v17 = vmul.f32 %v4452_v39, %v5618_v33 }
 0x450   : > { %4463 = vtanh.f32 %v4240_v34  ;;  %v2667_v51 = vpop.f32.mrb[63].mxu1  ;;  %v2825_v46 = vmul.f32 %v4454_v1, %v5618_v33 }
 0x451   : > { %4465 = vtanh.f32 %v2667_v51  ;;  %v2937_v53 = vsel %vm2843_vm3, %v2826_v17, 0.0 }
 0x452   : > { %v4456_v45 = vpop.eup %4455  ;;  %2932 = vadd.xlane.f32.xlu1 %v2931_v13  ;;  %v2934_v52 = vsel %vm2843_vm3, %v2825_v46, 0.0 }
 0x453   : > { %v4458_v6 = vpop.eup %4457  ;;  %2935 = vadd.xlane.f32.xlu0 %v2934_v52  ;;  %v4243_v63 = vpop.f32.mrb[64].mxu1  ;;  %v2828_v33 = vmul.f32 %v4456_v45, %v5655_v38 }
 0x454   : > { %4467 = vtanh.f32 %v4243_v63  ;;  %v2677_v57 = vpop.f32.mrb[65].mxu1  ;;  %v2827_v1 = vmul.f32 %v4458_v6, %v5655_v38 }
 0x455   : > { %4469 = vtanh.f32 %v2677_v57  ;;  %v2943_v63 = vsel %vm2843_vm3, %v2828_v33, 0.0 }
 0x456   : > { %v4460_v39 = vpop.eup %4459  ;;  %2938 = vadd.xlane.f32.xlu1 %v2937_v53  ;;  %v2940_v34 = vsel %vm2843_vm3, %v2827_v1, 0.0 }
 0x457   : > { %v4462_v51 = vpop.eup %4461  ;;  %2941 = vadd.xlane.f32.xlu0 %v2940_v34  ;;  %v4246_v13 = vpop.f32.mrb[66].mxu1  ;;  %v2830_v6 = vmul.f32 %v4460_v39, %v5655_v38 }
 0x458   : > { %4471 = vtanh.f32 %v4246_v13  ;;  %v2687_v46 = vpop.f32.mrb[67].mxu1  ;;  %v2829_v52 = vmul.f32 %v4462_v51, %v5655_v38 }
 0x459   : > { %4473 = vtanh.f32 %v2687_v46  ;;  %v2949_v13 = vsel %vm2843_vm3, %v2830_v6, 0.0 }
 0x45a   : > { %v4464_v57 = vpop.eup %4463  ;;  %2944 = vadd.xlane.f32.xlu1 %v2943_v63  ;;  %v2946_v17 = vsel %vm2843_vm3, %v2829_v52, 0.0 }
 0x45b   : > { %v4466_v45 = vpop.eup %4465  ;;  %2947 = vadd.xlane.f32.xlu0 %v2946_v17  ;;  %v4249_v53 = vpop.f32.mrb[68].mxu1  ;;  %v2832_v51 = vmul.f32 %v4464_v57, %v5655_v38 }
 0x45c   : > { %4475 = vtanh.f32 %v4249_v53  ;;  %v2697_v1 = vpop.f32.mrb[69].mxu1  ;;  %v2831_v34 = vmul.f32 %v4466_v45, %v5655_v38 }
 0x45d   : > { %4477 = vtanh.f32 %v2697_v1  ;;  %v2955_v53 = vsel %vm2843_vm3, %v2832_v51, 0.0 }
 0x45e   : > { %v4468_v46 = vpop.eup %4467  ;;  %2950 = vadd.xlane.f32.xlu1 %v2949_v13  ;;  %v2952_v33 = vsel %vm2843_vm3, %v2831_v34, 0.0 }
 0x45f   : > { %v4470_v39 = vpop.eup %4469  ;;  %2953 = vadd.xlane.f32.xlu0 %v2952_v33  ;;  %v4252_v63 = vpop.f32.mrb[70].mxu1  ;;  %v2834_v45 = vmul.f32 %v4468_v46, %v5655_v38 }
 0x460   : > { %4479 = vtanh.f32 %v4252_v63  ;;  %v2707_v52 = vpop.f32.mrb[71].mxu1  ;;  %v2833_v17 = vmul.f32 %v4470_v39, %v5655_v38 }
 0x461   : > { %4481 = vtanh.f32 %v2707_v52  ;;  %v2961_v63 = vsel %vm2843_vm3, %v2834_v45, 0.0 }
 0x462   : > { %v4472_v1 = vpop.eup %4471  ;;  %2956 = vadd.xlane.f32.xlu1 %v2955_v53  ;;  %v2958_v6 = vsel %vm2843_vm3, %v2833_v17, 0.0 }
 0x463   : > { %v4474_v57 = vpop.eup %4473  ;;  %2959 = vadd.xlane.f32.xlu0 %v2958_v6  ;;  %v4255_v13 = vpop.f32.mrb[72].mxu1  ;;  %v2836_v39 = vmul.f32 %v4472_v1, %v5655_v38 }
 0x464   : > { %4483 = vtanh.f32 %v4255_v13  ;;  %v2717_v34 = vpop.f32.mrb[73].mxu1  ;;  %v2835_v33 = vmul.f32 %v4474_v57, %v5655_v38 }
 0x465   : > { %4485 = vtanh.f32 %v2717_v34  ;;  %v2967_v53 = vsel %vm2843_vm3, %v2836_v39, 0.0 }
 0x466   : > { %v4476_v52 = vpop.eup %4475  ;;  %2962 = vadd.xlane.f32.xlu1 %v2961_v63  ;;  %v2964_v51 = vsel %vm2843_vm3, %v2835_v33, 0.0 }
 0x467   : > { %v4478_v46 = vpop.eup %4477  ;;  %2965 = vadd.xlane.f32.xlu0 %v2964_v51  ;;  %v2838_v6 = vmul.f32 %v4476_v52, %v5655_v38 }
 0x468   : > { %v2837_v17 = vmul.f32 %v4478_v46, %v5655_v38 }
 0x469   : > { %v2973_v1 = vsel %vm2843_vm3, %v2838_v6, 0.0 }
 0x46a   : > { %v4480_v13 = vpop.eup %4479  ;;  %2968 = vadd.xlane.f32.xlu1 %v2967_v53  ;;  %v2970_v57 = vsel %vm2843_vm3, %v2837_v17, 0.0 }
 0x46b   : > { %v4482_v34 = vpop.eup %4481  ;;  %2971 = vadd.xlane.f32.xlu0 %v2970_v57  ;;  %v2840_v33 = vmul.f32 %v4480_v13, %v5655_v38 }
 0x46c   : > { %v2839_v45 = vmul.f32 %v4482_v34, %v5655_v38 }
 0x46d   : > { %v2979_v52 = vsel %vm2843_vm3, %v2840_v33, 0.0 }
 0x46e   : > { %v4484_v63 = vpop.eup %4483  ;;  %2974 = vadd.xlane.f32.xlu1 %v2973_v1  ;;  %v2976_v51 = vsel %vm2843_vm3, %v2839_v45, 0.0 }
 0x46f   : > { %v4486_v46 = vpop.eup %4485  ;;  %2977 = vadd.xlane.f32.xlu0 %v2976_v51  ;;  %v2842_v17 = vmul.f32 %v4484_v63, %v5655_v38 }
 0x470   : > { %v2841_v39 = vmul.f32 %v4486_v46, %v5655_v38 }
 0x471   : > { %v2985_v6 = vsel %vm2843_vm3, %v2842_v17, 0.0 }
 0x472   : > { %2980 = vadd.xlane.f32.xlu1 %v2979_v52  ;;  %v2982_v53 = vsel %vm2843_vm3, %v2841_v39, 0.0 }
 0x473   : > { %2983 = vadd.xlane.f32.xlu0 %v2982_v53 }
 0x476   : > { %2986 = vadd.xlane.f32.xlu1 %v2985_v6 }
 0x4a3   : > { %v2849_v13 = vpop.xlane.xlu0 %2848 }
 0x4a7   : > { %v2846_v57 = vpop.xlane.xlu0 %2845  ;;  %v5691_v34 = vpop.xlane.xlu1 %2854 }
 0x4ab   : > { %v5693_v45 = vpop.xlane.xlu1 %2851 }
 0x4ac   : > { %v5695_v1 = vpop.xlane.xlu0 %2857 }
 0x4af   : > { %v5697_v51 = vpop.xlane.xlu1 %2860 }
 0x4b0   : > { %v5699_v33 = vpop.xlane.xlu0 %2863 }
 0x4b3   : > { %v5701_v38 = vpop.xlane.xlu1 %2866 }
 0x4b4   : > { %v5703_v63 = vpop.xlane.xlu0 %2869 }
 0x4b7   : > { %v5705_v46 = vpop.xlane.xlu1 %2872 }
 0x4b8   : > { %v5707_v39 = vpop.xlane.xlu0 %2875 }
 0x4bb   : > { %v5709_v52 = vpop.xlane.xlu1 %2878 }
 0x4bc   : > { %v5711_v17 = vpop.xlane.xlu0 %2881 }
 0x4bf   : > { %v5713_v53 = vpop.xlane.xlu1 %2884 }
 0x4c0   : > { %v5715_v6 = vpop.xlane.xlu0 %2887 }
 0x4c1   : > { %6461 = vst [vmem:[#allocation45_spill] sm:$0xff] %v5715_v6 }
 0x4c3   : > { %v5717_v0 = vpop.xlane.xlu1 %2890 }
 0x4c4   : > { %6462 = vst [vmem:[#allocation46_spill] sm:$0xff] %v5717_v0  ;;  %v2894_v10 = vpop.xlane.xlu0 %2893 }
 0x4c5   : > { %v2988_v18 = vmax.f32 %v2846_v57, %v2894_v10 }
 0x4c7   : > { %v2897_v60 = vpop.xlane.xlu1 %2896 }
 0x4c8   : > { %v2900_v32 = vpop.xlane.xlu0 %2899  ;;  %v2990_v9 = vmax.f32 %v2849_v13, %v2897_v60 }
 0x4c9   : > { %v2992_v14 = vmax.f32 %v5693_v45, %v2900_v32 }
 0x4cb   : > { %v5719_v28 = vpop.xlane.xlu1 %2902 }
 0x4cc   : > { %v5721_v8 = vpop.xlane.xlu0 %2905  ;;  %v2994_v48 = vmax.f32 %v5691_v34, %v5719_v28 }
 0x4cd   : > { %v2996_v42 = vmax.f32 %v5695_v1, %v5721_v8 }
 0x4cf   : > { %v5723_v35 = vpop.xlane.xlu1 %2908 }
 0x4d0   : > { %v5725_v30 = vpop.xlane.xlu0 %2911  ;;  %v2998_v24 = vmax.f32 %v5697_v51, %v5723_v35 }
 0x4d1   : > { %v3000_v11 = vmax.f32 %v5699_v33, %v5725_v30 }
 0x4d3   : > { %v5727_v27 = vpop.xlane.xlu1 %2914 }
 0x4d4   : > { %v5729_v23 = vpop.xlane.xlu0 %2917 }
 0x4d7   : > { %v5731_v25 = vpop.xlane.xlu1 %2920 }
 0x4d8   : > { %v5733_v15 = vpop.xlane.xlu0 %2923 }
 0x4db   : > { %v5735_v26 = vpop.xlane.xlu1 %2926 }
 0x4dc   : > { %v5737_v55 = vpop.xlane.xlu0 %2929 }
 0x4df   : > { %v5739_v40 = vpop.xlane.xlu1 %2932 }
 0x4e0   : > { %v5741_v16 = vpop.xlane.xlu0 %2935 }
 0x4e1   : > { %6463 = vst [vmem:[#allocation47_spill] sm:$0xff] %v5741_v16 }
 0x4e3   : > { %v5743_v5 = vpop.xlane.xlu1 %2938 }
 0x4e4   : > { %6464 = vst [vmem:[#allocation48_spill] sm:$0xff] %v5743_v5  ;;  %v2942_v19 = vpop.xlane.xlu0 %2941 }
 0x4e5   : > { %v2989_v3 = vmax.f32 %v2988_v18, %v2942_v19 }
 0x4e7   : > { %v3020_v22 = vsub.f32 %v2846_v57, %v2989_v3  ;;  %v3036_v61 = vsub.f32 %v2894_v10, %v2989_v3  ;;  %v3052_v21 = vsub.f32 %v2942_v19, %v2989_v3  ;;  %v2945_v31 = vpop.xlane.xlu1 %2944  ;;  %v3002_v10 = vmax.f32 %v5701_v38, %v5727_v27 }
 0x4e8   : > { %v2991_v18 = vmax.f32 %v2990_v9, %v2945_v31  ;;  %v2948_v12 = vpop.xlane.xlu0 %2947 }
 0x4e9   : > { %v3068_v20 = vmul.f32 1.442695, %v3020_v22  ;;  %v3100_v58 = vmul.f32 1.442695, %v3036_v61  ;;  %v3132_v7 = vmul.f32 1.442695, %v3052_v21  ;;  %v2993_v54 = vmax.f32 %v2992_v14, %v2948_v12 }
 0x4ea   : > { %v3021_v19 = vsub.f32 %v2849_v13, %v2991_v18  ;;  %v3037_v3 = vsub.f32 %v2897_v60, %v2991_v18  ;;  %v3053_v57 = vsub.f32 %v2945_v31, %v2991_v18  ;;  %v3004_v14 = vmax.f32 %v5703_v63, %v5729_v23 }
 0x4eb   : > { %4487 = vpow2.f32 %v3068_v20  ;;  %v3022_v62 = vsub.f32 %v5693_v45, %v2993_v54  ;;  %v3038_v37 = vsub.f32 %v2900_v32, %v2993_v54  ;;  %v3054_v29 = vsub.f32 %v2948_v12, %v2993_v54  ;;  %v2951_v47 = vpop.xlane.xlu1 %2950 }
 0x4ec   : > { %4489 = vpow2.f32 %v3100_v58  ;;  %v3070_v2 = vmul.f32 1.442695, %v3021_v19  ;;  %v3102_v9 = vmul.f32 1.442695, %v3037_v3  ;;  %v3134_v49 = vmul.f32 1.442695, %v3053_v57  ;;  %v2954_v22 = vpop.xlane.xlu0 %2953 }
 0x4ed   : > { %v3006_v61 = vmax.f32 %v5705_v46, %v5731_v25  ;;  %4491 = vpow2.f32 %v3132_v7  ;;  %v3072_v60 = vmul.f32 1.442695, %v3022_v62  ;;  %v3104_v31 = vmul.f32 1.442695, %v3038_v37 }
 0x4ee   : > { %4493 = vpow2.f32 %v3070_v2  ;;  %v2995_v20 = vmax.f32 %v2994_v48, %v2951_v47  ;;  %v2997_v21 = vmax.f32 %v2996_v42, %v2954_v22  ;;  %v3008_v12 = vmax.f32 %v5707_v39, %v5733_v15 }
 0x4ef   : > { %v3010_v32 = vmax.f32 %v5709_v52, %v5735_v26  ;;  %4495 = vpow2.f32 %v3102_v9  ;;  %v3136_v58 = vmul.f32 1.442695, %v3054_v29  ;;  %v2957_v54 = vpop.xlane.xlu1 %2956  ;;  %v3012_v29 = vmax.f32 %v5711_v17, %v5737_v55 }
 0x4f0   : > { %4497 = vpow2.f32 %v3134_v49  ;;  %v3023_v13 = vsub.f32 %v5691_v34, %v2995_v20  ;;  %v3039_v45 = vsub.f32 %v5719_v28, %v2995_v20  ;;  %v3055_v7 = vsub.f32 %v2951_v47, %v2995_v20  ;;  %v5767_v62 = vpop.xlane.xlu0 %2959 }
 0x4f1   : > { %4499 = vpow2.f32 %v3072_v60  ;;  %v3024_v2 = vsub.f32 %v5695_v1, %v2997_v21  ;;  %v3040_v37 = vsub.f32 %v5721_v8, %v2997_v21  ;;  %v3056_v42 = vsub.f32 %v2954_v22, %v2997_v21 }
 0x4f2   : > { %4501 = vpow2.f32 %v3104_v31  ;;  %v3074_v48 = vmul.f32 1.442695, %v3023_v13  ;;  %v3106_v18 = vmul.f32 1.442695, %v3039_v45  ;;  %v3138_v19 = vmul.f32 1.442695, %v3055_v7 }
 0x4f3   : > { %4503 = vpow2.f32 %v3136_v58  ;;  %v3076_v47 = vmul.f32 1.442695, %v3024_v2  ;;  %v5775_v28 = vpop.xlane.xlu1 %2962  ;;  %v3108_v34 = vmul.f32 1.442695, %v3040_v37  ;;  %v2999_v1 = vmax.f32 %v2998_v24, %v2957_v54 }
 0x4f4   : > { %4505 = vpow2.f32 %v3074_v48  ;;  %v3001_v8 = vmax.f32 %v3000_v11, %v5767_v62  ;;  %v3140_v9 = vmul.f32 1.442695, %v3056_v42  ;;  %v3003_v22 = vmax.f32 %v3002_v10, %v5775_v28  ;;  %v5783_v60 = vpop.xlane.xlu0 %2965 }
 0x4f5   : > { %v5778_v3 = vpop.eup %4487  ;;  %4507 = vpow2.f32 %v3106_v18  ;;  %v3025_v20 = vsub.f32 %v5697_v51, %v2999_v1  ;;  %v3041_v24 = vsub.f32 %v5723_v35, %v2999_v1  ;;  %v3057_v21 = vsub.f32 %v2957_v54, %v2999_v1 }
 0x4f6   : > { %v5785_v31 = vpop.eup %4489  ;;  %4509 = vpow2.f32 %v3138_v19  ;;  %v3026_v13 = vsub.f32 %v5699_v33, %v3001_v8  ;;  %v3042_v10 = vsub.f32 %v5725_v30, %v3001_v8  ;;  %v3005_v51 = vmax.f32 %v3004_v14, %v5783_v60 }
 0x4f7   : > { %v5789_v11 = vpop.eup %4491  ;;  %v3164_v58 = vadd.f32 %v5785_v31, %v5778_v3  ;;  %4511 = vpow2.f32 %v3076_v47  ;;  %v3078_v7 = vmul.f32 1.442695, %v3025_v20  ;;  %v3110_v2 = vmul.f32 1.442695, %v3041_v24  ;;  %v2969_v20 = vpop.xlane.xlu1 %2968 }
 0x4f8   : > { %v5795_v45 = vpop.eup %4493  ;;  %4513 = vpow2.f32 %v3108_v34  ;;  %v3142_v54 = vmul.f32 1.442695, %v3057_v21  ;;  %v3058_v42 = vsub.f32 %v5767_v62, %v3001_v8  ;;  %v3027_v14 = vsub.f32 %v5701_v38, %v3003_v22  ;;  %v2972_v38 = vpop.xlane.xlu0 %2971 }
 0x4f9   : > { %v5798_v37 = vpop.eup %4495  ;;  %v5801_v35 = vadd.f32 %v5789_v11, %v3164_v58  ;;  %4515 = vpow2.f32 %v3140_v9  ;;  %v3080_v19 = vmul.f32 1.442695, %v3026_v13  ;;  %v3112_v47 = vmul.f32 1.442695, %v3042_v10 }
 0x4fa   : > { %v5804_v48 = vpop.eup %4497  ;;  %v3166_v33 = vadd.f32 %v5798_v37, %v5795_v45  ;;  %4517 = vpow2.f32 %v3078_v7  ;;  %v3043_v34 = vsub.f32 %v5727_v27, %v3003_v22  ;;  %v3059_v8 = vsub.f32 %v5775_v28, %v3003_v22 }
 0x4fb   : > { %v5811_v18 = vpop.eup %4499  ;;  %4519 = vrcp.f32 %v5801_v35  ;;  %v3028_v9 = vsub.f32 %v5703_v63, %v3005_v51  ;;  %v3144_v58 = vmul.f32 1.442695, %v3058_v42  ;;  %v3082_v27 = vmul.f32 1.442695, %v3027_v14 }
 0x4fc   : > { %v5815_v62 = vpop.eup %4501  ;;  %v5818_v1 = vadd.f32 %v5804_v48, %v3166_v33  ;;  %4521 = vpow2.f32 %v3110_v2  ;;  %v3114_v10 = vmul.f32 1.442695, %v3043_v34  ;;  %v3044_v7 = vsub.f32 %v5729_v23, %v3005_v51 }
 0x4fd   : > { %v5822_v24 = vpop.eup %4503  ;;  %v3168_v21 = vadd.f32 %v5815_v62, %v5811_v18  ;;  %4523 = vpow2.f32 %v3142_v54  ;;  %v3060_v28 = vsub.f32 %v5783_v60, %v3005_v51  ;;  %v3007_v2 = vmax.f32 %v3006_v61, %v2969_v20 }
 0x4fe   : > { %v5826_v13 = vpop.eup %4505  ;;  %4525 = vrcp.f32 %v5818_v1  ;;  %v3009_v54 = vmax.f32 %v3008_v12, %v2972_v38  ;;  %v3146_v60 = vmul.f32 1.442695, %v3059_v8  ;;  %v3084_v51 = vmul.f32 1.442695, %v3028_v9  ;;  %v2975_v8 = vpop.xlane.xlu1 %2974 }
 0x4ff   : > { %v5831_v63 = vpop.eup %4507  ;;  %v5834_v22 = vadd.f32 %v5822_v24, %v3168_v21  ;;  %4527 = vpow2.f32 %v3080_v19  ;;  %v3029_v14 = vsub.f32 %v5705_v46, %v3007_v2  ;;  %v3045_v61 = vsub.f32 %v5731_v25, %v3007_v2 }
 0x500   : > { %v5842_v42 = vpop.eup %4509  ;;  %v3170_v23 = vadd.f32 %v5831_v63, %v5826_v13  ;;  %4529 = vpow2.f32 %v3112_v47  ;;  %v3061_v19 = vsub.f32 %v2969_v20, %v3007_v2  ;;  %v3116_v21 = vmul.f32 1.442695, %v3044_v7  ;;  %v5862_v20 = vpop.xlane.xlu0 %2977 }
 0x501   : > { %v5846_v33 = vpop.eup %4511  ;;  %4531 = vrcp.f32 %v5834_v22  ;;  %v3030_v47 = vsub.f32 %v5707_v39, %v3009_v54  ;;  %v3148_v46 = vmul.f32 1.442695, %v3060_v28  ;;  %v3046_v25 = vsub.f32 %v5733_v15, %v3009_v54 }
 0x502   : > { %v5851_v34 = vpop.eup %4513  ;;  %v5854_v12 = vadd.f32 %v5842_v42, %v3170_v23  ;;  %4533 = vpow2.f32 %v3144_v58  ;;  %v3086_v58 = vmul.f32 1.442695, %v3029_v14  ;;  %v5867_v7 = vmul.f32 1.442695, %v3045_v61 }
 0x503   : > { %v5857_v9 = vpop.eup %4515  ;;  %v3172_v30 = vadd.f32 %v5851_v34, %v5846_v33  ;;  %4535 = vpow2.f32 %v3082_v27  ;;  %v3062_v39 = vsub.f32 %v2972_v38, %v3009_v54  ;;  %v5872_v49 = vmul.f32 1.442695, %v3061_v19 }
 0x504   : > { %v5864_v2 = vpop.eup %4517  ;;  %4537 = vrcp.f32 %v5854_v12  ;;  %v3011_v15 = vmax.f32 %v3010_v32, %v2975_v8  ;;  %v5880_v14 = vmul.f32 1.442695, %v3030_v47  ;;  %v5895_v61 = vmul.f32 1.442695, %v3046_v25 }
 0x505   : > { %v4520_v23 = vpop.eup %4519  ;;  %v5870_v57 = vadd.f32 %v5857_v9, %v3172_v30  ;;  %4539 = vpow2.f32 %v3114_v10  ;;  %v5886_v30 = vmax.f32 %v3012_v29, %v5862_v20  ;;  %v5897_v19 = vmul.f32 1.442695, %v3062_v39 }
 0x506   : > { %v5877_v27 = vpop.eup %4521  ;;  %v3212_v28 = vmul.f32 %v4520_v23, %v5801_v35  ;;  %4541 = vpow2.f32 %v3146_v60  ;;  %v3031_v10 = vsub.f32 %v5709_v52, %v3011_v15  ;;  %v3047_v35 = vsub.f32 %v5735_v26, %v3011_v15 }
 0x507   : > { %v5888_v38 = vpop.eup %4523  ;;  %4543 = vrcp.f32 %v5870_v57  ;;  %v3174_v32 = vadd.f32 %v5877_v27, %v5864_v2  ;;  %v3063_v0 = vsub.f32 %v2975_v8, %v3011_v15 }
 0x508   : > { %v4526_v54 = vpop.eup %4525  ;;  %v3228_v60 = vsub.f32 2.0, %v3212_v28  ;;  %4545 = vpow2.f32 %v3084_v51  ;;  %v5907_v26 = vmul.f32 1.442695, %v3031_v10  ;;  %v5914_v28 = vmul.f32 1.442695, %v3047_v35 }
 0x509   : > { %v5899_v29 = vpop.eup %4527  ;;  %v3213_v47 = vmul.f32 %v4526_v54, %v5818_v1  ;;  %v5903_v5 = vadd.f32 %v5888_v38, %v3174_v32  ;;  %4547 = vpow2.f32 %v3116_v21  ;;  %v6466_v51 = vmax.f32 %v5242_v59, 0.0 }
 0x50a   : > { %v5905_v16 = vpop.eup %4529  ;;  %v3244_v52 = vmul.f32 %v4520_v23, %v3228_v60  ;;  %4549 = vpow2.f32 %v3148_v46  ;;  %6465 = vst [vmem:[#allocation49_spill] sm:$0xff] %v5914_v28 }
 0x50b   : > { %v4532_v25 = vpop.eup %4531  ;;  %v3229_v39 = vsub.f32 2.0, %v3213_v47  ;;  %4551 = vrcp.f32 %v5903_v5  ;;  %v3176_v1 = vadd.f32 %v5905_v16, %v5899_v29  ;;  %v5927_v47 = vmul.f32 1.442695, %v3063_v0 }
 0x50c   : > { %v5916_v21 = vpop.eup %4533  ;;  %v3260_v8 = vmul.f32 %v5778_v3, %v3244_v52  ;;  %v3276_v46 = vmul.f32 %v5785_v31, %v3244_v52  ;;  %v3292_v23 = vmul.f32 %v5789_v11, %v3244_v52  ;;  %v3214_v15 = vmul.f32 %v4532_v25, %v5834_v22 }
 0x50d   : > { %v5922_v32 = vpop.eup %4535  ;;  %v3245_v10 = vmul.f32 %v4526_v54, %v3229_v39  ;;  %v5925_v60 = vadd.f32 %v5916_v21, %v3176_v1  ;;  %4553 = vpow2.f32 %v3086_v58  ;;  %v6467_v3 = vmax.f32 %v5354_v44, 0.0 }
 0x50e   : > { %v4538_v35 = vpop.eup %4537  ;;  %v3308_v6 = vmul.f32 %v3260_v8, %v6466_v51  ;;  %v6468_v11 = vmax.f32 %v5466_v36, 0.0  ;;  %v3230_v22 = vsub.f32 2.0, %v3214_v15 }
 0x50f   : > { %v3324_v31 = vmul.f32 %v3276_v46, %v6467_v3  ;;  %v5935_v28 = vpop.eup %4539  ;;  %v3261_v54 = vmul.f32 %v5795_v45, %v3245_v10  ;;  %v3277_v39 = vmul.f32 %v5798_v37, %v3245_v10  ;;  %v3293_v0 = vmul.f32 %v5804_v48, %v3245_v10 }
 0x510   : > { %v3340_v52 = vmul.f32 %v3292_v23, %v6468_v11  ;;  %v3215_v58 = vmul.f32 %v4538_v35, %v5854_v12  ;;  %v5941_v1 = vpop.eup %4541  ;;  %v3356_v59 = vsel %vm1637_vm2, %v3308_v6, 0.0  ;;  %v3246_v51 = vmul.f32 %v4532_v25, %v3230_v22 }
 0x511   : > { %v3357_v44 = vsel %vm1637_vm2, %v3324_v31, 0.0  ;;  %v4544_v8 = vpop.eup %4543  ;;  %v6469_v23 = vmax.f32 %v5239_v56, 0.0  ;;  %v6470_v37 = vmax.f32 %v5351_v41, 0.0  ;;  %v6471_v48 = vmax.f32 %v5463_v43, 0.0 }
 0x512   : > { %v3359_v36 = vsel %vm1637_vm2, %v3340_v52, 0.0  ;;  %v3358_v46 = vadd.f32 %v3357_v44, %v3356_v59  ;;  %v5952_v10 = vpop.eup %4545  ;;  %v3262_v6 = vmul.f32 %v5811_v18, %v3246_v51  ;;  %v3278_v3 = vmul.f32 %v5815_v62, %v3246_v51 }
 0x513   : > { %v3309_v45 = vmul.f32 %v3261_v54, %v6469_v23  ;;  %v3325_v15 = vmul.f32 %v3277_v39, %v6470_v37  ;;  %v3341_v12 = vmul.f32 %v3293_v0, %v6471_v48  ;;  %v3294_v25 = vmul.f32 %v5822_v24, %v3246_v51  ;;  %v5957_v11 = vpop.eup %4547  ;;  %v6474_v24 = vld [vmem:[#allocation32_spill] sm:$0xff] }
 0x514   : > { %v3231_v31 = vsub.f32 2.0, %v3215_v58  ;;  %v3360_v56 = vadd.f32 %v3359_v36, %v3358_v46  ;;  %v5962_v22 = vpop.eup %4549  ;;  %v6472_v39 = vmax.f32 %v5256_v4, 0.0  ;;  %v6473_v62 = vmax.f32 %v5368_v50, 0.0 }
 0x515   : > { %v3361_v52 = vsel %vm1637_vm2, %v3309_v45, 0.0  ;;  %v3362_v41 = vsel %vm1637_vm2, %v3325_v15, 0.0  ;;  %v3364_v43 = vsel %vm1637_vm2, %v3341_v12, 0.0  ;;  %v6475_v58 = vmax.f32 %v6474_v24, 0.0  ;;  %v4552_v44 = vpop.eup %4551 }
 0x516   : > { %v3363_v54 = vadd.f32 %v3362_v41, %v3361_v52  ;;  %v3310_v18 = vmul.f32 %v3262_v6, %v6472_v39  ;;  %v3326_v0 = vmul.f32 %v3278_v3, %v6473_v62  ;;  %3436 = vst.msk [vmem:[%s4800_s20] sm:$0xff] %vm1637_vm2, %v3360_v56  ;;  %v3247_v36 = vmul.f32 %v4538_v35, %v3231_v31  ;;  %v6476_v56 = vld [vmem:[#allocation5_spill] sm:$0xff] }
 0x517   : > { %v3342_v59 = vmul.f32 %v3294_v25, %v6475_v58  ;;  %v3216_v51 = vmul.f32 %v4544_v8, %v5870_v57  ;;  %4555 = vrcp.f32 %v5925_v60  ;;  %v3178_v46 = vadd.f32 %v5935_v28, %v5922_v32  ;;  %v5979_v37 = vpop.eup %4553 }
 0x518   : > { %v3365_v4 = vadd.f32 %v3364_v43, %v3363_v54  ;;  %v3366_v23 = vsel %vm1637_vm2, %v3310_v18, 0.0  ;;  %v3367_v50 = vsel %vm1637_vm2, %v3326_v0, 0.0  ;;  %v3263_v48 = vmul.f32 %v5826_v13, %v3247_v36  ;;  %v6478_v13 = vld [vmem:[#allocation18_spill] sm:$0xff] }
 0x519   : > { %v3369_v45 = vsel %vm1637_vm2, %v3342_v59, 0.0  ;;  %v3368_v15 = vadd.f32 %v3367_v50, %v3366_v23  ;;  %v3279_v57 = vmul.f32 %v5831_v63, %v3247_v36  ;;  %v3295_v35 = vmul.f32 %v5842_v42, %v3247_v36  ;;  %v6480_v63 = vld [vmem:[#allocation31_spill] sm:$0xff] }
 0x51a   : > { %3437 = vst.msk [vmem:[%s4800_s20 + $0x8] sm:$0xff] %vm1637_vm2, %v3365_v4  ;;  %v3232_v12 = vsub.f32 2.0, %v3216_v51  ;;  %v3217_v6 = vmul.f32 %v4552_v44, %v5903_v5  ;;  %v3179_v3 = vadd.f32 %v5941_v1, %v3178_v46  ;;  %v3180_v25 = vadd.f32 %v5957_v11, %v5952_v10  ;;  %v6482_v50 = vld [vmem:[#allocation7_spill] sm:$0xff] }
 0x51b   : > { %v3370_v31 = vadd.f32 %v3369_v45, %v3368_v15  ;;  %v6477_v52 = vmax.f32 %v6476_v56, 0.0  ;;  %v6479_v43 = vmax.f32 %v6478_v13, 0.0  ;;  %v6481_v39 = vmax.f32 %v6480_v63, 0.0  ;;  %v6484_v15 = vld [vmem:[#allocation20_spill] sm:$0xff] }
 0x51c   : > { %v3248_v18 = vmul.f32 %v4544_v8, %v3232_v12  ;;  %v3233_v62 = vsub.f32 2.0, %v3217_v6  ;;  %4557 = vrcp.f32 %v3179_v3  ;;  %v5997_v5 = vadd.f32 %v5962_v22, %v3180_v25 }
 0x51d   : > { %v3311_v41 = vmul.f32 %v3263_v48, %v6477_v52  ;;  %v3327_v54 = vmul.f32 %v3279_v57, %v6479_v43  ;;  %v3343_v42 = vmul.f32 %v3295_v35, %v6481_v39  ;;  %3438 = vst.msk [vmem:[%s4800_s20 + $0x10] sm:$0xff] %vm1637_vm2, %v3370_v31  ;;  %4559 = vpow2.f32 %v5867_v7  ;;  %v6486_v57 = vld [vmem:[#allocation34_spill] sm:$0xff]  ;;  %v6027_v31 = vpop.xlane.xlu1 %2980  ;;  %v6491_v43 = vld [vmem:[#allocation19_spill] sm:$0xff] }
 0x51e   : > { %v3048_v58 = vsub.f32 %v5737_v55, %v5886_v30  ;;  %v3264_v36 = vmul.f32 %v5846_v33, %v3248_v18  ;;  %v3280_v8 = vmul.f32 %v5851_v34, %v3248_v18  ;;  %v3296_v51 = vmul.f32 %v5857_v9, %v3248_v18 }
 0x51f   : > { %v3371_v0 = vsel %vm1637_vm2, %v3311_v41, 0.0  ;;  %v3372_v24 = vsel %vm1637_vm2, %v3327_v54, 0.0  ;;  %v3374_v46 = vsel %vm1637_vm2, %v3343_v42, 0.0  ;;  %v3249_v4 = vmul.f32 %v4552_v44, %v3233_v62  ;;  %v6493_v54 = vld [vmem:[#allocation33_spill] sm:$0xff] }
 0x520   : > { %v3373_v59 = vadd.f32 %v3372_v24, %v3371_v0  ;;  %4561 = vrcp.f32 %v5997_v5  ;;  %v3064_v23 = vsub.f32 %v5862_v20, %v5886_v30  ;;  %v6483_v45 = vmax.f32 %v6482_v50, 0.0 }
 0x521   : > { %v6485_v48 = vmax.f32 %v6484_v15, 0.0  ;;  %v6487_v34 = vmax.f32 %v6486_v57, 0.0  ;;  %v4556_v12 = vpop.eup %4555  ;;  %v3265_v9 = vmul.f32 %v5864_v2, %v3249_v4  ;;  %v3281_v44 = vmul.f32 %v5877_v27, %v3249_v4  ;;  %v6489_v27 = vld [vmem:[#allocation6_spill] sm:$0xff] }
 0x522   : > { %v3375_v7 = vadd.f32 %v3374_v46, %v3373_v59  ;;  %v3312_v55 = vmul.f32 %v3264_v36, %v6483_v45  ;;  %v3297_v6 = vmul.f32 %v5888_v38, %v3249_v4  ;;  %v6488_v20 = vsub.f32 %v5711_v17, %v5886_v30 }
 0x523   : > { %v3328_v33 = vmul.f32 %v3280_v8, %v6485_v48  ;;  %v3344_v35 = vmul.f32 %v3296_v51, %v6487_v34  ;;  %v3218_v41 = vmul.f32 %v4556_v12, %v5925_v60  ;;  %4563 = vpow2.f32 %v5872_v49  ;;  %v6500_v34 = vld [vmem:[#allocation36_spill] sm:$0xff] }
 0x524   : > { %v6025_v25 = vmul.f32 1.442695, %v6488_v20  ;;  %3439 = vst.msk [vmem:[%s4800_s20 + $0x18] sm:$0xff] %vm1637_vm2, %v3375_v7  ;;  %v3376_v56 = vsel %vm1637_vm2, %v3312_v55, 0.0  ;;  %v6490_v38 = vmax.f32 %v6489_v27, 0.0  ;;  %v6492_v17 = vmax.f32 %v6491_v43, 0.0 }
 0x525   : > { %v3377_v52 = vsel %vm1637_vm2, %v3328_v33, 0.0  ;;  %v6494_v63 = vmax.f32 %v6493_v54, 0.0  ;;  %v3379_v42 = vsel %vm1637_vm2, %v3344_v35, 0.0  ;;  %v3234_v18 = vsub.f32 2.0, %v3218_v41  ;;  %v6504_v54 = vld [vmem:[#allocation47_spill] sm:$0xff] }
 0x526   : > { %v3378_v2 = vadd.f32 %v3377_v52, %v3376_v56  ;;  %v3313_v13 = vmul.f32 %v3265_v9, %v6490_v38  ;;  %v3329_v30 = vmul.f32 %v3281_v44, %v6492_v17  ;;  %4565 = vpow2.f32 %v5880_v14  ;;  %v4558_v36 = vpop.eup %4557  ;;  %v6502_v44 = vld [vmem:[#allocation49_spill] sm:$0xff] }
 0x527   : > { %v3345_v39 = vmul.f32 %v3297_v6, %v6494_v63  ;;  %v6495_v49 = vmax.f32 %v5713_v53, %v5739_v40  ;;  %v6051_v59 = vmul.f32 1.442695, %v3048_v58  ;;  %v3250_v51 = vmul.f32 %v4556_v12, %v3234_v18  ;;  %v6056_v14 = vpop.eup %4559  ;;  %v6084_v6 = vpop.xlane.xlu0 %2983  ;;  %v6506_v18 = vld [vmem:[#allocation8_spill] sm:$0xff] }
 0x528   : > { %v3380_v62 = vadd.f32 %v3379_v42, %v3378_v2  ;;  %v3381_v0 = vsel %vm1637_vm2, %v3313_v13, 0.0  ;;  %v3382_v24 = vsel %vm1637_vm2, %v3329_v30, 0.0  ;;  %4567 = vpow2.f32 %v5895_v61  ;;  %v6503_v30 = vld [vmem:[#allocation45_spill] sm:$0xff] }
 0x529   : > { %v6047_v60 = vmax.f32 %v6495_v49, %v6027_v31  ;;  %v3383_v8 = vadd.f32 %v3382_v24, %v3381_v0  ;;  %v6054_v46 = vmul.f32 1.442695, %v3064_v23  ;;  %v3384_v4 = vsel %vm1637_vm2, %v3345_v39, 0.0 }
 0x52a   : > { %3440 = vst.msk [vmem:[%s4800_s20 + $0x20] sm:$0xff] %vm1637_vm2, %v3380_v62  ;;  %v3219_v7 = vmul.f32 %v4558_v36, %v3179_v3  ;;  %4569 = vpow2.f32 %v5897_v19  ;;  %v3266_v45 = vmul.f32 %v5899_v29, %v3250_v51  ;;  %v3282_v61 = vmul.f32 %v5905_v16, %v3250_v51  ;;  %v4562_v55 = vpop.eup %4561  ;;  %v6498_v29 = vld [vmem:[#allocation22_spill] sm:$0xff]  ;;  %v6510_v62 = vld [vmem:[#allocation35_spill] sm:$0xff] }
 0x52b   : > { %v3033_v58 = vsub.f32 %v5713_v53, %v6047_v60  ;;  %v3385_v50 = vadd.f32 %v3384_v4, %v3383_v8  ;;  %v3298_v23 = vmul.f32 %v5916_v21, %v3250_v51  ;;  %v3182_v48 = vadd.f32 %v6056_v14, %v5979_v37  ;;  %v6496_v53 = vld [vmem:[#allocation9_spill] sm:$0xff] }
 0x52c   : > { %v3235_v15 = vsub.f32 2.0, %v3219_v7  ;;  %4571 = vpow2.f32 %v5907_v26  ;;  %v3049_v19 = vsub.f32 %v5739_v40, %v6047_v60  ;;  %v6497_v3 = vmax.f32 %v6496_v53, 0.0 }
 0x52d   : > { %3441 = vst.msk [vmem:[%s4800_s20 + $0x28] sm:$0xff] %vm1637_vm2, %v3385_v50  ;;  %v6499_v57 = vmax.f32 %v6498_v29, 0.0  ;;  %v6501_v21 = vmax.f32 %v6500_v34, 0.0  ;;  %v3220_v12 = vmul.f32 %v4562_v55, %v5997_v5  ;;  %4573 = vpow2.f32 %v6502_v44  ;;  %v6086_v20 = vpop.eup %4563 }
 0x52e   : > { %v3314_v33 = vmul.f32 %v3266_v45, %v6497_v3  ;;  %v3251_v9 = vmul.f32 %v4558_v36, %v3235_v15  ;;  %v3065_v26 = vsub.f32 %v6027_v31, %v6047_v60  ;;  %v3094_v40 = vmul.f32 1.442695, %v3033_v58 }
 0x52f   : > { %v3330_v16 = vmul.f32 %v3282_v61, %v6499_v57  ;;  %v3346_v35 = vmul.f32 %v3298_v23, %v6501_v21  ;;  %v3236_v2 = vsub.f32 2.0, %v3220_v12  ;;  %v3183_v17 = vadd.f32 %v6086_v20, %v3182_v48  ;;  %v6512_v23 = vld [vmem:[#allocation11_spill] sm:$0xff]  ;;  %v6516_v48 = vld [vmem:[#allocation38_spill] sm:$0xff] }
 0x530   : > { %v3386_v56 = vsel %vm1637_vm2, %v3314_v33, 0.0  ;;  %v3267_v5 = vmul.f32 %v5922_v32, %v3251_v9  ;;  %v3283_v38 = vmul.f32 %v5935_v28, %v3251_v9  ;;  %v3299_v13 = vmul.f32 %v5941_v1, %v3251_v9  ;;  %v6094_v31 = vpop.eup %4565  ;;  %v6508_v28 = vld [vmem:[#allocation21_spill] sm:$0xff] }
 0x531   : > { %v3387_v52 = vsel %vm1637_vm2, %v3330_v16, 0.0  ;;  %v3389_v41 = vsel %vm1637_vm2, %v3346_v35, 0.0  ;;  %v3252_v43 = vmul.f32 %v4562_v55, %v3236_v2  ;;  %4575 = vpow2.f32 %v5927_v47  ;;  %v2987_v16 = vpop.xlane.xlu1 %2986  ;;  %v6519_v2 = vld [vmem:[#allocation48_spill] sm:$0xff] }
 0x532   : > { %v3388_v27 = vadd.f32 %v3387_v52, %v3386_v56  ;;  %v6505_v63 = vmax.f32 %v6503_v30, %v6504_v54  ;;  %v6507_v32 = vmax.f32 %v6506_v18, 0.0  ;;  %v6509_v60 = vmax.f32 %v6508_v28, 0.0  ;;  %v6108_v36 = vpop.eup %4567 }
 0x533   : > { %v6511_v0 = vmax.f32 %v6510_v62, 0.0  ;;  %v3268_v8 = vmul.f32 %v5952_v10, %v3252_v43  ;;  %v3284_v47 = vmul.f32 %v5957_v11, %v3252_v43  ;;  %v3300_v51 = vmul.f32 %v5962_v22, %v3252_v43  ;;  %v6514_v11 = vld [vmem:[#allocation24_spill] sm:$0xff] }
 0x534   : > { %v3017_v39 = vmax.f32 %v6505_v63, %v6084_v6  ;;  %v3390_v42 = vadd.f32 %v3389_v41, %v3388_v27  ;;  %v3315_v49 = vmul.f32 %v3267_v5, %v6507_v32  ;;  %v3331_v1 = vmul.f32 %v3283_v38, %v6509_v60  ;;  %v6113_v4 = vpop.eup %4569  ;;  %v6518_v41 = vld [vmem:[#allocation46_spill] sm:$0xff] }
 0x535   : > { %v3347_v24 = vmul.f32 %v3299_v13, %v6511_v0  ;;  %4577 = vrcp.f32 %v3183_v17  ;;  %v3184_v50 = vadd.f32 %v6108_v36, %v6094_v31  ;;  %v3126_v45 = vmul.f32 1.442695, %v3049_v19 }
 0x536   : > { %3442 = vst.msk [vmem:[%s4800_s20 + $0x30] sm:$0xff] %vm1637_vm2, %v3390_v42  ;;  %v3391_v7 = vsel %vm1637_vm2, %v3315_v49, 0.0  ;;  %v3392_v58 = vsel %vm1637_vm2, %v3331_v1, 0.0  ;;  %v6513_v10 = vmax.f32 %v6512_v23, 0.0  ;;  %v6515_v15 = vmax.f32 %v6514_v11, 0.0  ;;  %v6127_v33 = vpop.eup %4571 }
 0x537   : > { %v3393_v61 = vadd.f32 %v3392_v58, %v3391_v7  ;;  %v6517_v53 = vmax.f32 %v6516_v48, 0.0  ;;  %v3394_v29 = vsel %vm1637_vm2, %v3347_v24, 0.0  ;;  %v3185_v57 = vadd.f32 %v6113_v4, %v3184_v50  ;;  %v6135_v9 = vpop.eup %4573 }
 0x538   : > { %v3316_v55 = vmul.f32 %v3268_v8, %v6513_v10  ;;  %v3332_v22 = vmul.f32 %v3284_v47, %v6515_v15  ;;  %4579 = vpow2.f32 %v6025_v25  ;;  %v3158_v19 = vmul.f32 1.442695, %v3065_v26  ;;  %v6523_v10 = vld [vmem:[#allocation23_spill] sm:$0xff] }
 0x539   : > { %v3348_v3 = vmul.f32 %v3300_v51, %v6517_v53  ;;  %v3395_v34 = vadd.f32 %v3394_v29, %v3393_v61  ;;  %v3034_v12 = vsub.f32 %v6503_v30, %v3017_v39  ;;  %4581 = vrcp.f32 %v3185_v57 }
 0x53a   : > { %v3396_v21 = vsel %vm1637_vm2, %v3316_v55, 0.0  ;;  %v3397_v35 = vsel %vm1637_vm2, %v3332_v22, 0.0  ;;  %v3050_v52 = vsub.f32 %v6504_v54, %v3017_v39  ;;  %v3186_v25 = vadd.f32 %v6135_v9, %v6127_v33 }
 0x53b   : > { %v3398_v44 = vadd.f32 %v3397_v35, %v3396_v21  ;;  %v3399_v56 = vsel %vm1637_vm2, %v3348_v3, 0.0  ;;  %3443 = vst.msk [vmem:[%s4800_s20 + $0x38] sm:$0xff] %vm1637_vm2, %v3395_v34  ;;  %4583 = vpow2.f32 %v6051_v59  ;;  %v3066_v26 = vsub.f32 %v6084_v6, %v3017_v39  ;;  %v6149_v13 = vpop.eup %4575 }
 0x53c   : > { %v6520_v27 = vmax.f32 %v6518_v41, %v6519_v2  ;;  %4585 = vpow2.f32 %v6054_v46  ;;  %v3096_v43 = vmul.f32 1.442695, %v3034_v12  ;;  %v3187_v59 = vadd.f32 %v6149_v13, %v3186_v25 }
 0x53d   : > { %v3400_v38 = vadd.f32 %v3399_v56, %v3398_v44  ;;  %4587 = vpow2.f32 %v3094_v40  ;;  %v3128_v6 = vmul.f32 1.442695, %v3050_v52  ;;  %v3160_v39 = vmul.f32 1.442695, %v3066_v26 }
 0x53e   : > { %v3019_v5 = vmax.f32 %v6520_v27, %v2987_v16  ;;  %4589 = vpow2.f32 %v3126_v45  ;;  %v6521_v45 = vld [vmem:[#allocation10_spill] sm:$0xff]  ;;  %v6524_v55 = vmax.f32 %v6523_v10, 0.0 }
 0x53f   : > { %3444 = vst.msk [vmem:[%s4800_s20 + $0x40] sm:$0xff] %vm1637_vm2, %v3400_v38  ;;  %v4578_v63 = vpop.eup %4577  ;;  %4591 = vpow2.f32 %v3158_v19  ;;  %v6522_v61 = vmax.f32 %v6521_v45, 0.0 }
 0x540   : > { %v3035_v30 = vsub.f32 %v6518_v41, %v3019_v5  ;;  %v3051_v54 = vsub.f32 %v6519_v2, %v3019_v5  ;;  %v3067_v42 = vsub.f32 %v2987_v16, %v3019_v5  ;;  %v3221_v18 = vmul.f32 %v4578_v63, %v3183_v17  ;;  %v6527_v41 = vld [vmem:[#allocation13_spill] sm:$0xff]  ;;  %v6529_v5 = vld [vmem:[#allocation26_spill] sm:$0xff] }
 0x541   : > { %4593 = vrcp.f32 %v3187_v59  ;;  %v6528_v2 = vmax.f32 %v6527_v41, 0.0  ;;  %v6541_v41 = vld [vmem:[#allocation28_spill] sm:$0xff] }
 0x542   : > { %v3098_v46 = vmul.f32 1.442695, %v3035_v30  ;;  %4595 = vpow2.f32 %v3096_v43  ;;  %v3130_v40 = vmul.f32 1.442695, %v3051_v54  ;;  %v6156_v32 = vpop.eup %4579  ;;  %v3237_v49 = vsub.f32 2.0, %v3221_v18 }
 0x543   : > { %4597 = vpow2.f32 %v3128_v6  ;;  %v3162_v28 = vmul.f32 1.442695, %v3067_v42  ;;  %v4582_v60 = vpop.eup %4581 }
 0x544   : > { %4599 = vpow2.f32 %v3160_v39  ;;  %v3253_v1 = vmul.f32 %v4578_v63, %v3237_v49  ;;  %v3222_v0 = vmul.f32 %v4582_v60, %v3185_v57 }
 0x545   : > { %4601 = vpow2.f32 %v3098_v46  ;;  %v6158_v62 = vpop.eup %4583 }
 0x546   : > { %4603 = vpow2.f32 %v3130_v40  ;;  %v6160_v24 = vpop.eup %4585  ;;  %v3269_v17 = vmul.f32 %v5979_v37, %v3253_v1  ;;  %v3285_v8 = vmul.f32 %v6056_v14, %v3253_v1  ;;  %v3301_v47 = vmul.f32 %v6086_v20, %v3253_v1  ;;  %v6525_v37 = vld [vmem:[#allocation37_spill] sm:$0xff] }
 0x547   : > { %v3188_v51 = vadd.f32 %v6158_v62, %v6156_v32  ;;  %v6167_v7 = vpop.eup %4587  ;;  %v3238_v58 = vsub.f32 2.0, %v3222_v0  ;;  %4605 = vpow2.f32 %v3162_v28  ;;  %v6526_v15 = vmax.f32 %v6525_v37, 0.0 }
 0x548   : > { %v6169_v50 = vpop.eup %4589  ;;  %v3317_v23 = vmul.f32 %v3269_v17, %v6522_v61  ;;  %v3333_v11 = vmul.f32 %v3285_v8, %v6524_v55  ;;  %v6535_v61 = vld [vmem:[#allocation25_spill] sm:$0xff]  ;;  %v6537_v55 = vld [vmem:[#allocation39_spill] sm:$0xff] }
 0x549   : > { %v3349_v14 = vmul.f32 %v3301_v47, %v6526_v15  ;;  %v3189_v20 = vadd.f32 %v6160_v24, %v3188_v51  ;;  %v6178_v22 = vpop.eup %4591  ;;  %v3254_v48 = vmul.f32 %v4582_v60, %v3238_v58  ;;  %v3190_v53 = vadd.f32 %v6169_v50, %v6167_v7  ;;  %v6533_v51 = vld [vmem:[#allocation12_spill] sm:$0xff] }
 0x54a   : > { %v3401_v29 = vsel %vm1637_vm2, %v3317_v23, 0.0  ;;  %v3402_v57 = vsel %vm1637_vm2, %v3333_v11, 0.0  ;;  %v6534_v58 = vmax.f32 %v6533_v51, 0.0  ;;  %v6536_v23 = vmax.f32 %v6535_v61, 0.0 }
 0x54b   : > { %v4594_v3 = vpop.eup %4593  ;;  %4607 = vrcp.f32 %v3189_v20  ;;  %v3403_v16 = vadd.f32 %v3402_v57, %v3401_v29  ;;  %v3270_v34 = vmul.f32 %v6094_v31, %v3254_v48  ;;  %v3286_v21 = vmul.f32 %v6108_v36, %v3254_v48  ;;  %v6531_v36 = vld [vmem:[#allocation40_spill] sm:$0xff] }
 0x54c   : > { %v6184_v19 = vpop.eup %4595  ;;  %v3302_v35 = vmul.f32 %v6113_v4, %v3254_v48  ;;  %v3404_v44 = vsel %vm1637_vm2, %v3349_v14, 0.0  ;;  %v3223_v56 = vmul.f32 %v4594_v3, %v3187_v59  ;;  %v3191_v52 = vadd.f32 %v6178_v22, %v3190_v53 }
 0x54d   : > { %v6189_v12 = vpop.eup %4597  ;;  %v3405_v26 = vadd.f32 %v3404_v44, %v3403_v16  ;;  %v3318_v27 = vmul.f32 %v3270_v34, %v6528_v2  ;;  %v6530_v31 = vmax.f32 %v6529_v5, 0.0  ;;  %v6532_v43 = vmax.f32 %v6531_v36, 0.0  ;;  %v6539_v44 = vld [vmem:[#allocation15_spill] sm:$0xff]  ;;  %v6543_v5 = vld [vmem:[#allocation42_spill] sm:$0xff] }
 0x54e   : > { %v6193_v25 = vpop.eup %4599  ;;  %v3239_v54 = vsub.f32 2.0, %v3223_v56  ;;  %4609 = vrcp.f32 %v3191_v52  ;;  %v3192_v59 = vadd.f32 %v6189_v12, %v6184_v19  ;;  %v6538_v11 = vmax.f32 %v6537_v55, 0.0 }
 0x54f   : > { %v3334_v38 = vmul.f32 %v3286_v21, %v6530_v31  ;;  %v3350_v30 = vmul.f32 %v3302_v35, %v6532_v43  ;;  %v6201_v4 = vpop.eup %4601  ;;  %3445 = vst.msk [vmem:[%s4800_s20 + $0x48] sm:$0xff] %vm1637_vm2, %v3405_v26  ;;  %v3406_v63 = vsel %vm1637_vm2, %v3318_v27, 0.0  ;;  %v6540_v56 = vmax.f32 %v6539_v44, 0.0 }
 0x550   : > { %v6205_v6 = vpop.eup %4603  ;;  %v3255_v18 = vmul.f32 %v4594_v3, %v3239_v54  ;;  %v3193_v46 = vadd.f32 %v6193_v25, %v3192_v59  ;;  %v6542_v2 = vmax.f32 %v6541_v41, 0.0  ;;  %v6544_v31 = vmax.f32 %v6543_v5, 0.0 }
 0x551   : > { %v3407_v39 = vsel %vm1637_vm2, %v3334_v38, 0.0  ;;  %v3194_v40 = vadd.f32 %v6205_v6, %v6201_v4  ;;  %v6214_v49 = vpop.eup %4605  ;;  %v3409_v28 = vsel %vm1637_vm2, %v3350_v30, 0.0 }
 0x552   : > { %v3408_v42 = vadd.f32 %v3407_v39, %v3406_v63  ;;  %v3271_v1 = vmul.f32 %v6127_v33, %v3255_v18  ;;  %v3287_v0 = vmul.f32 %v6135_v9, %v3255_v18  ;;  %v3303_v17 = vmul.f32 %v6149_v13, %v3255_v18 }
 0x553   : > { %4611 = vrcp.f32 %v3193_v46  ;;  %v3195_v8 = vadd.f32 %v6214_v49, %v3194_v40 }
 0x554   : > { %v3410_v60 = vadd.f32 %v3409_v28, %v3408_v42  ;;  %v3319_v45 = vmul.f32 %v3271_v1, %v6534_v58  ;;  %v3335_v10 = vmul.f32 %v3287_v0, %v6536_v23  ;;  %v3351_v33 = vmul.f32 %v3303_v17, %v6538_v11  ;;  %v6545_v42 = vld [vmem:[#allocation14_spill] sm:$0xff]  ;;  %v6549_v17 = vld [vmem:[#allocation41_spill] sm:$0xff] }
 0x555   : > { %v4608_v47 = vpop.eup %4607  ;;  %4613 = vrcp.f32 %v3195_v8  ;;  %v6546_v18 = vmax.f32 %v6545_v42, 0.0  ;;  %v6551_v11 = vld [vmem:[#allocation17_spill] sm:$0xff] }
 0x556   : > { %3446 = vst.msk [vmem:[%s4800_s20 + $0x50] sm:$0xff] %vm1637_vm2, %v3410_v60  ;;  %v3224_v37 = vmul.f32 %v4608_v47, %v3189_v20  ;;  %v3411_v9 = vsel %vm1637_vm2, %v3319_v45, 0.0  ;;  %v3412_v13 = vsel %vm1637_vm2, %v3335_v10, 0.0  ;;  %v3414_v53 = vsel %vm1637_vm2, %v3351_v33, 0.0  ;;  %v6547_v60 = vld [vmem:[#allocation27_spill] sm:$0xff] }
 0x557   : > { %v3413_v15 = vadd.f32 %v3412_v13, %v3411_v9  ;;  %v6548_v1 = vmax.f32 %v6547_v60, 0.0  ;;  %v6552_v33 = vmax.f32 %v6551_v11, 0.0  ;;  %v6553_v9 = vld [vmem:[#allocation30_spill] sm:$0xff] }
 0x558   : > { %v3240_v14 = vsub.f32 2.0, %v3224_v37  ;;  %v4610_v48 = vpop.eup %4609  ;;  %v6554_v13 = vmax.f32 %v6553_v9, 0.0 }
 0x559   : > { %v3415_v3 = vadd.f32 %v3414_v53, %v3413_v15  ;;  %v3225_v57 = vmul.f32 %v4610_v48, %v3191_v52 }
 0x55a   : > { %v3256_v29 = vmul.f32 %v4608_v47, %v3240_v14  ;;  %v6550_v47 = vmax.f32 %v6549_v17, 0.0 }
 0x55b   : > { %3447 = vst.msk [vmem:[%s4800_s20 + $0x58] sm:$0xff] %vm1637_vm2, %v3415_v3  ;;  %v3241_v21 = vsub.f32 2.0, %v3225_v57 }
 0x55c   : > { %v3272_v16 = vmul.f32 %v6156_v32, %v3256_v29  ;;  %v3288_v34 = vmul.f32 %v6158_v62, %v3256_v29  ;;  %v3304_v20 = vmul.f32 %v6160_v24, %v3256_v29 }
 0x55d   : > { %v4612_v35 = vpop.eup %4611  ;;  %v3257_v52 = vmul.f32 %v4610_v48, %v3241_v21  ;;  %v6555_v48 = vld [vmem:[#allocation44_spill] sm:$0xff] }
 0x55e   : > { %v3320_v26 = vmul.f32 %v3272_v16, %v6540_v56  ;;  %v3336_v27 = vmul.f32 %v3288_v34, %v6542_v2  ;;  %v3352_v38 = vmul.f32 %v3304_v20, %v6544_v31  ;;  %v3226_v36 = vmul.f32 %v4612_v35, %v3193_v46  ;;  %v6557_v34 = vld [vmem:[#allocation16_spill] sm:$0xff] }
 0x55f   : > { %v4614_v43 = vpop.eup %4613  ;;  %v3273_v24 = vmul.f32 %v6167_v7, %v3257_v52  ;;  %v3289_v54 = vmul.f32 %v6169_v50, %v3257_v52  ;;  %v3305_v59 = vmul.f32 %v6178_v22, %v3257_v52  ;;  %v6556_v53 = vmax.f32 %v6555_v48, 0.0 }
 0x560   : > { %v3416_v32 = vsel %vm1637_vm2, %v3320_v26, 0.0  ;;  %v3417_v62 = vsel %vm1637_vm2, %v3336_v27, 0.0  ;;  %v3242_v63 = vsub.f32 2.0, %v3226_v36  ;;  %v3419_v39 = vsel %vm1637_vm2, %v3352_v38, 0.0  ;;  %v6561_v26 = vld [vmem:[#allocation43_spill] sm:$0xff] }
 0x561   : > { %v3418_v30 = vadd.f32 %v3417_v62, %v3416_v32  ;;  %v3321_v40 = vmul.f32 %v3273_v24, %v6546_v18  ;;  %v3227_v46 = vmul.f32 %v4614_v43, %v3195_v8  ;;  %v3337_v0 = vmul.f32 %v3289_v54, %v6548_v1 }
 0x562   : > { %v3353_v51 = vmul.f32 %v3305_v59, %v6550_v47  ;;  %v3258_v7 = vmul.f32 %v4612_v35, %v3242_v63  ;;  %v6558_v20 = vmax.f32 %v6557_v34, 0.0  ;;  %v6559_v35 = vld [vmem:[#allocation29_spill] sm:$0xff] }
 0x563   : > { %v3420_v28 = vadd.f32 %v3419_v39, %v3418_v30  ;;  %v3421_v58 = vsel %vm1637_vm2, %v3321_v40, 0.0  ;;  %v3243_v50 = vsub.f32 2.0, %v3227_v46  ;;  %v3422_v22 = vsel %vm1637_vm2, %v3337_v0, 0.0 }
 0x564   : > { %v3274_v45 = vmul.f32 %v6184_v19, %v3258_v7  ;;  %v3290_v8 = vmul.f32 %v6189_v12, %v3258_v7  ;;  %v3423_v61 = vadd.f32 %v3422_v22, %v3421_v58  ;;  %v3306_v23 = vmul.f32 %v6193_v25, %v3258_v7 }
 0x565   : > { %3448 = vst.msk [vmem:[%s4800_s20 + $0x60] sm:$0xff] %vm1637_vm2, %v3420_v28  ;;  %v3259_v10 = vmul.f32 %v4614_v43, %v3243_v50  ;;  %v3424_v55 = vsel %vm1637_vm2, %v3353_v51, 0.0  ;;  %v6560_v44 = vmax.f32 %v6559_v35, 0.0 }
 0x566   : > { %v3322_v37 = vmul.f32 %v3274_v45, %v6552_v33  ;;  %v3338_v15 = vmul.f32 %v3290_v8, %v6554_v13  ;;  %v3425_v14 = vadd.f32 %v3424_v55, %v3423_v61  ;;  %v3354_v3 = vmul.f32 %v3306_v23, %v6556_v53 }
 0x567   : > { %v3275_v19 = vmul.f32 %v6201_v4, %v3259_v10  ;;  %v3291_v12 = vmul.f32 %v6205_v6, %v3259_v10  ;;  %v3307_v57 = vmul.f32 %v6214_v49, %v3259_v10  ;;  %v6562_v6 = vmax.f32 %v6561_v26, 0.0 }
 0x568   : > { %v3426_v25 = vsel %vm1637_vm2, %v3322_v37, 0.0  ;;  %v3427_v29 = vsel %vm1637_vm2, %v3338_v15, 0.0  ;;  %3449 = vst.msk [vmem:[%s4800_s20 + $0x68] sm:$0xff] %vm1637_vm2, %v3425_v14  ;;  %v3429_v4 = vsel %vm1637_vm2, %v3354_v3, 0.0 }
 0x569   : > { %v3428_v16 = vadd.f32 %v3427_v29, %v3426_v25  ;;  %v3323_v21 = vmul.f32 %v3275_v19, %v6558_v20  ;;  %v3339_v56 = vmul.f32 %v3291_v12, %v6560_v44  ;;  %v3355_v41 = vmul.f32 %v3307_v57, %v6562_v6 }
 0x56b   : > { %v3430_v2 = vadd.f32 %v3429_v4, %v3428_v16  ;;  %v3431_v27 = vsel %vm1637_vm2, %v3323_v21, 0.0  ;;  %v3432_v5 = vsel %vm1637_vm2, %v3339_v56, 0.0  ;;  %v3434_v31 = vsel %vm1637_vm2, %v3355_v41, 0.0 }
 0x56c   : > { %v3433_v49 = vadd.f32 %v3432_v5, %v3431_v27 }
 0x56d   : > { %3450 = vst.msk [vmem:[%s4800_s20 + $0x70] sm:$0xff] %vm1637_vm2, %v3430_v2 }
 0x56e   : > { %v3435_v38 = vadd.f32 %v3434_v31, %v3433_v49 }
 0x570   : > { %3451 = vst.msk [vmem:[%s4800_s20 + $0x78] sm:$0xff] %vm1637_vm2, %v3435_v38 }
 0x571 PF: > { %s19_s15 = sadd.s32 1, %s4669_s15   ;;  %s6563_s17 = sld [smem:[#allocation4_spill]] }
 0x572   : > { %p16_p0 = scmp.ge.s32.totalorder %s19_s15, 6   ;;  %s6564_s30 = smov %s4649_s10 }
 0x573   : > { %s6565_s10 = smov %s4773_s22  ;;  %s6566_s11 = smov %s4661_s13 }
 0x574   : > { %s6567_s12 = smov %s4665_s14  ;;  %s6568_s13 = smov %s6571_s16 }
 0x575   :  { %18 = sbr.rel (!%p16_p0) target bundleno = 6 (0x6), region = 143 }
 0x577   : > { %s6569_s14 = smov %s6563_s17 }

</bundles_post_ra>
